<compile_context>
chip_gen: v7x
topology: tpu7x:2x2x1
jax: 0.10.0
libtpu: 0.0.40
codegen_flags: <defaults>
</compile_context>

<pallas_src>
import functools

import jax
import jax.numpy as jnp
from jax.experimental import pallas as pl
from jax.experimental.pallas import tpu as pltpu

LANE = 128
BN_EPS = 1e-5


def _round_up(x, m):
    return (x + m - 1) // m * m


# ----------------------------------------------------------------------------
# BatchNorm (training-mode batch stats) + ReLU : two tiled Pallas passes
# ----------------------------------------------------------------------------
def _bn_stats_kernel(x_ref, sum_ref, ssq_ref):
    @pl.when(pl.program_id(0) == 0)
    def _():
        sum_ref[...] = jnp.zeros_like(sum_ref)
        ssq_ref[...] = jnp.zeros_like(ssq_ref)

    x = x_ref[...].astype(jnp.float32)
    sum_ref[...] += jnp.sum(x, axis=0, keepdims=True)
    ssq_ref[...] += jnp.sum(x * x, axis=0, keepdims=True)


def _bn_apply_relu_kernel(x_ref, scale_ref, shift_ref, o_ref):
    x = x_ref[...].astype(jnp.float32)
    y = x * scale_ref[...] + shift_ref[...]
    o_ref[...] = jnp.maximum(y, 0.0).astype(o_ref.dtype)


def bn_relu(x_nhwc, gamma_p, beta_p, out_dtype=jnp.bfloat16):
    """Training-mode BN (batch stats over N*H*W) + ReLU, channel-padded input."""
    N, H, W, CP = x_nhwc.shape
    M = N * H * W
    x2 = x_nhwc.reshape(M, CP)
    Mp = _round_up(M, 128)
    if Mp != M:
        x2 = jnp.pad(x2, ((0, Mp - M), (0, 0)))     # zero rows: no effect on sums
    tm = 512 if Mp % 512 == 0 else (256 if Mp % 256 == 0 else 128)
    grid = (Mp // tm,)

    s, ss = pl.pallas_call(
        _bn_stats_kernel,
        out_shape=(jax.ShapeDtypeStruct((1, CP), jnp.float32),
                   jax.ShapeDtypeStruct((1, CP), jnp.float32)),
        grid=grid,
        in_specs=[pl.BlockSpec((tm, CP), lambda i: (i, 0))],
        out_specs=(pl.BlockSpec((1, CP), lambda i: (0, 0)),
                   pl.BlockSpec((1, CP), lambda i: (0, 0))),
        compiler_params=pltpu.CompilerParams(dimension_semantics=("arbitrary",)),
    )(x2)

    # Tiny per-channel finalize (1 x 128) in plain JAX.
    mean = s / M
    var = ss / M - mean * mean                      # biased (training-mode) variance
    scale = gamma_p.reshape(1, CP) * jax.lax.rsqrt(var + BN_EPS)
    shift = beta_p.reshape(1, CP) - mean * scale

    y = pl.pallas_call(
        _bn_apply_relu_kernel,
        out_shape=jax.ShapeDtypeStruct((Mp, CP), out_dtype),
        grid=grid,
        in_specs=[pl.BlockSpec((tm, CP), lambda i: (i, 0)),
                  pl.BlockSpec((1, CP), lambda i: (0, 0)),
                  pl.BlockSpec((1, CP), lambda i: (0, 0))],
        out_specs=pl.BlockSpec((tm, CP), lambda i: (i, 0)),
        compiler_params=pltpu.CompilerParams(dimension_semantics=("parallel",)),
    )(x2, scale, shift)
    return y[:M].reshape(N, H, W, CP)


# ----------------------------------------------------------------------------
# Direct 3x3 conv (no im2col), fused residual add
# ----------------------------------------------------------------------------
def _conv3x3_kernel(*refs, stride, wo, has_res):
    n_rows = 3 * stride
    row_refs = refs[:n_rows]
    w_ref = refs[n_rows]
    res_ref = refs[n_rows + 1] if has_res else None
    o_ref = refs[-1]
    coutp = o_ref.shape[-1]

    acc = jnp.zeros((wo, coutp), jnp.float32)
    for kh in range(3):
        # One padded-input row per column-phase for this kh tap.
        phase_rows = [row_refs[kh * stride + p][...][0, 0] for p in range(stride)]
        for kw in range(3):
            p = kw % stride
            start = kw // stride
            a = phase_rows[p][start:start + wo, :]              # (wo, CP) bf16
            acc = acc + jnp.dot(a, w_ref[kh * 3 + kw],
                                preferred_element_type=jnp.float32)
    if has_res:
        acc = acc + res_ref[...][0, 0].astype(jnp.float32)
    o_ref[...] = acc.reshape(o_ref.shape).astype(o_ref.dtype)


def _make_row_spec(wph, cp, kh, stride):
    def imap(n, ho):
        return (n, stride * ho + kh, 0, 0)
    return pl.BlockSpec((1, 1, wph, cp), imap)


def conv3x3(phases, w_flat, stride, out_h, out_w, residual=None):
    """phases[p] = spatially-padded input[:, :, p::stride, :] (bf16).
       w_flat: (9, CP, CoutP) bf16, tap index kh*3+kw.  Output f32."""
    N, _, _, CP = phases[0].shape
    CoutP = w_flat.shape[-1]

    inputs, in_specs = [], []
    for kh in range(3):
        for p in range(stride):
            ph = phases[p]
            inputs.append(ph)
            in_specs.append(_make_row_spec(ph.shape[2], CP, kh, stride))
    inputs.append(w_flat)
    in_specs.append(pl.BlockSpec((9, CP, CoutP), lambda n, ho: (0, 0, 0)))
    if residual is not None:
        inputs.append(residual)
        in_specs.append(pl.BlockSpec((1, 1, out_w, CoutP),
                                     lambda n, ho: (n, ho, 0, 0)))

    kernel = functools.partial(_conv3x3_kernel, stride=stride, wo=out_w,
                               has_res=residual is not None)
    flops = 2 * N * out_h * out_w * 9 * CP * CoutP
    bytes_accessed = int(sum(x.size * x.dtype.itemsize for x in inputs)
                         + N * out_h * out_w * CoutP * 4)
    return pl.pallas_call(
        kernel,
        out_shape=jax.ShapeDtypeStruct((N, out_h, out_w, CoutP), jnp.float32),
        grid=(N, out_h),
        in_specs=in_specs,
        out_specs=pl.BlockSpec((1, 1, out_w, CoutP), lambda n, ho: (n, ho, 0, 0)),
        compiler_params=pltpu.CompilerParams(
            dimension_semantics=("parallel", "parallel")),
        cost_estimate=pl.CostEstimate(flops=flops, transcendentals=0,
                                      bytes_accessed=bytes_accessed),
    )(*inputs)


# ----------------------------------------------------------------------------
# 1x1 shortcut conv (stride handled by index_map + static slice: centre tap)
# ----------------------------------------------------------------------------
def _conv1x1_kernel(row_ref, w_ref, o_ref, *, wo, start):
    a = row_ref[...][0, 0][start:start + wo, :]
    out = jnp.dot(a, w_ref[...], preferred_element_type=jnp.float32)
    o_ref[...] = out.reshape(o_ref.shape).astype(o_ref.dtype)


def conv1x1_shortcut(phase, w, stride, out_h, out_w):
    """1x1 / stride-s conv on relu(bn1(x)).  `phase` is the centre-tap column
    phase of the same spatially-padded array used by conv1 (reused, no extra
    strided copy)."""
    N, _, Wph, CP = phase.shape
    CoutP = w.shape[-1]
    start = 1 // stride                         # centre-tap column offset in phase

    def row_imap(n, ho):
        return (n, stride * ho + 1, 0, 0)       # centre-tap row (never padding)

    kernel = functools.partial(_conv1x1_kernel, wo=out_w, start=start)
    return pl.pallas_call(
        kernel,
        out_shape=jax.ShapeDtypeStruct((N, out_h, out_w, CoutP), jnp.float32),
        grid=(N, out_h),
        in_specs=[pl.BlockSpec((1, 1, Wph, CP), row_imap),
                  pl.BlockSpec((CP, CoutP), lambda n, ho: (0, 0))],
        out_specs=pl.BlockSpec((1, 1, out_w, CoutP), lambda n, ho: (n, ho, 0, 0)),
        compiler_params=pltpu.CompilerParams(
            dimension_semantics=("parallel", "parallel")),
    )(phase, w)


# ----------------------------------------------------------------------------
# BasicBlock / NetworkBlock forward (channel-padded NHWC, CP = 128)
# ----------------------------------------------------------------------------
def basic_block(x_p, p, stride):
    N, H, W, CP = x_p.shape
    equal_in_out = p["ws"] is None
    assert not (equal_in_out and stride != 1), "identity shortcut needs stride 1"
    out_h = (H + 2 - 3) // stride + 1
    out_w = (W + 2 - 3) // stride + 1

    a = bn_relu(x_p, p["g1"], p["b1"])                        # relu(bn1(x)), bf16
    ap = jnp.pad(a, ((0, 0), (1, 1), (1, 1), (0, 0)))         # spatial zero-pad
    phases = [ap[:, :, q::stride, :] for q in range(stride)]  # column phases

    h = conv3x3(phases, p["w1"], stride, out_h, out_w)        # conv1, f32

    h2 = bn_relu(h, p["g2"], p["b2"])                         # relu(bn2(.)), bf16
    # TODO(synk): dropout (drop_rate > 0) not implemented; identity at 0.0.
    hp = jnp.pad(h2, ((0, 0), (1, 1), (1, 1), (0, 0)))

    if equal_in_out:
        res = x_p                                             # identity shortcut
    else:
        res = conv1x1_shortcut(phases[1 % stride], p["ws"], stride, out_h, out_w)

    # conv2 (stride 1) with the residual add fused in-kernel.
    out = conv3x3([hp], p["w2"], 1, out_h, out_w, residual=res)
    return out


def network_block(x_p, params, stride):
    out = x_p
    for i, p in enumerate(params):
        out = basic_block(out, p, stride if i == 0 else 1)
    return out


# ----------------------------------------------------------------------------
# Parameters (raw f32 for the reference, padded bf16/f32 for the kernels)
# ----------------------------------------------------------------------------
def init_params(key, nb_layers, in_planes, out_planes):
    raw = []
    for i in range(nb_layers):
        cin = in_planes if i == 0 else out_planes
        key, k1, k2, k3, k4, k5, k6, k7 = jax.random.split(key, 8)
        raw.append({
            "g1": 1.0 + 0.1 * jax.random.normal(k1, (cin,), jnp.float32),
            "b1": 0.1 * jax.random.normal(k2, (cin,), jnp.float32),
            "w1": jax.random.normal(k3, (3, 3, cin, out_planes), jnp.float32)
                  * (2.0 / (9 * out_planes)) ** 0.5,
            "g2": 1.0 + 0.1 * jax.random.normal(k4, (out_planes,), jnp.float32),
            "b2": 0.1 * jax.random.normal(k5, (out_planes,), jnp.float32),
            "w2": jax.random.normal(k6, (3, 3, out_planes, out_planes), jnp.float32)
                  * (2.0 / (9 * out_planes)) ** 0.5,
            "ws": (jax.random.normal(k7, (cin, out_planes), jnp.float32)
                   * (2.0 / out_planes) ** 0.5) if cin != out_planes else None,
        })
    return raw


def _pad_vec(v, cp):
    return jnp.pad(v, (0, cp - v.shape[0]))


def _pad_conv_w(w, cp):
    _, _, cin, cout = w.shape
    wp = jnp.pad(w, ((0, 0), (0, 0), (0, cp - cin), (0, cp - cout)))
    return wp.reshape(9, cp, cp).astype(jnp.bfloat16)


def pad_params(raw, cp=LANE):
    padded = []
    for p in raw:
        padded.append({
            "g1": _pad_vec(p["g1"], cp), "b1": _pad_vec(p["b1"], cp),
            "w1": _pad_conv_w(p["w1"], cp),
            "g2": _pad_vec(p["g2"], cp), "b2": _pad_vec(p["b2"], cp),
            "w2": _pad_conv_w(p["w2"], cp),
            "ws": None if p["ws"] is None else
                  jnp.pad(p["ws"], ((0, cp - p["ws"].shape[0]),
                                    (0, cp - p["ws"].shape[1]))).astype(jnp.bfloat16),
        })
    return padded


# ----------------------------------------------------------------------------
# Pure-JAX f32 reference
# ----------------------------------------------------------------------------
def _ref_bn_relu(x, g, b):
    mean = jnp.mean(x, axis=(0, 1, 2), keepdims=True)
    var = jnp.mean((x - mean) ** 2, axis=(0, 1, 2), keepdims=True)
    return jnp.maximum((x - mean) * jax.lax.rsqrt(var + BN_EPS) * g + b, 0.0)


def _ref_conv(x, w, stride, pad):
    return jax.lax.conv_general_dilated(
        x, w, (stride, stride), ((pad, pad), (pad, pad)),
        dimension_numbers=("NHWC", "HWIO", "NHWC"))


def _ref_block(x, p, stride):
    cin, cout = x.shape[-1], p["w1"].shape[-1]
    a = _ref_bn_relu(x, p["g1"], p["b1"])
    h = _ref_conv(a, p["w1"], stride, 1)
    h = _ref_bn_relu(h, p["g2"], p["b2"])
    res = x if cin == cout else _ref_conv(a, p["ws"].reshape(1, 1, cin, cout), stride, 0)
    return _ref_conv(h, p["w2"], 1, 1) + res


def _ref_network_block(x, params, stride):
    out = x
    for i, p in enumerate(params):
        out = _ref_block(out, p, stride if i == 0 else 1)
    return out


# ----------------------------------------------------------------------------
if __name__ == "__main__":
    # NetworkBlock(nb_layers=2, in_planes=4, out_planes=16, block=BasicBlock,
    #              stride=2, drop_rate=0.0)
    nb_layers, in_planes, out_planes, stride = 2, 4, 16, 2

    key = jax.random.PRNGKey(0)
    kx, kp = jax.random.split(key)
    x_nchw = jax.random.normal(kx, (2, in_planes, 16, 16), jnp.float32)  # NCHW
    raw_params = init_params(kp, nb_layers, in_planes, out_planes)

    x_nhwc = jnp.transpose(x_nchw, (0, 2, 3, 1))                          # NHWC
    x_pad = jnp.pad(x_nhwc, ((0, 0), (0, 0), (0, 0), (0, LANE - in_planes)))
    params = pad_params(raw_params)

    fwd = jax.jit(functools.partial(network_block, stride=stride))
    out_p = jax.block_until_ready(fwd(x_pad, params))

    out_nchw = jnp.transpose(out_p[..., :out_planes], (0, 3, 1, 2))       # NCHW
    assert out_nchw.shape == (2, out_planes, 8, 8), out_nchw.shape
    assert bool(jnp.all(jnp.isfinite(out_nchw)))

    ref = jnp.transpose(_ref_network_block(x_nhwc, raw_params, stride), (0, 3, 1, 2))
    err = float(jnp.max(jnp.abs(out_nchw - ref)))
    scale = float(jnp.max(jnp.abs(ref)))
    assert err <= 5e-2 * max(scale, 1.0), (err, scale)   # bf16 matmul tolerance

    print("KERNEL_OK")
</pallas_src>

<mosaic_0001>
module attributes {stable_mosaic.version = 11 : i64} {
  func.func @_bn_apply_relu_kernel(%arg0: i32, %arg1: memref<512x128xf32, #tpu.memory_space<vmem>>, %arg2: memref<1x128xf32, #tpu.memory_space<vmem>>, %arg3: memref<1x128xf32, #tpu.memory_space<vmem>>, %arg4: memref<512x128xbf16, #tpu.memory_space<vmem>>) attributes {dimension_semantics = [#tpu.dimension_semantics<parallel>], iteration_bounds = array<i64: 1>, scalar_prefetch = 0 : i64, scratch_operands = 0 : i64, tpu.core_type = #tpu.core_type<tc>, window_params = [{transform_indices = @transform_0, window_bounds = array<i64: 512, 128>}, {pipeline_mode = #tpu.pipeline_mode<synchronous>, transform_indices = @transform_1, window_bounds = array<i64: 1, 128>}, {pipeline_mode = #tpu.pipeline_mode<synchronous>, transform_indices = @transform_2, window_bounds = array<i64: 1, 128>}, {transform_indices = @transform_3, window_bounds = array<i64: 512, 128>}]} {
    %c0 = arith.constant 0 : index
    %c0_0 = arith.constant 0 : index
    %0 = vector.load %arg1[%c0, %c0_0] : memref<512x128xf32, #tpu.memory_space<vmem>>, vector<512x128xf32>
    %c0_1 = arith.constant 0 : index
    %c0_2 = arith.constant 0 : index
    %1 = vector.load %arg2[%c0_1, %c0_2] : memref<1x128xf32, #tpu.memory_space<vmem>>, vector<1x128xf32>
    %2 = vector.broadcast %1 : vector<1x128xf32> to vector<512x128xf32>
    %3 = arith.mulf %0, %2 : vector<512x128xf32>
    %c0_3 = arith.constant 0 : index
    %c0_4 = arith.constant 0 : index
    %4 = vector.load %arg3[%c0_3, %c0_4] : memref<1x128xf32, #tpu.memory_space<vmem>>, vector<1x128xf32>
    %5 = vector.broadcast %4 : vector<1x128xf32> to vector<512x128xf32>
    %6 = arith.addf %3, %5 : vector<512x128xf32>
    %cst = arith.constant 0.000000e+00 : f32
    %7 = vector.broadcast %cst : f32 to vector<512x128xf32>
    %8 = arith.maximumf %6, %7 : vector<512x128xf32>
    %9 = arith.truncf %8 : vector<512x128xf32> to vector<512x128xbf16>
    %c0_5 = arith.constant 0 : index
    %c0_6 = arith.constant 0 : index
    %10 = vector.load %arg4[%c0_5, %c0_6] : memref<512x128xbf16, #tpu.memory_space<vmem>>, vector<512x128xbf16>
    tpu.vector_store %arg4[%c0_5, %c0_6], %9 {strides = array<i32>} : memref<512x128xbf16, #tpu.memory_space<vmem>>, vector<512x128xbf16>,
    return
  }
  func.func @transform_0(%arg0: i32) -> (i32, i32) {
    %c0_i32 = arith.constant 0 : i32
    %c0_i32_0 = arith.constant 0 : i32
    return %arg0, %c0_i32 : i32, i32
  }
  func.func @transform_1(%arg0: i32) -> (i32, i32) {
    %c0_i32 = arith.constant 0 : i32
    %c0_i32_0 = arith.constant 0 : i32
    %c0_i32_1 = arith.constant 0 : i32
    return %c0_i32, %c0_i32_0 : i32, i32
  }
  func.func @transform_2(%arg0: i32) -> (i32, i32) {
    %c0_i32 = arith.constant 0 : i32
    %c0_i32_0 = arith.constant 0 : i32
    %c0_i32_1 = arith.constant 0 : i32
    return %c0_i32, %c0_i32_0 : i32, i32
  }
  func.func @transform_3(%arg0: i32) -> (i32, i32) {
    %c0_i32 = arith.constant 0 : i32
    %c0_i32_0 = arith.constant 0 : i32
    return %arg0, %c0_i32 : i32, i32
  }
}

module attributes {stable_mosaic.version = 11 : i64} {
  func.func @_bn_stats_kernel(%arg0: i32, %arg1: memref<512x128xf32, #tpu.memory_space<vmem>>, %arg2: memref<1x128xf32, #tpu.memory_space<vmem>>, %arg3: memref<1x128xf32, #tpu.memory_space<vmem>>) attributes {dimension_semantics = [#tpu.dimension_semantics<arbitrary>], iteration_bounds = array<i64: 1>, scalar_prefetch = 0 : i64, scratch_operands = 0 : i64, tpu.core_type = #tpu.core_type<tc>, window_params = [{transform_indices = @transform_0, window_bounds = array<i64: 512, 128>}, {pipeline_mode = #tpu.pipeline_mode<synchronous>, transform_indices = @transform_1, window_bounds = array<i64: 1, 128>}, {pipeline_mode = #tpu.pipeline_mode<synchronous>, transform_indices = @transform_2, window_bounds = array<i64: 1, 128>}]} {
    %c0_i32 = arith.constant 0 : i32
    %0 = arith.cmpi eq, %arg0, %c0_i32 : i32
    %1 = arith.extui %0 : i1 to i32
    %c0_i32_0 = arith.constant 0 : i32
    %2 = arith.cmpi ne, %1, %c0_i32_0 : i32
    scf.if %2 {
      %cst_11 = arith.constant 0.000000e+00 : f32
      %15 = vector.broadcast %cst_11 : f32 to vector<1x128xf32>
      %c0_12 = arith.constant 0 : index
      %c0_13 = arith.constant 0 : index
      %16 = vector.load %arg2[%c0_12, %c0_13] : memref<1x128xf32, #tpu.memory_space<vmem>>, vector<1x128xf32>
      tpu.vector_store %arg2[%c0_12, %c0_13], %15 {strides = array<i32>} : memref<1x128xf32, #tpu.memory_space<vmem>>, vector<1x128xf32>,
      %cst_14 = arith.constant 0.000000e+00 : f32
      %17 = vector.broadcast %cst_14 : f32 to vector<1x128xf32>
      %c0_15 = arith.constant 0 : index
      %c0_16 = arith.constant 0 : index
      %18 = vector.load %arg3[%c0_15, %c0_16] : memref<1x128xf32, #tpu.memory_space<vmem>>, vector<1x128xf32>
      tpu.vector_store %arg3[%c0_15, %c0_16], %17 {strides = array<i32>} : memref<1x128xf32, #tpu.memory_space<vmem>>, vector<1x128xf32>,
    } else {
    }
    %c0 = arith.constant 0 : index
    %c0_1 = arith.constant 0 : index
    %3 = vector.load %arg1[%c0, %c0_1] : memref<512x128xf32, #tpu.memory_space<vmem>>, vector<512x128xf32>
    %c0_2 = arith.constant 0 : index
    %c0_3 = arith.constant 0 : index
    %4 = vector.load %arg2[%c0_2, %c0_3] : memref<1x128xf32, #tpu.memory_space<vmem>>, vector<1x128xf32>
    %cst = arith.constant dense<0.000000e+00> : vector<128xf32>
    %5 = vector.multi_reduction <add>, %3, %cst [0] : vector<512x128xf32> to vector<128xf32>
    %6 = vector.shape_cast %5 : vector<128xf32> to vector<1x128xf32>
    %7 = arith.addf %4, %6 : vector<1x128xf32>
    %c0_4 = arith.constant 0 : index
    %c0_5 = arith.constant 0 : index
    %8 = vector.load %arg2[%c0_4, %c0_5] : memref<1x128xf32, #tpu.memory_space<vmem>>, vector<1x128xf32>
    tpu.vector_store %arg2[%c0_4, %c0_5], %7 {strides = array<i32>} : memref<1x128xf32, #tpu.memory_space<vmem>>, vector<1x128xf32>,
    %c0_6 = arith.constant 0 : index
    %c0_7 = arith.constant 0 : index
    %9 = vector.load %arg3[%c0_6, %c0_7] : memref<1x128xf32, #tpu.memory_space<vmem>>, vector<1x128xf32>
    %10 = arith.mulf %3, %3 : vector<512x128xf32>
    %cst_8 = arith.constant dense<0.000000e+00> : vector<128xf32>
    %11 = vector.multi_reduction <add>, %10, %cst_8 [0] : vector<512x128xf32> to vector<128xf32>
    %12 = vector.shape_cast %11 : vector<128xf32> to vector<1x128xf32>
    %13 = arith.addf %9, %12 : vector<1x128xf32>
    %c0_9 = arith.constant 0 : index
    %c0_10 = arith.constant 0 : index
    %14 = vector.load %arg3[%c0_9, %c0_10] : memref<1x128xf32, #tpu.memory_space<vmem>>, vector<1x128xf32>
    tpu.vector_store %arg3[%c0_9, %c0_10], %13 {strides = array<i32>} : memref<1x128xf32, #tpu.memory_space<vmem>>, vector<1x128xf32>,
    return
  }
  func.func @transform_0(%arg0: i32) -> (i32, i32) {
    %c0_i32 = arith.constant 0 : i32
    %c0_i32_0 = arith.constant 0 : i32
    return %arg0, %c0_i32 : i32, i32
  }
  func.func @transform_1(%arg0: i32) -> (i32, i32) {
    %c0_i32 = arith.constant 0 : i32
    %c0_i32_0 = arith.constant 0 : i32
    %c0_i32_1 = arith.constant 0 : i32
    return %c0_i32, %c0_i32_0 : i32, i32
  }
  func.func @transform_2(%arg0: i32) -> (i32, i32) {
    %c0_i32 = arith.constant 0 : i32
    %c0_i32_0 = arith.constant 0 : i32
    %c0_i32_1 = arith.constant 0 : i32
    return %c0_i32, %c0_i32_0 : i32, i32
  }
}

module attributes {stable_mosaic.version = 11 : i64} {
  func.func @_bn_stats_kernel(%arg0: i32, %arg1: memref<128x128xf32, #tpu.memory_space<vmem>>, %arg2: memref<1x128xf32, #tpu.memory_space<vmem>>, %arg3: memref<1x128xf32, #tpu.memory_space<vmem>>) attributes {dimension_semantics = [#tpu.dimension_semantics<arbitrary>], iteration_bounds = array<i64: 1>, scalar_prefetch = 0 : i64, scratch_operands = 0 : i64, tpu.core_type = #tpu.core_type<tc>, window_params = [{transform_indices = @transform_0, window_bounds = array<i64: 128, 128>}, {pipeline_mode = #tpu.pipeline_mode<synchronous>, transform_indices = @transform_1, window_bounds = array<i64: 1, 128>}, {pipeline_mode = #tpu.pipeline_mode<synchronous>, transform_indices = @transform_2, window_bounds = array<i64: 1, 128>}]} {
    %c0_i32 = arith.constant 0 : i32
    %0 = arith.cmpi eq, %arg0, %c0_i32 : i32
    %1 = arith.extui %0 : i1 to i32
    %c0_i32_0 = arith.constant 0 : i32
    %2 = arith.cmpi ne, %1, %c0_i32_0 : i32
    scf.if %2 {
      %cst_11 = arith.constant 0.000000e+00 : f32
      %15 = vector.broadcast %cst_11 : f32 to vector<1x128xf32>
      %c0_12 = arith.constant 0 : index
      %c0_13 = arith.constant 0 : index
      %16 = vector.load %arg2[%c0_12, %c0_13] : memref<1x128xf32, #tpu.memory_space<vmem>>, vector<1x128xf32>
      tpu.vector_store %arg2[%c0_12, %c0_13], %15 {strides = array<i32>} : memref<1x128xf32, #tpu.memory_space<vmem>>, vector<1x128xf32>,
      %cst_14 = arith.constant 0.000000e+00 : f32
      %17 = vector.broadcast %cst_14 : f32 to vector<1x128xf32>
      %c0_15 = arith.constant 0 : index
      %c0_16 = arith.constant 0 : index
      %18 = vector.load %arg3[%c0_15, %c0_16] : memref<1x128xf32, #tpu.memory_space<vmem>>, vector<1x128xf32>
      tpu.vector_store %arg3[%c0_15, %c0_16], %17 {strides = array<i32>} : memref<1x128xf32, #tpu.memory_space<vmem>>, vector<1x128xf32>,
    } else {
    }
    %c0 = arith.constant 0 : index
    %c0_1 = arith.constant 0 : index
    %3 = vector.load %arg1[%c0, %c0_1] : memref<128x128xf32, #tpu.memory_space<vmem>>, vector<128x128xf32>
    %c0_2 = arith.constant 0 : index
    %c0_3 = arith.constant 0 : index
    %4 = vector.load %arg2[%c0_2, %c0_3] : memref<1x128xf32, #tpu.memory_space<vmem>>, vector<1x128xf32>
    %cst = arith.constant dense<0.000000e+00> : vector<128xf32>
    %5 = vector.multi_reduction <add>, %3, %cst [0] : vector<128x128xf32> to vector<128xf32>
    %6 = vector.shape_cast %5 : vector<128xf32> to vector<1x128xf32>
    %7 = arith.addf %4, %6 : vector<1x128xf32>
    %c0_4 = arith.constant 0 : index
    %c0_5 = arith.constant 0 : index
    %8 = vector.load %arg2[%c0_4, %c0_5] : memref<1x128xf32, #tpu.memory_space<vmem>>, vector<1x128xf32>
    tpu.vector_store %arg2[%c0_4, %c0_5], %7 {strides = array<i32>} : memref<1x128xf32, #tpu.memory_space<vmem>>, vector<1x128xf32>,
    %c0_6 = arith.constant 0 : index
    %c0_7 = arith.constant 0 : index
    %9 = vector.load %arg3[%c0_6, %c0_7] : memref<1x128xf32, #tpu.memory_space<vmem>>, vector<1x128xf32>
    %10 = arith.mulf %3, %3 : vector<128x128xf32>
    %cst_8 = arith.constant dense<0.000000e+00> : vector<128xf32>
    %11 = vector.multi_reduction <add>, %10, %cst_8 [0] : vector<128x128xf32> to vector<128xf32>
    %12 = vector.shape_cast %11 : vector<128xf32> to vector<1x128xf32>
    %13 = arith.addf %9, %12 : vector<1x128xf32>
    %c0_9 = arith.constant 0 : index
    %c0_10 = arith.constant 0 : index
    %14 = vector.load %arg3[%c0_9, %c0_10] : memref<1x128xf32, #tpu.memory_space<vmem>>, vector<1x128xf32>
    tpu.vector_store %arg3[%c0_9, %c0_10], %13 {strides = array<i32>} : memref<1x128xf32, #tpu.memory_space<vmem>>, vector<1x128xf32>,
    return
  }
  func.func @transform_0(%arg0: i32) -> (i32, i32) {
    %c0_i32 = arith.constant 0 : i32
    %c0_i32_0 = arith.constant 0 : i32
    return %arg0, %c0_i32 : i32, i32
  }
  func.func @transform_1(%arg0: i32) -> (i32, i32) {
    %c0_i32 = arith.constant 0 : i32
    %c0_i32_0 = arith.constant 0 : i32
    %c0_i32_1 = arith.constant 0 : i32
    return %c0_i32, %c0_i32_0 : i32, i32
  }
  func.func @transform_2(%arg0: i32) -> (i32, i32) {
    %c0_i32 = arith.constant 0 : i32
    %c0_i32_0 = arith.constant 0 : i32
    %c0_i32_1 = arith.constant 0 : i32
    return %c0_i32, %c0_i32_0 : i32, i32
  }
}

module attributes {stable_mosaic.version = 11 : i64} {
  func.func @_conv3x3_kernel(%arg0: i32, %arg1: i32, %arg2: memref<1x1x9x128xbf16, #tpu.memory_space<vmem>>, %arg3: memref<1x1x9x128xbf16, #tpu.memory_space<vmem>>, %arg4: memref<1x1x9x128xbf16, #tpu.memory_space<vmem>>, %arg5: memref<1x1x9x128xbf16, #tpu.memory_space<vmem>>, %arg6: memref<1x1x9x128xbf16, #tpu.memory_space<vmem>>, %arg7: memref<1x1x9x128xbf16, #tpu.memory_space<vmem>>, %arg8: memref<9x128x128xbf16, #tpu.memory_space<vmem>>, %arg9: memref<1x1x8x128xf32, #tpu.memory_space<vmem>>) attributes {dimension_semantics = [#tpu.dimension_semantics<parallel>, #tpu.dimension_semantics<parallel>], iteration_bounds = array<i64: 2, 8>, scalar_prefetch = 0 : i64, scratch_operands = 0 : i64, tpu.core_type = #tpu.core_type<tc>, window_params = [{transform_indices = @transform_0, window_bounds = array<i64: 1, 1, 9, 128>}, {transform_indices = @transform_1, window_bounds = array<i64: 1, 1, 9, 128>}, {transform_indices = @transform_2, window_bounds = array<i64: 1, 1, 9, 128>}, {transform_indices = @transform_3, window_bounds = array<i64: 1, 1, 9, 128>}, {transform_indices = @transform_4, window_bounds = array<i64: 1, 1, 9, 128>}, {transform_indices = @transform_5, window_bounds = array<i64: 1, 1, 9, 128>}, {pipeline_mode = #tpu.pipeline_mode<synchronous>, transform_indices = @transform_6, window_bounds = array<i64: 9, 128, 128>}, {transform_indices = @transform_7, window_bounds = array<i64: 1, 1, 8, 128>}]} {
    %cst = arith.constant 0.000000e+00 : f32
    %0 = vector.broadcast %cst : f32 to vector<8x128xf32>
    %c0 = arith.constant 0 : index
    %c0_0 = arith.constant 0 : index
    %c0_1 = arith.constant 0 : index
    %c0_2 = arith.constant 0 : index
    %1 = vector.load %arg2[%c0, %c0_0, %c0_1, %c0_2] : memref<1x1x9x128xbf16, #tpu.memory_space<vmem>>, vector<1x1x9x128xbf16>
    %2 = vector.shape_cast %1 : vector<1x1x9x128xbf16> to vector<9x128xbf16>
    %c0_3 = arith.constant 0 : index
    %c0_4 = arith.constant 0 : index
    %c0_5 = arith.constant 0 : index
    %c0_6 = arith.constant 0 : index
    %3 = vector.load %arg3[%c0_3, %c0_4, %c0_5, %c0_6] : memref<1x1x9x128xbf16, #tpu.memory_space<vmem>>, vector<1x1x9x128xbf16>
    %4 = vector.shape_cast %3 : vector<1x1x9x128xbf16> to vector<9x128xbf16>
    %5 = vector.extract_strided_slice %2 {offsets = [0, 0], sizes = [8, 128], strides = [1, 1]} : vector<9x128xbf16> to vector<8x128xbf16>
    %c0_7 = arith.constant 0 : index
    %c0_8 = arith.constant 0 : index
    %c0_9 = arith.constant 0 : index
    %6 = vector.load %arg8[%c0_7, %c0_8, %c0_9] : memref<9x128x128xbf16, #tpu.memory_space<vmem>>, vector<1x128x128xbf16>
    %7 = vector.shape_cast %6 : vector<1x128x128xbf16> to vector<128x128xbf16>
    %cst_10 = arith.constant dense<0.000000e+00> : vector<8x128xf32>
    %8 = tpu.matmul %5, %7, %cst_10 {dimension_numbers = #tpu.dot_dimension_numbers<[1], [0], [0], [1], [0, 0, 1, 1], [], []>} : vector<8x128xbf16>, vector<128x128xbf16>, vector<8x128xf32> -> vector<8x128xf32>
    %9 = arith.addf %0, %8 : vector<8x128xf32>
    %10 = vector.extract_strided_slice %4 {offsets = [0, 0], sizes = [8, 128], strides = [1, 1]} : vector<9x128xbf16> to vector<8x128xbf16>
    %c1 = arith.constant 1 : index
    %c0_11 = arith.constant 0 : index
    %c0_12 = arith.constant 0 : index
    %11 = vector.load %arg8[%c1, %c0_11, %c0_12] : memref<9x128x128xbf16, #tpu.memory_space<vmem>>, vector<1x128x128xbf16>
    %12 = vector.shape_cast %11 : vector<1x128x128xbf16> to vector<128x128xbf16>
    %cst_13 = arith.constant dense<0.000000e+00> : vector<8x128xf32>
    %13 = tpu.matmul %10, %12, %cst_13 {dimension_numbers = #tpu.dot_dimension_numbers<[1], [0], [0], [1], [0, 0, 1, 1], [], []>} : vector<8x128xbf16>, vector<128x128xbf16>, vector<8x128xf32> -> vector<8x128xf32>
    %14 = arith.addf %9, %13 : vector<8x128xf32>
    %15 = vector.extract_strided_slice %2 {offsets = [1, 0], sizes = [8, 128], strides = [1, 1]} : vector<9x128xbf16> to vector<8x128xbf16>
    %c2 = arith.constant 2 : index
    %c0_14 = arith.constant 0 : index
    %c0_15 = arith.constant 0 : index
    %16 = vector.load %arg8[%c2, %c0_14, %c0_15] : memref<9x128x128xbf16, #tpu.memory_space<vmem>>, vector<1x128x128xbf16>
    %17 = vector.shape_cast %16 : vector<1x128x128xbf16> to vector<128x128xbf16>
    %cst_16 = arith.constant dense<0.000000e+00> : vector<8x128xf32>
    %18 = tpu.matmul %15, %17, %cst_16 {dimension_numbers = #tpu.dot_dimension_numbers<[1], [0], [0], [1], [0, 0, 1, 1], [], []>} : vector<8x128xbf16>, vector<128x128xbf16>, vector<8x128xf32> -> vector<8x128xf32>
    %19 = arith.addf %14, %18 : vector<8x128xf32>
    %c0_17 = arith.constant 0 : index
    %c0_18 = arith.constant 0 : index
    %c0_19 = arith.constant 0 : index
    %c0_20 = arith.constant 0 : index
    %20 = vector.load %arg4[%c0_17, %c0_18, %c0_19, %c0_20] : memref<1x1x9x128xbf16, #tpu.memory_space<vmem>>, vector<1x1x9x128xbf16>
    %21 = vector.shape_cast %20 : vector<1x1x9x128xbf16> to vector<9x128xbf16>
    %c0_21 = arith.constant 0 : index
    %c0_22 = arith.constant 0 : index
    %c0_23 = arith.constant 0 : index
    %c0_24 = arith.constant 0 : index
    %22 = vector.load %arg5[%c0_21, %c0_22, %c0_23, %c0_24] : memref<1x1x9x128xbf16, #tpu.memory_space<vmem>>, vector<1x1x9x128xbf16>
    %23 = vector.shape_cast %22 : vector<1x1x9x128xbf16> to vector<9x128xbf16>
    %24 = vector.extract_strided_slice %21 {offsets = [0, 0], sizes = [8, 128], strides = [1, 1]} : vector<9x128xbf16> to vector<8x128xbf16>
    %c3 = arith.constant 3 : index
    %c0_25 = arith.constant 0 : index
    %c0_26 = arith.constant 0 : index
    %25 = vector.load %arg8[%c3, %c0_25, %c0_26] : memref<9x128x128xbf16, #tpu.memory_space<vmem>>, vector<1x128x128xbf16>
    %26 = vector.shape_cast %25 : vector<1x128x128xbf16> to vector<128x128xbf16>
    %cst_27 = arith.constant dense<0.000000e+00> : vector<8x128xf32>
    %27 = tpu.matmul %24, %26, %cst_27 {dimension_numbers = #tpu.dot_dimension_numbers<[1], [0], [0], [1], [0, 0, 1, 1], [], []>} : vector<8x128xbf16>, vector<128x128xbf16>, vector<8x128xf32> -> vector<8x128xf32>
    %28 = arith.addf %19, %27 : vector<8x128xf32>
    %29 = vector.extract_strided_slice %23 {offsets = [0, 0], sizes = [8, 128], strides = [1, 1]} : vector<9x128xbf16> to vector<8x128xbf16>
    %c4 = arith.constant 4 : index
    %c0_28 = arith.constant 0 : index
    %c0_29 = arith.constant 0 : index
    %30 = vector.load %arg8[%c4, %c0_28, %c0_29] : memref<9x128x128xbf16, #tpu.memory_space<vmem>>, vector<1x128x128xbf16>
    %31 = vector.shape_cast %30 : vector<1x128x128xbf16> to vector<128x128xbf16>
    %cst_30 = arith.constant dense<0.000000e+00> : vector<8x128xf32>
    %32 = tpu.matmul %29, %31, %cst_30 {dimension_numbers = #tpu.dot_dimension_numbers<[1], [0], [0], [1], [0, 0, 1, 1], [], []>} : vector<8x128xbf16>, vector<128x128xbf16>, vector<8x128xf32> -> vector<8x128xf32>
    %33 = arith.addf %28, %32 : vector<8x128xf32>
    %34 = vector.extract_strided_slice %21 {offsets = [1, 0], sizes = [8, 128], strides = [1, 1]} : vector<9x128xbf16> to vector<8x128xbf16>
    %c5 = arith.constant 5 : index
    %c0_31 = arith.constant 0 : index
    %c0_32 = arith.constant 0 : index
    %35 = vector.load %arg8[%c5, %c0_31, %c0_32] : memref<9x128x128xbf16, #tpu.memory_space<vmem>>, vector<1x128x128xbf16>
    %36 = vector.shape_cast %35 : vector<1x128x128xbf16> to vector<128x128xbf16>
    %cst_33 = arith.constant dense<0.000000e+00> : vector<8x128xf32>
    %37 = tpu.matmul %34, %36, %cst_33 {dimension_numbers = #tpu.dot_dimension_numbers<[1], [0], [0], [1], [0, 0, 1, 1], [], []>} : vector<8x128xbf16>, vector<128x128xbf16>, vector<8x128xf32> -> vector<8x128xf32>
    %38 = arith.addf %33, %37 : vector<8x128xf32>
    %c0_34 = arith.constant 0 : index
    %c0_35 = arith.constant 0 : index
    %c0_36 = arith.constant 0 : index
    %c0_37 = arith.constant 0 : index
    %39 = vector.load %arg6[%c0_34, %c0_35, %c0_36, %c0_37] : memref<1x1x9x128xbf16, #tpu.memory_space<vmem>>, vector<1x1x9x128xbf16>
    %40 = vector.shape_cast %39 : vector<1x1x9x128xbf16> to vector<9x128xbf16>
    %c0_38 = arith.constant 0 : index
    %c0_39 = arith.constant 0 : index
    %c0_40 = arith.constant 0 : index
    %c0_41 = arith.constant 0 : index
    %41 = vector.load %arg7[%c0_38, %c0_39, %c0_40, %c0_41] : memref<1x1x9x128xbf16, #tpu.memory_space<vmem>>, vector<1x1x9x128xbf16>
    %42 = vector.shape_cast %41 : vector<1x1x9x128xbf16> to vector<9x128xbf16>
    %43 = vector.extract_strided_slice %40 {offsets = [0, 0], sizes = [8, 128], strides = [1, 1]} : vector<9x128xbf16> to vector<8x128xbf16>
    %c6 = arith.constant 6 : index
    %c0_42 = arith.constant 0 : index
    %c0_43 = arith.constant 0 : index
    %44 = vector.load %arg8[%c6, %c0_42, %c0_43] : memref<9x128x128xbf16, #tpu.memory_space<vmem>>, vector<1x128x128xbf16>
    %45 = vector.shape_cast %44 : vector<1x128x128xbf16> to vector<128x128xbf16>
    %cst_44 = arith.constant dense<0.000000e+00> : vector<8x128xf32>
    %46 = tpu.matmul %43, %45, %cst_44 {dimension_numbers = #tpu.dot_dimension_numbers<[1], [0], [0], [1], [0, 0, 1, 1], [], []>} : vector<8x128xbf16>, vector<128x128xbf16>, vector<8x128xf32> -> vector<8x128xf32>
    %47 = arith.addf %38, %46 : vector<8x128xf32>
    %48 = vector.extract_strided_slice %42 {offsets = [0, 0], sizes = [8, 128], strides = [1, 1]} : vector<9x128xbf16> to vector<8x128xbf16>
    %c7 = arith.constant 7 : index
    %c0_45 = arith.constant 0 : index
    %c0_46 = arith.constant 0 : index
    %49 = vector.load %arg8[%c7, %c0_45, %c0_46] : memref<9x128x128xbf16, #tpu.memory_space<vmem>>, vector<1x128x128xbf16>
    %50 = vector.shape_cast %49 : vector<1x128x128xbf16> to vector<128x128xbf16>
    %cst_47 = arith.constant dense<0.000000e+00> : vector<8x128xf32>
    %51 = tpu.matmul %48, %50, %cst_47 {dimension_numbers = #tpu.dot_dimension_numbers<[1], [0], [0], [1], [0, 0, 1, 1], [], []>} : vector<8x128xbf16>, vector<128x128xbf16>, vector<8x128xf32> -> vector<8x128xf32>
    %52 = arith.addf %47, %51 : vector<8x128xf32>
    %53 = vector.extract_strided_slice %40 {offsets = [1, 0], sizes = [8, 128], strides = [1, 1]} : vector<9x128xbf16> to vector<8x128xbf16>
    %c8 = arith.constant 8 : index
    %c0_48 = arith.constant 0 : index
    %c0_49 = arith.constant 0 : index
    %54 = vector.load %arg8[%c8, %c0_48, %c0_49] : memref<9x128x128xbf16, #tpu.memory_space<vmem>>, vector<1x128x128xbf16>
    %55 = vector.shape_cast %54 : vector<1x128x128xbf16> to vector<128x128xbf16>
    %cst_50 = arith.constant dense<0.000000e+00> : vector<8x128xf32>
    %56 = tpu.matmul %53, %55, %cst_50 {dimension_numbers = #tpu.dot_dimension_numbers<[1], [0], [0], [1], [0, 0, 1, 1], [], []>} : vector<8x128xbf16>, vector<128x128xbf16>, vector<8x128xf32> -> vector<8x128xf32>
    %57 = arith.addf %52, %56 : vector<8x128xf32>
    %58 = vector.shape_cast %57 : vector<8x128xf32> to vector<1x1x8x128xf32>
    %c0_51 = arith.constant 0 : index
    %c0_52 = arith.constant 0 : index
    %c0_53 = arith.constant 0 : index
    %c0_54 = arith.constant 0 : index
    %59 = vector.load %arg9[%c0_51, %c0_52, %c0_53, %c0_54] : memref<1x1x8x128xf32, #tpu.memory_space<vmem>>, vector<1x1x8x128xf32>
    tpu.vector_store %arg9[%c0_51, %c0_52, %c0_53, %c0_54], %58 {strides = array<i32>} : memref<1x1x8x128xf32, #tpu.memory_space<vmem>>, vector<1x1x8x128xf32>,
    return
  }
  func.func @transform_0(%arg0: i32, %arg1: i32) -> (i32, i32, i32, i32) {
    %c2_i32 = arith.constant 2 : i32
    %0 = arith.muli %c2_i32, %arg1 : i32
    %c0_i32 = arith.constant 0 : i32
    %1 = arith.addi %0, %c0_i32 : i32
    %c0_i32_0 = arith.constant 0 : i32
    %c0_i32_1 = arith.constant 0 : i32
    %c0_i32_2 = arith.constant 0 : i32
    return %arg0, %1, %c0_i32_0, %c0_i32_1 : i32, i32, i32, i32
  }
  func.func @transform_1(%arg0: i32, %arg1: i32) -> (i32, i32, i32, i32) {
    %c2_i32 = arith.constant 2 : i32
    %0 = arith.muli %c2_i32, %arg1 : i32
    %c0_i32 = arith.constant 0 : i32
    %1 = arith.addi %0, %c0_i32 : i32
    %c0_i32_0 = arith.constant 0 : i32
    %c0_i32_1 = arith.constant 0 : i32
    %c0_i32_2 = arith.constant 0 : i32
    return %arg0, %1, %c0_i32_0, %c0_i32_1 : i32, i32, i32, i32
  }
  func.func @transform_2(%arg0: i32, %arg1: i32) -> (i32, i32, i32, i32) {
    %c2_i32 = arith.constant 2 : i32
    %0 = arith.muli %c2_i32, %arg1 : i32
    %c1_i32 = arith.constant 1 : i32
    %1 = arith.addi %0, %c1_i32 : i32
    %c0_i32 = arith.constant 0 : i32
    %c0_i32_0 = arith.constant 0 : i32
    %c0_i32_1 = arith.constant 0 : i32
    return %arg0, %1, %c0_i32, %c0_i32_0 : i32, i32, i32, i32
  }
  func.func @transform_3(%arg0: i32, %arg1: i32) -> (i32, i32, i32, i32) {
    %c2_i32 = arith.constant 2 : i32
    %0 = arith.muli %c2_i32, %arg1 : i32
    %c1_i32 = arith.constant 1 : i32
    %1 = arith.addi %0, %c1_i32 : i32
    %c0_i32 = arith.constant 0 : i32
    %c0_i32_0 = arith.constant 0 : i32
    %c0_i32_1 = arith.constant 0 : i32
    return %arg0, %1, %c0_i32, %c0_i32_0 : i32, i32, i32, i32
  }
  func.func @transform_4(%arg0: i32, %arg1: i32) -> (i32, i32, i32, i32) {
    %c2_i32 = arith.constant 2 : i32
    %0 = arith.muli %c2_i32, %arg1 : i32
    %c2_i32_0 = arith.constant 2 : i32
    %1 = arith.addi %0, %c2_i32_0 : i32
    %c0_i32 = arith.constant 0 : i32
    %c0_i32_1 = arith.constant 0 : i32
    %c0_i32_2 = arith.constant 0 : i32
    return %arg0, %1, %c0_i32, %c0_i32_1 : i32, i32, i32, i32
  }
  func.func @transform_5(%arg0: i32, %arg1: i32) -> (i32, i32, i32, i32) {
    %c2_i32 = arith.constant 2 : i32
    %0 = arith.muli %c2_i32, %arg1 : i32
    %c2_i32_0 = arith.constant 2 : i32
    %1 = arith.addi %0, %c2_i32_0 : i32
    %c0_i32 = arith.constant 0 : i32
    %c0_i32_1 = arith.constant 0 : i32
    %c0_i32_2 = arith.constant 0 : i32
    return %arg0, %1, %c0_i32, %c0_i32_1 : i32, i32, i32, i32
  }
  func.func @transform_6(%arg0: i32, %arg1: i32) -> (i32, i32, i32) {
    %c0_i32 = arith.constant 0 : i32
    %c0_i32_0 = arith.constant 0 : i32
    %c0_i32_1 = arith.constant 0 : i32
    %c0_i32_2 = arith.constant 0 : i32
    return %c0_i32, %c0_i32_0, %c0_i32_1 : i32, i32, i32
  }
  func.func @transform_7(%arg0: i32, %arg1: i32) -> (i32, i32, i32, i32) {
    %c0_i32 = arith.constant 0 : i32
    %c0_i32_0 = arith.constant 0 : i32
    %c0_i32_1 = arith.constant 0 : i32
    return %arg0, %arg1, %c0_i32, %c0_i32_0 : i32, i32, i32, i32
  }
}

module attributes {stable_mosaic.version = 11 : i64} {
  func.func @_conv1x1_kernel(%arg0: i32, %arg1: i32, %arg2: memref<1x1x9x128xbf16, #tpu.memory_space<vmem>>, %arg3: memref<128x128xbf16, #tpu.memory_space<vmem>>, %arg4: memref<1x1x8x128xf32, #tpu.memory_space<vmem>>) attributes {dimension_semantics = [#tpu.dimension_semantics<parallel>, #tpu.dimension_semantics<parallel>], iteration_bounds = array<i64: 2, 8>, scalar_prefetch = 0 : i64, scratch_operands = 0 : i64, tpu.core_type = #tpu.core_type<tc>, window_params = [{transform_indices = @transform_0, window_bounds = array<i64: 1, 1, 9, 128>}, {pipeline_mode = #tpu.pipeline_mode<synchronous>, transform_indices = @transform_1, window_bounds = array<i64: 128, 128>}, {transform_indices = @transform_2, window_bounds = array<i64: 1, 1, 8, 128>}]} {
    %c0 = arith.constant 0 : index
    %c0_0 = arith.constant 0 : index
    %c0_1 = arith.constant 0 : index
    %c0_2 = arith.constant 0 : index
    %0 = vector.load %arg2[%c0, %c0_0, %c0_1, %c0_2] : memref<1x1x9x128xbf16, #tpu.memory_space<vmem>>, vector<1x1x9x128xbf16>
    %1 = vector.shape_cast %0 : vector<1x1x9x128xbf16> to vector<9x128xbf16>
    %2 = vector.extract_strided_slice %1 {offsets = [0, 0], sizes = [8, 128], strides = [1, 1]} : vector<9x128xbf16> to vector<8x128xbf16>
    %c0_3 = arith.constant 0 : index
    %c0_4 = arith.constant 0 : index
    %3 = vector.load %arg3[%c0_3, %c0_4] : memref<128x128xbf16, #tpu.memory_space<vmem>>, vector<128x128xbf16>
    %cst = arith.constant dense<0.000000e+00> : vector<8x128xf32>
    %4 = tpu.matmul %2, %3, %cst {dimension_numbers = #tpu.dot_dimension_numbers<[1], [0], [0], [1], [0, 0, 1, 1], [], []>} : vector<8x128xbf16>, vector<128x128xbf16>, vector<8x128xf32> -> vector<8x128xf32>
    %5 = vector.shape_cast %4 : vector<8x128xf32> to vector<1x1x8x128xf32>
    %c0_5 = arith.constant 0 : index
    %c0_6 = arith.constant 0 : index
    %c0_7 = arith.constant 0 : index
    %c0_8 = arith.constant 0 : index
    %6 = vector.load %arg4[%c0_5, %c0_6, %c0_7, %c0_8] : memref<1x1x8x128xf32, #tpu.memory_space<vmem>>, vector<1x1x8x128xf32>
    tpu.vector_store %arg4[%c0_5, %c0_6, %c0_7, %c0_8], %5 {strides = array<i32>} : memref<1x1x8x128xf32, #tpu.memory_space<vmem>>, vector<1x1x8x128xf32>,
    return
  }
  func.func @transform_0(%arg0: i32, %arg1: i32) -> (i32, i32, i32, i32) {
    %c2_i32 = arith.constant 2 : i32
    %0 = arith.muli %c2_i32, %arg1 : i32
    %c1_i32 = arith.constant 1 : i32
    %1 = arith.addi %0, %c1_i32 : i32
    %c0_i32 = arith.constant 0 : i32
    %c0_i32_0 = arith.constant 0 : i32
    %c0_i32_1 = arith.constant 0 : i32
    return %arg0, %1, %c0_i32, %c0_i32_0 : i32, i32, i32, i32
  }
  func.func @transform_1(%arg0: i32, %arg1: i32) -> (i32, i32) {
    %c0_i32 = arith.constant 0 : i32
    %c0_i32_0 = arith.constant 0 : i32
    %c0_i32_1 = arith.constant 0 : i32
    return %c0_i32, %c0_i32_0 : i32, i32
  }
  func.func @transform_2(%arg0: i32, %arg1: i32) -> (i32, i32, i32, i32) {
    %c0_i32 = arith.constant 0 : i32
    %c0_i32_0 = arith.constant 0 : i32
    %c0_i32_1 = arith.constant 0 : i32
    return %arg0, %arg1, %c0_i32, %c0_i32_0 : i32, i32, i32, i32
  }
}

module attributes {stable_mosaic.version = 11 : i64} {
  func.func @_bn_apply_relu_kernel(%arg0: i32, %arg1: memref<128x128xf32, #tpu.memory_space<vmem>>, %arg2: memref<1x128xf32, #tpu.memory_space<vmem>>, %arg3: memref<1x128xf32, #tpu.memory_space<vmem>>, %arg4: memref<128x128xbf16, #tpu.memory_space<vmem>>) attributes {dimension_semantics = [#tpu.dimension_semantics<parallel>], iteration_bounds = array<i64: 1>, scalar_prefetch = 0 : i64, scratch_operands = 0 : i64, tpu.core_type = #tpu.core_type<tc>, window_params = [{transform_indices = @transform_0, window_bounds = array<i64: 128, 128>}, {pipeline_mode = #tpu.pipeline_mode<synchronous>, transform_indices = @transform_1, window_bounds = array<i64: 1, 128>}, {pipeline_mode = #tpu.pipeline_mode<synchronous>, transform_indices = @transform_2, window_bounds = array<i64: 1, 128>}, {transform_indices = @transform_3, window_bounds = array<i64: 128, 128>}]} {
    %c0 = arith.constant 0 : index
    %c0_0 = arith.constant 0 : index
    %0 = vector.load %arg1[%c0, %c0_0] : memref<128x128xf32, #tpu.memory_space<vmem>>, vector<128x128xf32>
    %c0_1 = arith.constant 0 : index
    %c0_2 = arith.constant 0 : index
    %1 = vector.load %arg2[%c0_1, %c0_2] : memref<1x128xf32, #tpu.memory_space<vmem>>, vector<1x128xf32>
    %2 = vector.broadcast %1 : vector<1x128xf32> to vector<128x128xf32>
    %3 = arith.mulf %0, %2 : vector<128x128xf32>
    %c0_3 = arith.constant 0 : index
    %c0_4 = arith.constant 0 : index
    %4 = vector.load %arg3[%c0_3, %c0_4] : memref<1x128xf32, #tpu.memory_space<vmem>>, vector<1x128xf32>
    %5 = vector.broadcast %4 : vector<1x128xf32> to vector<128x128xf32>
    %6 = arith.addf %3, %5 : vector<128x128xf32>
    %cst = arith.constant 0.000000e+00 : f32
    %7 = vector.broadcast %cst : f32 to vector<128x128xf32>
    %8 = arith.maximumf %6, %7 : vector<128x128xf32>
    %9 = arith.truncf %8 : vector<128x128xf32> to vector<128x128xbf16>
    %c0_5 = arith.constant 0 : index
    %c0_6 = arith.constant 0 : index
    %10 = vector.load %arg4[%c0_5, %c0_6] : memref<128x128xbf16, #tpu.memory_space<vmem>>, vector<128x128xbf16>
    tpu.vector_store %arg4[%c0_5, %c0_6], %9 {strides = array<i32>} : memref<128x128xbf16, #tpu.memory_space<vmem>>, vector<128x128xbf16>,
    return
  }
  func.func @transform_0(%arg0: i32) -> (i32, i32) {
    %c0_i32 = arith.constant 0 : i32
    %c0_i32_0 = arith.constant 0 : i32
    return %arg0, %c0_i32 : i32, i32
  }
  func.func @transform_1(%arg0: i32) -> (i32, i32) {
    %c0_i32 = arith.constant 0 : i32
    %c0_i32_0 = arith.constant 0 : i32
    %c0_i32_1 = arith.constant 0 : i32
    return %c0_i32, %c0_i32_0 : i32, i32
  }
  func.func @transform_2(%arg0: i32) -> (i32, i32) {
    %c0_i32 = arith.constant 0 : i32
    %c0_i32_0 = arith.constant 0 : i32
    %c0_i32_1 = arith.constant 0 : i32
    return %c0_i32, %c0_i32_0 : i32, i32
  }
  func.func @transform_3(%arg0: i32) -> (i32, i32) {
    %c0_i32 = arith.constant 0 : i32
    %c0_i32_0 = arith.constant 0 : i32
    return %arg0, %c0_i32 : i32, i32
  }
}

module attributes {stable_mosaic.version = 11 : i64} {
  func.func @_conv3x3_kernel(%arg0: i32, %arg1: i32, %arg2: memref<1x1x10x128xbf16, #tpu.memory_space<vmem>>, %arg3: memref<1x1x10x128xbf16, #tpu.memory_space<vmem>>, %arg4: memref<1x1x10x128xbf16, #tpu.memory_space<vmem>>, %arg5: memref<9x128x128xbf16, #tpu.memory_space<vmem>>, %arg6: memref<1x1x8x128xf32, #tpu.memory_space<vmem>>) attributes {dimension_semantics = [#tpu.dimension_semantics<parallel>, #tpu.dimension_semantics<parallel>], iteration_bounds = array<i64: 2, 8>, scalar_prefetch = 0 : i64, scratch_operands = 0 : i64, tpu.core_type = #tpu.core_type<tc>, window_params = [{transform_indices = @transform_0, window_bounds = array<i64: 1, 1, 10, 128>}, {transform_indices = @transform_1, window_bounds = array<i64: 1, 1, 10, 128>}, {transform_indices = @transform_2, window_bounds = array<i64: 1, 1, 10, 128>}, {pipeline_mode = #tpu.pipeline_mode<synchronous>, transform_indices = @transform_3, window_bounds = array<i64: 9, 128, 128>}, {transform_indices = @transform_4, window_bounds = array<i64: 1, 1, 8, 128>}]} {
    %cst = arith.constant 0.000000e+00 : f32
    %0 = vector.broadcast %cst : f32 to vector<8x128xf32>
    %c0 = arith.constant 0 : index
    %c0_0 = arith.constant 0 : index
    %c0_1 = arith.constant 0 : index
    %c0_2 = arith.constant 0 : index
    %1 = vector.load %arg2[%c0, %c0_0, %c0_1, %c0_2] : memref<1x1x10x128xbf16, #tpu.memory_space<vmem>>, vector<1x1x10x128xbf16>
    %2 = vector.shape_cast %1 : vector<1x1x10x128xbf16> to vector<10x128xbf16>
    %3 = vector.extract_strided_slice %2 {offsets = [0, 0], sizes = [8, 128], strides = [1, 1]} : vector<10x128xbf16> to vector<8x128xbf16>
    %c0_3 = arith.constant 0 : index
    %c0_4 = arith.constant 0 : index
    %c0_5 = arith.constant 0 : index
    %4 = vector.load %arg5[%c0_3, %c0_4, %c0_5] : memref<9x128x128xbf16, #tpu.memory_space<vmem>>, vector<1x128x128xbf16>
    %5 = vector.shape_cast %4 : vector<1x128x128xbf16> to vector<128x128xbf16>
    %cst_6 = arith.constant dense<0.000000e+00> : vector<8x128xf32>
    %6 = tpu.matmul %3, %5, %cst_6 {dimension_numbers = #tpu.dot_dimension_numbers<[1], [0], [0], [1], [0, 0, 1, 1], [], []>} : vector<8x128xbf16>, vector<128x128xbf16>, vector<8x128xf32> -> vector<8x128xf32>
    %7 = arith.addf %0, %6 : vector<8x128xf32>
    %8 = vector.extract_strided_slice %2 {offsets = [1, 0], sizes = [8, 128], strides = [1, 1]} : vector<10x128xbf16> to vector<8x128xbf16>
    %c1 = arith.constant 1 : index
    %c0_7 = arith.constant 0 : index
    %c0_8 = arith.constant 0 : index
    %9 = vector.load %arg5[%c1, %c0_7, %c0_8] : memref<9x128x128xbf16, #tpu.memory_space<vmem>>, vector<1x128x128xbf16>
    %10 = vector.shape_cast %9 : vector<1x128x128xbf16> to vector<128x128xbf16>
    %cst_9 = arith.constant dense<0.000000e+00> : vector<8x128xf32>
    %11 = tpu.matmul %8, %10, %cst_9 {dimension_numbers = #tpu.dot_dimension_numbers<[1], [0], [0], [1], [0, 0, 1, 1], [], []>} : vector<8x128xbf16>, vector<128x128xbf16>, vector<8x128xf32> -> vector<8x128xf32>
    %12 = arith.addf %7, %11 : vector<8x128xf32>
    %13 = vector.extract_strided_slice %2 {offsets = [2, 0], sizes = [8, 128], strides = [1, 1]} : vector<10x128xbf16> to vector<8x128xbf16>
    %c2 = arith.constant 2 : index
    %c0_10 = arith.constant 0 : index
    %c0_11 = arith.constant 0 : index
    %14 = vector.load %arg5[%c2, %c0_10, %c0_11] : memref<9x128x128xbf16, #tpu.memory_space<vmem>>, vector<1x128x128xbf16>
    %15 = vector.shape_cast %14 : vector<1x128x128xbf16> to vector<128x128xbf16>
    %cst_12 = arith.constant dense<0.000000e+00> : vector<8x128xf32>
    %16 = tpu.matmul %13, %15, %cst_12 {dimension_numbers = #tpu.dot_dimension_numbers<[1], [0], [0], [1], [0, 0, 1, 1], [], []>} : vector<8x128xbf16>, vector<128x128xbf16>, vector<8x128xf32> -> vector<8x128xf32>
    %17 = arith.addf %12, %16 : vector<8x128xf32>
    %c0_13 = arith.constant 0 : index
    %c0_14 = arith.constant 0 : index
    %c0_15 = arith.constant 0 : index
    %c0_16 = arith.constant 0 : index
    %18 = vector.load %arg3[%c0_13, %c0_14, %c0_15, %c0_16] : memref<1x1x10x128xbf16, #tpu.memory_space<vmem>>, vector<1x1x10x128xbf16>
    %19 = vector.shape_cast %18 : vector<1x1x10x128xbf16> to vector<10x128xbf16>
    %20 = vector.extract_strided_slice %19 {offsets = [0, 0], sizes = [8, 128], strides = [1, 1]} : vector<10x128xbf16> to vector<8x128xbf16>
    %c3 = arith.constant 3 : index
    %c0_17 = arith.constant 0 : index
    %c0_18 = arith.constant 0 : index
    %21 = vector.load %arg5[%c3, %c0_17, %c0_18] : memref<9x128x128xbf16, #tpu.memory_space<vmem>>, vector<1x128x128xbf16>
    %22 = vector.shape_cast %21 : vector<1x128x128xbf16> to vector<128x128xbf16>
    %cst_19 = arith.constant dense<0.000000e+00> : vector<8x128xf32>
    %23 = tpu.matmul %20, %22, %cst_19 {dimension_numbers = #tpu.dot_dimension_numbers<[1], [0], [0], [1], [0, 0, 1, 1], [], []>} : vector<8x128xbf16>, vector<128x128xbf16>, vector<8x128xf32> -> vector<8x128xf32>
    %24 = arith.addf %17, %23 : vector<8x128xf32>
    %25 = vector.extract_strided_slice %19 {offsets = [1, 0], sizes = [8, 128], strides = [1, 1]} : vector<10x128xbf16> to vector<8x128xbf16>
    %c4 = arith.constant 4 : index
    %c0_20 = arith.constant 0 : index
    %c0_21 = arith.constant 0 : index
    %26 = vector.load %arg5[%c4, %c0_20, %c0_21] : memref<9x128x128xbf16, #tpu.memory_space<vmem>>, vector<1x128x128xbf16>
    %27 = vector.shape_cast %26 : vector<1x128x128xbf16> to vector<128x128xbf16>
    %cst_22 = arith.constant dense<0.000000e+00> : vector<8x128xf32>
    %28 = tpu.matmul %25, %27, %cst_22 {dimension_numbers = #tpu.dot_dimension_numbers<[1], [0], [0], [1], [0, 0, 1, 1], [], []>} : vector<8x128xbf16>, vector<128x128xbf16>, vector<8x128xf32> -> vector<8x128xf32>
    %29 = arith.addf %24, %28 : vector<8x128xf32>
    %30 = vector.extract_strided_slice %19 {offsets = [2, 0], sizes = [8, 128], strides = [1, 1]} : vector<10x128xbf16> to vector<8x128xbf16>
    %c5 = arith.constant 5 : index
    %c0_23 = arith.constant 0 : index
    %c0_24 = arith.constant 0 : index
    %31 = vector.load %arg5[%c5, %c0_23, %c0_24] : memref<9x128x128xbf16, #tpu.memory_space<vmem>>, vector<1x128x128xbf16>
    %32 = vector.shape_cast %31 : vector<1x128x128xbf16> to vector<128x128xbf16>
    %cst_25 = arith.constant dense<0.000000e+00> : vector<8x128xf32>
    %33 = tpu.matmul %30, %32, %cst_25 {dimension_numbers = #tpu.dot_dimension_numbers<[1], [0], [0], [1], [0, 0, 1, 1], [], []>} : vector<8x128xbf16>, vector<128x128xbf16>, vector<8x128xf32> -> vector<8x128xf32>
    %34 = arith.addf %29, %33 : vector<8x128xf32>
    %c0_26 = arith.constant 0 : index
    %c0_27 = arith.constant 0 : index
    %c0_28 = arith.constant 0 : index
    %c0_29 = arith.constant 0 : index
    %35 = vector.load %arg4[%c0_26, %c0_27, %c0_28, %c0_29] : memref<1x1x10x128xbf16, #tpu.memory_space<vmem>>, vector<1x1x10x128xbf16>
    %36 = vector.shape_cast %35 : vector<1x1x10x128xbf16> to vector<10x128xbf16>
    %37 = vector.extract_strided_slice %36 {offsets = [0, 0], sizes = [8, 128], strides = [1, 1]} : vector<10x128xbf16> to vector<8x128xbf16>
    %c6 = arith.constant 6 : index
    %c0_30 = arith.constant 0 : index
    %c0_31 = arith.constant 0 : index
    %38 = vector.load %arg5[%c6, %c0_30, %c0_31] : memref<9x128x128xbf16, #tpu.memory_space<vmem>>, vector<1x128x128xbf16>
    %39 = vector.shape_cast %38 : vector<1x128x128xbf16> to vector<128x128xbf16>
    %cst_32 = arith.constant dense<0.000000e+00> : vector<8x128xf32>
    %40 = tpu.matmul %37, %39, %cst_32 {dimension_numbers = #tpu.dot_dimension_numbers<[1], [0], [0], [1], [0, 0, 1, 1], [], []>} : vector<8x128xbf16>, vector<128x128xbf16>, vector<8x128xf32> -> vector<8x128xf32>
    %41 = arith.addf %34, %40 : vector<8x128xf32>
    %42 = vector.extract_strided_slice %36 {offsets = [1, 0], sizes = [8, 128], strides = [1, 1]} : vector<10x128xbf16> to vector<8x128xbf16>
    %c7 = arith.constant 7 : index
    %c0_33 = arith.constant 0 : index
    %c0_34 = arith.constant 0 : index
    %43 = vector.load %arg5[%c7, %c0_33, %c0_34] : memref<9x128x128xbf16, #tpu.memory_space<vmem>>, vector<1x128x128xbf16>
    %44 = vector.shape_cast %43 : vector<1x128x128xbf16> to vector<128x128xbf16>
    %cst_35 = arith.constant dense<0.000000e+00> : vector<8x128xf32>
    %45 = tpu.matmul %42, %44, %cst_35 {dimension_numbers = #tpu.dot_dimension_numbers<[1], [0], [0], [1], [0, 0, 1, 1], [], []>} : vector<8x128xbf16>, vector<128x128xbf16>, vector<8x128xf32> -> vector<8x128xf32>
    %46 = arith.addf %41, %45 : vector<8x128xf32>
    %47 = vector.extract_strided_slice %36 {offsets = [2, 0], sizes = [8, 128], strides = [1, 1]} : vector<10x128xbf16> to vector<8x128xbf16>
    %c8 = arith.constant 8 : index
    %c0_36 = arith.constant 0 : index
    %c0_37 = arith.constant 0 : index
    %48 = vector.load %arg5[%c8, %c0_36, %c0_37] : memref<9x128x128xbf16, #tpu.memory_space<vmem>>, vector<1x128x128xbf16>
    %49 = vector.shape_cast %48 : vector<1x128x128xbf16> to vector<128x128xbf16>
    %cst_38 = arith.constant dense<0.000000e+00> : vector<8x128xf32>
    %50 = tpu.matmul %47, %49, %cst_38 {dimension_numbers = #tpu.dot_dimension_numbers<[1], [0], [0], [1], [0, 0, 1, 1], [], []>} : vector<8x128xbf16>, vector<128x128xbf16>, vector<8x128xf32> -> vector<8x128xf32>
    %51 = arith.addf %46, %50 : vector<8x128xf32>
    %52 = vector.shape_cast %51 : vector<8x128xf32> to vector<1x1x8x128xf32>
    %c0_39 = arith.constant 0 : index
    %c0_40 = arith.constant 0 : index
    %c0_41 = arith.constant 0 : index
    %c0_42 = arith.constant 0 : index
    %53 = vector.load %arg6[%c0_39, %c0_40, %c0_41, %c0_42] : memref<1x1x8x128xf32, #tpu.memory_space<vmem>>, vector<1x1x8x128xf32>
    tpu.vector_store %arg6[%c0_39, %c0_40, %c0_41, %c0_42], %52 {strides = array<i32>} : memref<1x1x8x128xf32, #tpu.memory_space<vmem>>, vector<1x1x8x128xf32>,
    return
  }
  func.func @transform_0(%arg0: i32, %arg1: i32) -> (i32, i32, i32, i32) {
    %c1_i32 = arith.constant 1 : i32
    %0 = arith.muli %c1_i32, %arg1 : i32
    %c0_i32 = arith.constant 0 : i32
    %1 = arith.addi %0, %c0_i32 : i32
    %c0_i32_0 = arith.constant 0 : i32
    %c0_i32_1 = arith.constant 0 : i32
    %c0_i32_2 = arith.constant 0 : i32
    return %arg0, %1, %c0_i32_0, %c0_i32_1 : i32, i32, i32, i32
  }
  func.func @transform_1(%arg0: i32, %arg1: i32) -> (i32, i32, i32, i32) {
    %c1_i32 = arith.constant 1 : i32
    %0 = arith.muli %c1_i32, %arg1 : i32
    %c1_i32_0 = arith.constant 1 : i32
    %1 = arith.addi %0, %c1_i32_0 : i32
    %c0_i32 = arith.constant 0 : i32
    %c0_i32_1 = arith.constant 0 : i32
    %c0_i32_2 = arith.constant 0 : i32
    return %arg0, %1, %c0_i32, %c0_i32_1 : i32, i32, i32, i32
  }
  func.func @transform_2(%arg0: i32, %arg1: i32) -> (i32, i32, i32, i32) {
    %c1_i32 = arith.constant 1 : i32
    %0 = arith.muli %c1_i32, %arg1 : i32
    %c2_i32 = arith.constant 2 : i32
    %1 = arith.addi %0, %c2_i32 : i32
    %c0_i32 = arith.constant 0 : i32
    %c0_i32_0 = arith.constant 0 : i32
    %c0_i32_1 = arith.constant 0 : i32
    return %arg0, %1, %c0_i32, %c0_i32_0 : i32, i32, i32, i32
  }
  func.func @transform_3(%arg0: i32, %arg1: i32) -> (i32, i32, i32) {
    %c0_i32 = arith.constant 0 : i32
    %c0_i32_0 = arith.constant 0 : i32
    %c0_i32_1 = arith.constant 0 : i32
    %c0_i32_2 = arith.constant 0 : i32
    return %c0_i32, %c0_i32_0, %c0_i32_1 : i32, i32, i32
  }
  func.func @transform_4(%arg0: i32, %arg1: i32) -> (i32, i32, i32, i32) {
    %c0_i32 = arith.constant 0 : i32
    %c0_i32_0 = arith.constant 0 : i32
    %c0_i32_1 = arith.constant 0 : i32
    return %arg0, %arg1, %c0_i32, %c0_i32_0 : i32, i32, i32, i32
  }
}

module attributes {stable_mosaic.version = 11 : i64} {
  func.func @_conv3x3_kernel(%arg0: i32, %arg1: i32, %arg2: memref<1x1x10x128xbf16, #tpu.memory_space<vmem>>, %arg3: memref<1x1x10x128xbf16, #tpu.memory_space<vmem>>, %arg4: memref<1x1x10x128xbf16, #tpu.memory_space<vmem>>, %arg5: memref<9x128x128xbf16, #tpu.memory_space<vmem>>, %arg6: memref<1x1x8x128xf32, #tpu.memory_space<vmem>>, %arg7: memref<1x1x8x128xf32, #tpu.memory_space<vmem>>) attributes {dimension_semantics = [#tpu.dimension_semantics<parallel>, #tpu.dimension_semantics<parallel>], iteration_bounds = array<i64: 2, 8>, scalar_prefetch = 0 : i64, scratch_operands = 0 : i64, tpu.core_type = #tpu.core_type<tc>, window_params = [{transform_indices = @transform_0, window_bounds = array<i64: 1, 1, 10, 128>}, {transform_indices = @transform_1, window_bounds = array<i64: 1, 1, 10, 128>}, {transform_indices = @transform_2, window_bounds = array<i64: 1, 1, 10, 128>}, {pipeline_mode = #tpu.pipeline_mode<synchronous>, transform_indices = @transform_3, window_bounds = array<i64: 9, 128, 128>}, {transform_indices = @transform_4, window_bounds = array<i64: 1, 1, 8, 128>}, {transform_indices = @transform_5, window_bounds = array<i64: 1, 1, 8, 128>}]} {
    %cst = arith.constant 0.000000e+00 : f32
    %0 = vector.broadcast %cst : f32 to vector<8x128xf32>
    %c0 = arith.constant 0 : index
    %c0_0 = arith.constant 0 : index
    %c0_1 = arith.constant 0 : index
    %c0_2 = arith.constant 0 : index
    %1 = vector.load %arg2[%c0, %c0_0, %c0_1, %c0_2] : memref<1x1x10x128xbf16, #tpu.memory_space<vmem>>, vector<1x1x10x128xbf16>
    %2 = vector.shape_cast %1 : vector<1x1x10x128xbf16> to vector<10x128xbf16>
    %3 = vector.extract_strided_slice %2 {offsets = [0, 0], sizes = [8, 128], strides = [1, 1]} : vector<10x128xbf16> to vector<8x128xbf16>
    %c0_3 = arith.constant 0 : index
    %c0_4 = arith.constant 0 : index
    %c0_5 = arith.constant 0 : index
    %4 = vector.load %arg5[%c0_3, %c0_4, %c0_5] : memref<9x128x128xbf16, #tpu.memory_space<vmem>>, vector<1x128x128xbf16>
    %5 = vector.shape_cast %4 : vector<1x128x128xbf16> to vector<128x128xbf16>
    %cst_6 = arith.constant dense<0.000000e+00> : vector<8x128xf32>
    %6 = tpu.matmul %3, %5, %cst_6 {dimension_numbers = #tpu.dot_dimension_numbers<[1], [0], [0], [1], [0, 0, 1, 1], [], []>} : vector<8x128xbf16>, vector<128x128xbf16>, vector<8x128xf32> -> vector<8x128xf32>
    %7 = arith.addf %0, %6 : vector<8x128xf32>
    %8 = vector.extract_strided_slice %2 {offsets = [1, 0], sizes = [8, 128], strides = [1, 1]} : vector<10x128xbf16> to vector<8x128xbf16>
    %c1 = arith.constant 1 : index
    %c0_7 = arith.constant 0 : index
    %c0_8 = arith.constant 0 : index
    %9 = vector.load %arg5[%c1, %c0_7, %c0_8] : memref<9x128x128xbf16, #tpu.memory_space<vmem>>, vector<1x128x128xbf16>
    %10 = vector.shape_cast %9 : vector<1x128x128xbf16> to vector<128x128xbf16>
    %cst_9 = arith.constant dense<0.000000e+00> : vector<8x128xf32>
    %11 = tpu.matmul %8, %10, %cst_9 {dimension_numbers = #tpu.dot_dimension_numbers<[1], [0], [0], [1], [0, 0, 1, 1], [], []>} : vector<8x128xbf16>, vector<128x128xbf16>, vector<8x128xf32> -> vector<8x128xf32>
    %12 = arith.addf %7, %11 : vector<8x128xf32>
    %13 = vector.extract_strided_slice %2 {offsets = [2, 0], sizes = [8, 128], strides = [1, 1]} : vector<10x128xbf16> to vector<8x128xbf16>
    %c2 = arith.constant 2 : index
    %c0_10 = arith.constant 0 : index
    %c0_11 = arith.constant 0 : index
    %14 = vector.load %arg5[%c2, %c0_10, %c0_11] : memref<9x128x128xbf16, #tpu.memory_space<vmem>>, vector<1x128x128xbf16>
    %15 = vector.shape_cast %14 : vector<1x128x128xbf16> to vector<128x128xbf16>
    %cst_12 = arith.constant dense<0.000000e+00> : vector<8x128xf32>
    %16 = tpu.matmul %13, %15, %cst_12 {dimension_numbers = #tpu.dot_dimension_numbers<[1], [0], [0], [1], [0, 0, 1, 1], [], []>} : vector<8x128xbf16>, vector<128x128xbf16>, vector<8x128xf32> -> vector<8x128xf32>
    %17 = arith.addf %12, %16 : vector<8x128xf32>
    %c0_13 = arith.constant 0 : index
    %c0_14 = arith.constant 0 : index
    %c0_15 = arith.constant 0 : index
    %c0_16 = arith.constant 0 : index
    %18 = vector.load %arg3[%c0_13, %c0_14, %c0_15, %c0_16] : memref<1x1x10x128xbf16, #tpu.memory_space<vmem>>, vector<1x1x10x128xbf16>
    %19 = vector.shape_cast %18 : vector<1x1x10x128xbf16> to vector<10x128xbf16>
    %20 = vector.extract_strided_slice %19 {offsets = [0, 0], sizes = [8, 128], strides = [1, 1]} : vector<10x128xbf16> to vector<8x128xbf16>
    %c3 = arith.constant 3 : index
    %c0_17 = arith.constant 0 : index
    %c0_18 = arith.constant 0 : index
    %21 = vector.load %arg5[%c3, %c0_17, %c0_18] : memref<9x128x128xbf16, #tpu.memory_space<vmem>>, vector<1x128x128xbf16>
    %22 = vector.shape_cast %21 : vector<1x128x128xbf16> to vector<128x128xbf16>
    %cst_19 = arith.constant dense<0.000000e+00> : vector<8x128xf32>
    %23 = tpu.matmul %20, %22, %cst_19 {dimension_numbers = #tpu.dot_dimension_numbers<[1], [0], [0], [1], [0, 0, 1, 1], [], []>} : vector<8x128xbf16>, vector<128x128xbf16>, vector<8x128xf32> -> vector<8x128xf32>
    %24 = arith.addf %17, %23 : vector<8x128xf32>
    %25 = vector.extract_strided_slice %19 {offsets = [1, 0], sizes = [8, 128], strides = [1, 1]} : vector<10x128xbf16> to vector<8x128xbf16>
    %c4 = arith.constant 4 : index
    %c0_20 = arith.constant 0 : index
    %c0_21 = arith.constant 0 : index
    %26 = vector.load %arg5[%c4, %c0_20, %c0_21] : memref<9x128x128xbf16, #tpu.memory_space<vmem>>, vector<1x128x128xbf16>
    %27 = vector.shape_cast %26 : vector<1x128x128xbf16> to vector<128x128xbf16>
    %cst_22 = arith.constant dense<0.000000e+00> : vector<8x128xf32>
    %28 = tpu.matmul %25, %27, %cst_22 {dimension_numbers = #tpu.dot_dimension_numbers<[1], [0], [0], [1], [0, 0, 1, 1], [], []>} : vector<8x128xbf16>, vector<128x128xbf16>, vector<8x128xf32> -> vector<8x128xf32>
    %29 = arith.addf %24, %28 : vector<8x128xf32>
    %30 = vector.extract_strided_slice %19 {offsets = [2, 0], sizes = [8, 128], strides = [1, 1]} : vector<10x128xbf16> to vector<8x128xbf16>
    %c5 = arith.constant 5 : index
    %c0_23 = arith.constant 0 : index
    %c0_24 = arith.constant 0 : index
    %31 = vector.load %arg5[%c5, %c0_23, %c0_24] : memref<9x128x128xbf16, #tpu.memory_space<vmem>>, vector<1x128x128xbf16>
    %32 = vector.shape_cast %31 : vector<1x128x128xbf16> to vector<128x128xbf16>
    %cst_25 = arith.constant dense<0.000000e+00> : vector<8x128xf32>
    %33 = tpu.matmul %30, %32, %cst_25 {dimension_numbers = #tpu.dot_dimension_numbers<[1], [0], [0], [1], [0, 0, 1, 1], [], []>} : vector<8x128xbf16>, vector<128x128xbf16>, vector<8x128xf32> -> vector<8x128xf32>
    %34 = arith.addf %29, %33 : vector<8x128xf32>
    %c0_26 = arith.constant 0 : index
    %c0_27 = arith.constant 0 : index
    %c0_28 = arith.constant 0 : index
    %c0_29 = arith.constant 0 : index
    %35 = vector.load %arg4[%c0_26, %c0_27, %c0_28, %c0_29] : memref<1x1x10x128xbf16, #tpu.memory_space<vmem>>, vector<1x1x10x128xbf16>
    %36 = vector.shape_cast %35 : vector<1x1x10x128xbf16> to vector<10x128xbf16>
    %37 = vector.extract_strided_slice %36 {offsets = [0, 0], sizes = [8, 128], strides = [1, 1]} : vector<10x128xbf16> to vector<8x128xbf16>
    %c6 = arith.constant 6 : index
    %c0_30 = arith.constant 0 : index
    %c0_31 = arith.constant 0 : index
    %38 = vector.load %arg5[%c6, %c0_30, %c0_31] : memref<9x128x128xbf16, #tpu.memory_space<vmem>>, vector<1x128x128xbf16>
    %39 = vector.shape_cast %38 : vector<1x128x128xbf16> to vector<128x128xbf16>
    %cst_32 = arith.constant dense<0.000000e+00> : vector<8x128xf32>
    %40 = tpu.matmul %37, %39, %cst_32 {dimension_numbers = #tpu.dot_dimension_numbers<[1], [0], [0], [1], [0, 0, 1, 1], [], []>} : vector<8x128xbf16>, vector<128x128xbf16>, vector<8x128xf32> -> vector<8x128xf32>
    %41 = arith.addf %34, %40 : vector<8x128xf32>
    %42 = vector.extract_strided_slice %36 {offsets = [1, 0], sizes = [8, 128], strides = [1, 1]} : vector<10x128xbf16> to vector<8x128xbf16>
    %c7 = arith.constant 7 : index
    %c0_33 = arith.constant 0 : index
    %c0_34 = arith.constant 0 : index
    %43 = vector.load %arg5[%c7, %c0_33, %c0_34] : memref<9x128x128xbf16, #tpu.memory_space<vmem>>, vector<1x128x128xbf16>
    %44 = vector.shape_cast %43 : vector<1x128x128xbf16> to vector<128x128xbf16>
    %cst_35 = arith.constant dense<0.000000e+00> : vector<8x128xf32>
    %45 = tpu.matmul %42, %44, %cst_35 {dimension_numbers = #tpu.dot_dimension_numbers<[1], [0], [0], [1], [0, 0, 1, 1], [], []>} : vector<8x128xbf16>, vector<128x128xbf16>, vector<8x128xf32> -> vector<8x128xf32>
    %46 = arith.addf %41, %45 : vector<8x128xf32>
    %47 = vector.extract_strided_slice %36 {offsets = [2, 0], sizes = [8, 128], strides = [1, 1]} : vector<10x128xbf16> to vector<8x128xbf16>
    %c8 = arith.constant 8 : index
    %c0_36 = arith.constant 0 : index
    %c0_37 = arith.constant 0 : index
    %48 = vector.load %arg5[%c8, %c0_36, %c0_37] : memref<9x128x128xbf16, #tpu.memory_space<vmem>>, vector<1x128x128xbf16>
    %49 = vector.shape_cast %48 : vector<1x128x128xbf16> to vector<128x128xbf16>
    %cst_38 = arith.constant dense<0.000000e+00> : vector<8x128xf32>
    %50 = tpu.matmul %47, %49, %cst_38 {dimension_numbers = #tpu.dot_dimension_numbers<[1], [0], [0], [1], [0, 0, 1, 1], [], []>} : vector<8x128xbf16>, vector<128x128xbf16>, vector<8x128xf32> -> vector<8x128xf32>
    %51 = arith.addf %46, %50 : vector<8x128xf32>
    %c0_39 = arith.constant 0 : index
    %c0_40 = arith.constant 0 : index
    %c0_41 = arith.constant 0 : index
    %c0_42 = arith.constant 0 : index
    %52 = vector.load %arg6[%c0_39, %c0_40, %c0_41, %c0_42] : memref<1x1x8x128xf32, #tpu.memory_space<vmem>>, vector<1x1x8x128xf32>
    %53 = vector.shape_cast %52 : vector<1x1x8x128xf32> to vector<8x128xf32>
    %54 = arith.addf %51, %53 : vector<8x128xf32>
    %55 = vector.shape_cast %54 : vector<8x128xf32> to vector<1x1x8x128xf32>
    %c0_43 = arith.constant 0 : index
    %c0_44 = arith.constant 0 : index
    %c0_45 = arith.constant 0 : index
    %c0_46 = arith.constant 0 : index
    %56 = vector.load %arg7[%c0_43, %c0_44, %c0_45, %c0_46] : memref<1x1x8x128xf32, #tpu.memory_space<vmem>>, vector<1x1x8x128xf32>
    tpu.vector_store %arg7[%c0_43, %c0_44, %c0_45, %c0_46], %55 {strides = array<i32>} : memref<1x1x8x128xf32, #tpu.memory_space<vmem>>, vector<1x1x8x128xf32>,
    return
  }
  func.func @transform_0(%arg0: i32, %arg1: i32) -> (i32, i32, i32, i32) {
    %c1_i32 = arith.constant 1 : i32
    %0 = arith.muli %c1_i32, %arg1 : i32
    %c0_i32 = arith.constant 0 : i32
    %1 = arith.addi %0, %c0_i32 : i32
    %c0_i32_0 = arith.constant 0 : i32
    %c0_i32_1 = arith.constant 0 : i32
    %c0_i32_2 = arith.constant 0 : i32
    return %arg0, %1, %c0_i32_0, %c0_i32_1 : i32, i32, i32, i32
  }
  func.func @transform_1(%arg0: i32, %arg1: i32) -> (i32, i32, i32, i32) {
    %c1_i32 = arith.constant 1 : i32
    %0 = arith.muli %c1_i32, %arg1 : i32
    %c1_i32_0 = arith.constant 1 : i32
    %1 = arith.addi %0, %c1_i32_0 : i32
    %c0_i32 = arith.constant 0 : i32
    %c0_i32_1 = arith.constant 0 : i32
    %c0_i32_2 = arith.constant 0 : i32
    return %arg0, %1, %c0_i32, %c0_i32_1 : i32, i32, i32, i32
  }
  func.func @transform_2(%arg0: i32, %arg1: i32) -> (i32, i32, i32, i32) {
    %c1_i32 = arith.constant 1 : i32
    %0 = arith.muli %c1_i32, %arg1 : i32
    %c2_i32 = arith.constant 2 : i32
    %1 = arith.addi %0, %c2_i32 : i32
    %c0_i32 = arith.constant 0 : i32
    %c0_i32_0 = arith.constant 0 : i32
    %c0_i32_1 = arith.constant 0 : i32
    return %arg0, %1, %c0_i32, %c0_i32_0 : i32, i32, i32, i32
  }
  func.func @transform_3(%arg0: i32, %arg1: i32) -> (i32, i32, i32) {
    %c0_i32 = arith.constant 0 : i32
    %c0_i32_0 = arith.constant 0 : i32
    %c0_i32_1 = arith.constant 0 : i32
    %c0_i32_2 = arith.constant 0 : i32
    return %c0_i32, %c0_i32_0, %c0_i32_1 : i32, i32, i32
  }
  func.func @transform_4(%arg0: i32, %arg1: i32) -> (i32, i32, i32, i32) {
    %c0_i32 = arith.constant 0 : i32
    %c0_i32_0 = arith.constant 0 : i32
    %c0_i32_1 = arith.constant 0 : i32
    return %arg0, %arg1, %c0_i32, %c0_i32_0 : i32, i32, i32, i32
  }
  func.func @transform_5(%arg0: i32, %arg1: i32) -> (i32, i32, i32, i32) {
    %c0_i32 = arith.constant 0 : i32
    %c0_i32_0 = arith.constant 0 : i32
    %c0_i32_1 = arith.constant 0 : i32
    return %arg0, %arg1, %c0_i32, %c0_i32_0 : i32, i32, i32, i32
  }
}

module attributes {stable_mosaic.version = 11 : i64} {
  func.func @_conv3x3_kernel(%arg0: i32, %arg1: i32, %arg2: memref<1x1x10x128xbf16, #tpu.memory_space<vmem>>, %arg3: memref<1x1x10x128xbf16, #tpu.memory_space<vmem>>, %arg4: memref<1x1x10x128xbf16, #tpu.memory_space<vmem>>, %arg5: memref<9x128x128xbf16, #tpu.memory_space<vmem>>, %arg6: memref<1x1x8x128xf32, #tpu.memory_space<vmem>>, %arg7: memref<1x1x8x128xf32, #tpu.memory_space<vmem>>) attributes {dimension_semantics = [#tpu.dimension_semantics<parallel>, #tpu.dimension_semantics<parallel>], iteration_bounds = array<i64: 2, 8>, scalar_prefetch = 0 : i64, scratch_operands = 0 : i64, tpu.core_type = #tpu.core_type<tc>, window_params = [{transform_indices = @transform_0, window_bounds = array<i64: 1, 1, 10, 128>}, {transform_indices = @transform_1, window_bounds = array<i64: 1, 1, 10, 128>}, {transform_indices = @transform_2, window_bounds = array<i64: 1, 1, 10, 128>}, {pipeline_mode = #tpu.pipeline_mode<synchronous>, transform_indices = @transform_3, window_bounds = array<i64: 9, 128, 128>}, {transform_indices = @transform_4, window_bounds = array<i64: 1, 1, 8, 128>}, {transform_indices = @transform_5, window_bounds = array<i64: 1, 1, 8, 128>}]} {
    %cst = arith.constant 0.000000e+00 : f32
    %0 = vector.broadcast %cst : f32 to vector<8x128xf32>
    %c0 = arith.constant 0 : index
    %c0_0 = arith.constant 0 : index
    %c0_1 = arith.constant 0 : index
    %c0_2 = arith.constant 0 : index
    %1 = vector.load %arg2[%c0, %c0_0, %c0_1, %c0_2] : memref<1x1x10x128xbf16, #tpu.memory_space<vmem>>, vector<1x1x10x128xbf16>
    %2 = vector.shape_cast %1 : vector<1x1x10x128xbf16> to vector<10x128xbf16>
    %3 = vector.extract_strided_slice %2 {offsets = [0, 0], sizes = [8, 128], strides = [1, 1]} : vector<10x128xbf16> to vector<8x128xbf16>
    %c0_3 = arith.constant 0 : index
    %c0_4 = arith.constant 0 : index
    %c0_5 = arith.constant 0 : index
    %4 = vector.load %arg5[%c0_3, %c0_4, %c0_5] : memref<9x128x128xbf16, #tpu.memory_space<vmem>>, vector<1x128x128xbf16>
    %5 = vector.shape_cast %4 : vector<1x128x128xbf16> to vector<128x128xbf16>
    %cst_6 = arith.constant dense<0.000000e+00> : vector<8x128xf32>
    %6 = tpu.matmul %3, %5, %cst_6 {dimension_numbers = #tpu.dot_dimension_numbers<[1], [0], [0], [1], [0, 0, 1, 1], [], []>} : vector<8x128xbf16>, vector<128x128xbf16>, vector<8x128xf32> -> vector<8x128xf32>
    %7 = arith.addf %0, %6 : vector<8x128xf32>
    %8 = vector.extract_strided_slice %2 {offsets = [1, 0], sizes = [8, 128], strides = [1, 1]} : vector<10x128xbf16> to vector<8x128xbf16>
    %c1 = arith.constant 1 : index
    %c0_7 = arith.constant 0 : index
    %c0_8 = arith.constant 0 : index
    %9 = vector.load %arg5[%c1, %c0_7, %c0_8] : memref<9x128x128xbf16, #tpu.memory_space<vmem>>, vector<1x128x128xbf16>
    %10 = vector.shape_cast %9 : vector<1x128x128xbf16> to vector<128x128xbf16>
    %cst_9 = arith.constant dense<0.000000e+00> : vector<8x128xf32>
    %11 = tpu.matmul %8, %10, %cst_9 {dimension_numbers = #tpu.dot_dimension_numbers<[1], [0], [0], [1], [0, 0, 1, 1], [], []>} : vector<8x128xbf16>, vector<128x128xbf16>, vector<8x128xf32> -> vector<8x128xf32>
    %12 = arith.addf %7, %11 : vector<8x128xf32>
    %13 = vector.extract_strided_slice %2 {offsets = [2, 0], sizes = [8, 128], strides = [1, 1]} : vector<10x128xbf16> to vector<8x128xbf16>
    %c2 = arith.constant 2 : index
    %c0_10 = arith.constant 0 : index
    %c0_11 = arith.constant 0 : index
    %14 = vector.load %arg5[%c2, %c0_10, %c0_11] : memref<9x128x128xbf16, #tpu.memory_space<vmem>>, vector<1x128x128xbf16>
    %15 = vector.shape_cast %14 : vector<1x128x128xbf16> to vector<128x128xbf16>
    %cst_12 = arith.constant dense<0.000000e+00> : vector<8x128xf32>
    %16 = tpu.matmul %13, %15, %cst_12 {dimension_numbers = #tpu.dot_dimension_numbers<[1], [0], [0], [1], [0, 0, 1, 1], [], []>} : vector<8x128xbf16>, vector<128x128xbf16>, vector<8x128xf32> -> vector<8x128xf32>
    %17 = arith.addf %12, %16 : vector<8x128xf32>
    %c0_13 = arith.constant 0 : index
    %c0_14 = arith.constant 0 : index
    %c0_15 = arith.constant 0 : index
    %c0_16 = arith.constant 0 : index
    %18 = vector.load %arg3[%c0_13, %c0_14, %c0_15, %c0_16] : memref<1x1x10x128xbf16, #tpu.memory_space<vmem>>, vector<1x1x10x128xbf16>
    %19 = vector.shape_cast %18 : vector<1x1x10x128xbf16> to vector<10x128xbf16>
    %20 = vector.extract_strided_slice %19 {offsets = [0, 0], sizes = [8, 128], strides = [1, 1]} : vector<10x128xbf16> to vector<8x128xbf16>
    %c3 = arith.constant 3 : index
    %c0_17 = arith.constant 0 : index
    %c0_18 = arith.constant 0 : index
    %21 = vector.load %arg5[%c3, %c0_17, %c0_18] : memref<9x128x128xbf16, #tpu.memory_space<vmem>>, vector<1x128x128xbf16>
    %22 = vector.shape_cast %21 : vector<1x128x128xbf16> to vector<128x128xbf16>
    %cst_19 = arith.constant dense<0.000000e+00> : vector<8x128xf32>
    %23 = tpu.matmul %20, %22, %cst_19 {dimension_numbers = #tpu.dot_dimension_numbers<[1], [0], [0], [1], [0, 0, 1, 1], [], []>} : vector<8x128xbf16>, vector<128x128xbf16>, vector<8x128xf32> -> vector<8x128xf32>
    %24 = arith.addf %17, %23 : vector<8x128xf32>
    %25 = vector.extract_strided_slice %19 {offsets = [1, 0], sizes = [8, 128], strides = [1, 1]} : vector<10x128xbf16> to vector<8x128xbf16>
    %c4 = arith.constant 4 : index
    %c0_20 = arith.constant 0 : index
    %c0_21 = arith.constant 0 : index
    %26 = vector.load %arg5[%c4, %c0_20, %c0_21] : memref<9x128x128xbf16, #tpu.memory_space<vmem>>, vector<1x128x128xbf16>
    %27 = vector.shape_cast %26 : vector<1x128x128xbf16> to vector<128x128xbf16>
    %cst_22 = arith.constant dense<0.000000e+00> : vector<8x128xf32>
    %28 = tpu.matmul %25, %27, %cst_22 {dimension_numbers = #tpu.dot_dimension_numbers<[1], [0], [0], [1], [0, 0, 1, 1], [], []>} : vector<8x128xbf16>, vector<128x128xbf16>, vector<8x128xf32> -> vector<8x128xf32>
    %29 = arith.addf %24, %28 : vector<8x128xf32>
    %30 = vector.extract_strided_slice %19 {offsets = [2, 0], sizes = [8, 128], strides = [1, 1]} : vector<10x128xbf16> to vector<8x128xbf16>
    %c5 = arith.constant 5 : index
    %c0_23 = arith.constant 0 : index
    %c0_24 = arith.constant 0 : index
    %31 = vector.load %arg5[%c5, %c0_23, %c0_24] : memref<9x128x128xbf16, #tpu.memory_space<vmem>>, vector<1x128x128xbf16>
    %32 = vector.shape_cast %31 : vector<1x128x128xbf16> to vector<128x128xbf16>
    %cst_25 = arith.constant dense<0.000000e+00> : vector<8x128xf32>
    %33 = tpu.matmul %30, %32, %cst_25 {dimension_numbers = #tpu.dot_dimension_numbers<[1], [0], [0], [1], [0, 0, 1, 1], [], []>} : vector<8x128xbf16>, vector<128x128xbf16>, vector<8x128xf32> -> vector<8x128xf32>
    %34 = arith.addf %29, %33 : vector<8x128xf32>
    %c0_26 = arith.constant 0 : index
    %c0_27 = arith.constant 0 : index
    %c0_28 = arith.constant 0 : index
    %c0_29 = arith.constant 0 : index
    %35 = vector.load %arg4[%c0_26, %c0_27, %c0_28, %c0_29] : memref<1x1x10x128xbf16, #tpu.memory_space<vmem>>, vector<1x1x10x128xbf16>
    %36 = vector.shape_cast %35 : vector<1x1x10x128xbf16> to vector<10x128xbf16>
    %37 = vector.extract_strided_slice %36 {offsets = [0, 0], sizes = [8, 128], strides = [1, 1]} : vector<10x128xbf16> to vector<8x128xbf16>
    %c6 = arith.constant 6 : index
    %c0_30 = arith.constant 0 : index
    %c0_31 = arith.constant 0 : index
    %38 = vector.load %arg5[%c6, %c0_30, %c0_31] : memref<9x128x128xbf16, #tpu.memory_space<vmem>>, vector<1x128x128xbf16>
    %39 = vector.shape_cast %38 : vector<1x128x128xbf16> to vector<128x128xbf16>
    %cst_32 = arith.constant dense<0.000000e+00> : vector<8x128xf32>
    %40 = tpu.matmul %37, %39, %cst_32 {dimension_numbers = #tpu.dot_dimension_numbers<[1], [0], [0], [1], [0, 0, 1, 1], [], []>} : vector<8x128xbf16>, vector<128x128xbf16>, vector<8x128xf32> -> vector<8x128xf32>
    %41 = arith.addf %34, %40 : vector<8x128xf32>
    %42 = vector.extract_strided_slice %36 {offsets = [1, 0], sizes = [8, 128], strides = [1, 1]} : vector<10x128xbf16> to vector<8x128xbf16>
    %c7 = arith.constant 7 : index
    %c0_33 = arith.constant 0 : index
    %c0_34 = arith.constant 0 : index
    %43 = vector.load %arg5[%c7, %c0_33, %c0_34] : memref<9x128x128xbf16, #tpu.memory_space<vmem>>, vector<1x128x128xbf16>
    %44 = vector.shape_cast %43 : vector<1x128x128xbf16> to vector<128x128xbf16>
    %cst_35 = arith.constant dense<0.000000e+00> : vector<8x128xf32>
    %45 = tpu.matmul %42, %44, %cst_35 {dimension_numbers = #tpu.dot_dimension_numbers<[1], [0], [0], [1], [0, 0, 1, 1], [], []>} : vector<8x128xbf16>, vector<128x128xbf16>, vector<8x128xf32> -> vector<8x128xf32>
    %46 = arith.addf %41, %45 : vector<8x128xf32>
    %47 = vector.extract_strided_slice %36 {offsets = [2, 0], sizes = [8, 128], strides = [1, 1]} : vector<10x128xbf16> to vector<8x128xbf16>
    %c8 = arith.constant 8 : index
    %c0_36 = arith.constant 0 : index
    %c0_37 = arith.constant 0 : index
    %48 = vector.load %arg5[%c8, %c0_36, %c0_37] : memref<9x128x128xbf16, #tpu.memory_space<vmem>>, vector<1x128x128xbf16>
    %49 = vector.shape_cast %48 : vector<1x128x128xbf16> to vector<128x128xbf16>
    %cst_38 = arith.constant dense<0.000000e+00> : vector<8x128xf32>
    %50 = tpu.matmul %47, %49, %cst_38 {dimension_numbers = #tpu.dot_dimension_numbers<[1], [0], [0], [1], [0, 0, 1, 1], [], []>} : vector<8x128xbf16>, vector<128x128xbf16>, vector<8x128xf32> -> vector<8x128xf32>
    %51 = arith.addf %46, %50 : vector<8x128xf32>
    %c0_39 = arith.constant 0 : index
    %c0_40 = arith.constant 0 : index
    %c0_41 = arith.constant 0 : index
    %c0_42 = arith.constant 0 : index
    %52 = vector.load %arg6[%c0_39, %c0_40, %c0_41, %c0_42] : memref<1x1x8x128xf32, #tpu.memory_space<vmem>>, vector<1x1x8x128xf32>
    %53 = vector.shape_cast %52 : vector<1x1x8x128xf32> to vector<8x128xf32>
    %54 = arith.addf %51, %53 : vector<8x128xf32>
    %55 = vector.shape_cast %54 : vector<8x128xf32> to vector<1x1x8x128xf32>
    %c0_43 = arith.constant 0 : index
    %c0_44 = arith.constant 0 : index
    %c0_45 = arith.constant 0 : index
    %c0_46 = arith.constant 0 : index
    %56 = vector.load %arg7[%c0_43, %c0_44, %c0_45, %c0_46] : memref<1x1x8x128xf32, #tpu.memory_space<vmem>>, vector<1x1x8x128xf32>
    tpu.vector_store %arg7[%c0_43, %c0_44, %c0_45, %c0_46], %55 {strides = array<i32>} : memref<1x1x8x128xf32, #tpu.memory_space<vmem>>, vector<1x1x8x128xf32>,
    return
  }
  func.func @transform_0(%arg0: i32, %arg1: i32) -> (i32, i32, i32, i32) {
    %c1_i32 = arith.constant 1 : i32
    %0 = arith.muli %c1_i32, %arg1 : i32
    %c0_i32 = arith.constant 0 : i32
    %1 = arith.addi %0, %c0_i32 : i32
    %c0_i32_0 = arith.constant 0 : i32
    %c0_i32_1 = arith.constant 0 : i32
    %c0_i32_2 = arith.constant 0 : i32
    return %arg0, %1, %c0_i32_0, %c0_i32_1 : i32, i32, i32, i32
  }
  func.func @transform_1(%arg0: i32, %arg1: i32) -> (i32, i32, i32, i32) {
    %c1_i32 = arith.constant 1 : i32
    %0 = arith.muli %c1_i32, %arg1 : i32
    %c1_i32_0 = arith.constant 1 : i32
    %1 = arith.addi %0, %c1_i32_0 : i32
    %c0_i32 = arith.constant 0 : i32
    %c0_i32_1 = arith.constant 0 : i32
    %c0_i32_2 = arith.constant 0 : i32
    return %arg0, %1, %c0_i32, %c0_i32_1 : i32, i32, i32, i32
  }
  func.func @transform_2(%arg0: i32, %arg1: i32) -> (i32, i32, i32, i32) {
    %c1_i32 = arith.constant 1 : i32
    %0 = arith.muli %c1_i32, %arg1 : i32
    %c2_i32 = arith.constant 2 : i32
    %1 = arith.addi %0, %c2_i32 : i32
    %c0_i32 = arith.constant 0 : i32
    %c0_i32_0 = arith.constant 0 : i32
    %c0_i32_1 = arith.constant 0 : i32
    return %arg0, %1, %c0_i32, %c0_i32_0 : i32, i32, i32, i32
  }
  func.func @transform_3(%arg0: i32, %arg1: i32) -> (i32, i32, i32) {
    %c0_i32 = arith.constant 0 : i32
    %c0_i32_0 = arith.constant 0 : i32
    %c0_i32_1 = arith.constant 0 : i32
    %c0_i32_2 = arith.constant 0 : i32
    return %c0_i32, %c0_i32_0, %c0_i32_1 : i32, i32, i32
  }
  func.func @transform_4(%arg0: i32, %arg1: i32) -> (i32, i32, i32, i32) {
    %c0_i32 = arith.constant 0 : i32
    %c0_i32_0 = arith.constant 0 : i32
    %c0_i32_1 = arith.constant 0 : i32
    return %arg0, %arg1, %c0_i32, %c0_i32_0 : i32, i32, i32, i32
  }
  func.func @transform_5(%arg0: i32, %arg1: i32) -> (i32, i32, i32, i32) {
    %c0_i32 = arith.constant 0 : i32
    %c0_i32_0 = arith.constant 0 : i32
    %c0_i32_1 = arith.constant 0 : i32
    return %arg0, %arg1, %c0_i32, %c0_i32_0 : i32, i32, i32, i32
  }
}

</mosaic_0001>

<bundles_post_ra>
// kernel: network_block.13
= control target key start
LH: loop header
LB: loop body
LE: loop exit
PB: predicated region body
PF: predicated region fallthrough
CT: control target
= control target key end

     0   :  { %8 = vsyncpa [#allocation3], 0  ;;  %s339_s9 = smov [#allocation2]   ;;  %s388_s0 = inlined_call_operand.hbm [shape: f32[512,128], index: 0, kind: input, shape index: {}]   ;;  %s389_s1 = inlined_call_operand.vmem [shape: f32[1,128], index: 1, kind: output, shape index: {0}]   ;;  %s390_s2 = inlined_call_operand.vmem [shape: f32[1,128], index: 2, kind: output, shape index: {1}]  }
   0x1   :  { %s14_s10 = sshll.u32 %s339_s9, 4  ;;  %s315_s13 = scalar_lea.hbm %s388_s0, 8192  ;;  %s15_s10 = int_to_ptr.vmem [resolvable:$true] %s14_s10 }
   0x2   :  { %p316_p0 = scmp.ne.s32.totalorder %s388_s0, %s315_s13  ;;  %p319_p1 = scmp.lt.u32.totalorder %s315_s13, %s388_s0 }
   0x4   :  { %p321_p2 = pnand %p319_p1, %p316_p0 }
   0x6   :  { %324 = shalt.err (!%p321_p2)
}
   0x7   :  { %s325_s18 = scalar_lea.vmem %s15_s10, 8192  ;;  %p330_p4 = scmp.lt.s32.totalorder %s15_s10, %s15_s10 }
   0x8   :  { %p326_p3 = scmp.ne.s32.totalorder %s15_s10, %s325_s18  ;;  %p331_p5 = scmp.lt.s32.totalorder %s325_s18, %s325_s18 }
   0xa   :  { %p332_p6 = por %p331_p5, %p330_p4 }
   0xc   :  { %p333_p7 = pnand %p332_p6, %p326_p3 }
   0xe   :  { %336 = shalt.err (!%p333_p7)
}
   0xf   :  { %s340_s19 = smov 128   ;;  %s341_s20 = smov 8  }
  0x10   :  { %20 = dma.hbm_to_vmem [thread:$0]  %s388_s0, 8192, %s15_s10, [#allocation3], %s340_s19, %s340_s19, %s341_s20  }
  0x11   :  { %337 = dma.done.wait [#allocation3], 8192  }
  0x12   :  { %338 = vsyncadd [#allocation3], 4294959104  ;;  %v342_v0 = vmov 0.0   ;;  %v30_v1 = vld [vmem:[#allocation2] sm:$0xff]  ;;  %v31_v2 = vld [vmem:[#allocation2 + $0x8] sm:$0xff] }
  0x13   :  { %28 = vst [vmem:[%s389_s1] sm:$0x1] %v342_v0  ;;  %29 = vst [vmem:[%s390_s2] sm:$0x1] %v342_v0  ;;  %v32_v3 = vld [vmem:[#allocation2 + $0x10] sm:$0xff]  ;;  %v33_v4 = vld [vmem:[#allocation2 + $0x18] sm:$0xff]  ;;  %v95_v5 = vadd.f32 %v31_v2, %v30_v1  ;;  %v167_v6 = vmul.f32 %v30_v1, %v30_v1  ;;  %v168_v7 = vmul.f32 %v31_v2, %v31_v2 }
  0x14   :  { %v169_v8 = vmul.f32 %v32_v3, %v32_v3  ;;  %v34_v9 = vld [vmem:[#allocation2 + $0x20] sm:$0xff]  ;;  %v170_v11 = vmul.f32 %v33_v4, %v33_v4  ;;  %v35_v13 = vld [vmem:[#allocation2 + $0x28] sm:$0xff]  ;;  %v36_v17 = vld [vmem:[#allocation2 + $0x30] sm:$0xff] }
  0x15   :  { %v96_v10 = vadd.f32 %v95_v5, %v32_v3  ;;  %v231_v12 = vadd.f32 %v168_v7, %v167_v6  ;;  %v171_v15 = vmul.f32 %v34_v9, %v34_v9  ;;  %v172_v19 = vmul.f32 %v35_v13, %v35_v13  ;;  %v37_v21 = vld [vmem:[#allocation2 + $0x38] sm:$0xff]  ;;  %v38_v25 = vld [vmem:[#allocation2 + $0x40] sm:$0xff]  ;;  %v39_v29 = vld [vmem:[#allocation2 + $0x48] sm:$0xff] }
  0x16   :  { %v173_v23 = vmul.f32 %v36_v17, %v36_v17  ;;  %v174_v27 = vmul.f32 %v37_v21, %v37_v21  ;;  %v175_v31 = vmul.f32 %v38_v25, %v38_v25  ;;  %v40_v33 = vld [vmem:[#allocation2 + $0x50] sm:$0xff]  ;;  %v176_v35 = vmul.f32 %v39_v29, %v39_v29  ;;  %v41_v37 = vld [vmem:[#allocation2 + $0x58] sm:$0xff]  ;;  %v42_v41 = vld [vmem:[#allocation2 + $0x60] sm:$0xff] }
  0x17   :  { %v97_v14 = vadd.f32 %v96_v10, %v33_v4  ;;  %v232_v16 = vadd.f32 %v231_v12, %v169_v8  ;;  %v177_v39 = vmul.f32 %v40_v33, %v40_v33  ;;  %v178_v43 = vmul.f32 %v41_v37, %v41_v37  ;;  %v43_v45 = vld [vmem:[#allocation2 + $0x68] sm:$0xff]  ;;  %v44_v49 = vld [vmem:[#allocation2 + $0x70] sm:$0xff]  ;;  %v45_v53 = vld [vmem:[#allocation2 + $0x78] sm:$0xff] }
  0x18   :  { %v179_v47 = vmul.f32 %v42_v41, %v42_v41  ;;  %v180_v51 = vmul.f32 %v43_v45, %v43_v45  ;;  %v181_v55 = vmul.f32 %v44_v49, %v44_v49  ;;  %v46_v57 = vld [vmem:[#allocation2 + $0x80] sm:$0xff]  ;;  %v182_v59 = vmul.f32 %v45_v53, %v45_v53  ;;  %v47_v61 = vld [vmem:[#allocation2 + $0x88] sm:$0xff]  ;;  %v48_v1 = vld [vmem:[#allocation2 + $0x90] sm:$0xff] }
  0x19   :  { %v98_v18 = vadd.f32 %v97_v14, %v34_v9  ;;  %v233_v20 = vadd.f32 %v232_v16, %v170_v11  ;;  %v183_v63 = vmul.f32 %v46_v57, %v46_v57  ;;  %v184_v3 = vmul.f32 %v47_v61, %v47_v61  ;;  %v49_v5 = vld [vmem:[#allocation2 + $0x98] sm:$0xff]  ;;  %v50_v9 = vld [vmem:[#allocation2 + $0xa0] sm:$0xff] }
  0x1a   :  { %v185_v7 = vmul.f32 %v48_v1, %v48_v1  ;;  %v186_v11 = vmul.f32 %v49_v5, %v49_v5 }
  0x1b   :  { %v99_v22 = vadd.f32 %v98_v18, %v35_v13  ;;  %v234_v24 = vadd.f32 %v233_v20, %v171_v15  ;;  %v51_v13 = vld [vmem:[#allocation2 + $0xa8] sm:$0xff]  ;;  %v187_v15 = vmul.f32 %v50_v9, %v50_v9 }
  0x1d   :  { %v100_v26 = vadd.f32 %v99_v22, %v36_v17  ;;  %v235_v28 = vadd.f32 %v234_v24, %v172_v19  ;;  %v52_v17 = vld [vmem:[#allocation2 + $0xb0] sm:$0xff]  ;;  %v188_v19 = vmul.f32 %v51_v13, %v51_v13 }
  0x1f   :  { %v101_v30 = vadd.f32 %v100_v26, %v37_v21  ;;  %v236_v32 = vadd.f32 %v235_v28, %v173_v23  ;;  %v53_v21 = vld [vmem:[#allocation2 + $0xb8] sm:$0xff]  ;;  %v189_v23 = vmul.f32 %v52_v17, %v52_v17 }
  0x21   :  { %v102_v34 = vadd.f32 %v101_v30, %v38_v25  ;;  %v237_v36 = vadd.f32 %v236_v32, %v174_v27  ;;  %v54_v25 = vld [vmem:[#allocation2 + $0xc0] sm:$0xff]  ;;  %v190_v27 = vmul.f32 %v53_v21, %v53_v21 }
  0x23   :  { %v103_v38 = vadd.f32 %v102_v34, %v39_v29  ;;  %v238_v40 = vadd.f32 %v237_v36, %v175_v31  ;;  %v55_v29 = vld [vmem:[#allocation2 + $0xc8] sm:$0xff]  ;;  %v191_v31 = vmul.f32 %v54_v25, %v54_v25 }
  0x25   :  { %v104_v42 = vadd.f32 %v103_v38, %v40_v33  ;;  %v239_v44 = vadd.f32 %v238_v40, %v176_v35  ;;  %v56_v33 = vld [vmem:[#allocation2 + $0xd0] sm:$0xff]  ;;  %v192_v35 = vmul.f32 %v55_v29, %v55_v29 }
  0x27   :  { %v105_v46 = vadd.f32 %v104_v42, %v41_v37  ;;  %v240_v48 = vadd.f32 %v239_v44, %v177_v39  ;;  %v57_v37 = vld [vmem:[#allocation2 + $0xd8] sm:$0xff]  ;;  %v193_v39 = vmul.f32 %v56_v33, %v56_v33 }
  0x29   :  { %v106_v50 = vadd.f32 %v105_v46, %v42_v41  ;;  %v241_v52 = vadd.f32 %v240_v48, %v178_v43  ;;  %v58_v41 = vld [vmem:[#allocation2 + $0xe0] sm:$0xff]  ;;  %v194_v43 = vmul.f32 %v57_v37, %v57_v37 }
  0x2b   :  { %v107_v54 = vadd.f32 %v106_v50, %v43_v45  ;;  %v242_v56 = vadd.f32 %v241_v52, %v179_v47  ;;  %v59_v45 = vld [vmem:[#allocation2 + $0xe8] sm:$0xff]  ;;  %v195_v47 = vmul.f32 %v58_v41, %v58_v41 }
  0x2d   :  { %v108_v58 = vadd.f32 %v107_v54, %v44_v49  ;;  %v243_v60 = vadd.f32 %v242_v56, %v180_v51  ;;  %v60_v49 = vld [vmem:[#allocation2 + $0xf0] sm:$0xff]  ;;  %v196_v51 = vmul.f32 %v59_v45, %v59_v45 }
  0x2f   :  { %v109_v62 = vadd.f32 %v108_v58, %v45_v53  ;;  %v244_v0 = vadd.f32 %v243_v60, %v181_v55  ;;  %v61_v53 = vld [vmem:[#allocation2 + $0xf8] sm:$0xff]  ;;  %v197_v55 = vmul.f32 %v60_v49, %v60_v49 }
  0x31   :  { %v110_v2 = vadd.f32 %v109_v62, %v46_v57  ;;  %v245_v4 = vadd.f32 %v244_v0, %v182_v59  ;;  %v62_v57 = vld [vmem:[#allocation2 + $0x100] sm:$0xff]  ;;  %v198_v59 = vmul.f32 %v61_v53, %v61_v53 }
  0x33   :  { %v111_v6 = vadd.f32 %v110_v2, %v47_v61  ;;  %v246_v8 = vadd.f32 %v245_v4, %v183_v63  ;;  %v63_v61 = vld [vmem:[#allocation2 + $0x108] sm:$0xff]  ;;  %v199_v63 = vmul.f32 %v62_v57, %v62_v57 }
  0x35   :  { %v112_v10 = vadd.f32 %v111_v6, %v48_v1  ;;  %v247_v12 = vadd.f32 %v246_v8, %v184_v3  ;;  %v64_v1 = vld [vmem:[#allocation2 + $0x110] sm:$0xff]  ;;  %v200_v3 = vmul.f32 %v63_v61, %v63_v61 }
  0x37   :  { %v113_v14 = vadd.f32 %v112_v10, %v49_v5  ;;  %v248_v16 = vadd.f32 %v247_v12, %v185_v7  ;;  %v65_v5 = vld [vmem:[#allocation2 + $0x118] sm:$0xff]  ;;  %v201_v7 = vmul.f32 %v64_v1, %v64_v1 }
  0x39   :  { %v114_v18 = vadd.f32 %v113_v14, %v50_v9  ;;  %v249_v20 = vadd.f32 %v248_v16, %v186_v11  ;;  %v66_v9 = vld [vmem:[#allocation2 + $0x120] sm:$0xff]  ;;  %v202_v11 = vmul.f32 %v65_v5, %v65_v5 }
  0x3b   :  { %v115_v22 = vadd.f32 %v114_v18, %v51_v13  ;;  %v250_v24 = vadd.f32 %v249_v20, %v187_v15  ;;  %v67_v13 = vld [vmem:[#allocation2 + $0x128] sm:$0xff]  ;;  %v203_v15 = vmul.f32 %v66_v9, %v66_v9 }
  0x3d   :  { %v116_v26 = vadd.f32 %v115_v22, %v52_v17  ;;  %v251_v28 = vadd.f32 %v250_v24, %v188_v19  ;;  %v68_v17 = vld [vmem:[#allocation2 + $0x130] sm:$0xff]  ;;  %v204_v19 = vmul.f32 %v67_v13, %v67_v13 }
  0x3f   :  { %v117_v30 = vadd.f32 %v116_v26, %v53_v21  ;;  %v252_v32 = vadd.f32 %v251_v28, %v189_v23  ;;  %v69_v21 = vld [vmem:[#allocation2 + $0x138] sm:$0xff]  ;;  %v205_v23 = vmul.f32 %v68_v17, %v68_v17 }
  0x41   :  { %v118_v34 = vadd.f32 %v117_v30, %v54_v25  ;;  %v253_v36 = vadd.f32 %v252_v32, %v190_v27  ;;  %v70_v25 = vld [vmem:[#allocation2 + $0x140] sm:$0xff]  ;;  %v206_v27 = vmul.f32 %v69_v21, %v69_v21 }
  0x43   :  { %v119_v38 = vadd.f32 %v118_v34, %v55_v29  ;;  %v254_v40 = vadd.f32 %v253_v36, %v191_v31  ;;  %v71_v29 = vld [vmem:[#allocation2 + $0x148] sm:$0xff]  ;;  %v207_v31 = vmul.f32 %v70_v25, %v70_v25 }
  0x45   :  { %v120_v42 = vadd.f32 %v119_v38, %v56_v33  ;;  %v255_v44 = vadd.f32 %v254_v40, %v192_v35  ;;  %v72_v33 = vld [vmem:[#allocation2 + $0x150] sm:$0xff]  ;;  %v208_v35 = vmul.f32 %v71_v29, %v71_v29 }
  0x47   :  { %v121_v46 = vadd.f32 %v120_v42, %v57_v37  ;;  %v256_v48 = vadd.f32 %v255_v44, %v193_v39  ;;  %v73_v37 = vld [vmem:[#allocation2 + $0x158] sm:$0xff]  ;;  %v209_v39 = vmul.f32 %v72_v33, %v72_v33 }
  0x49   :  { %v122_v50 = vadd.f32 %v121_v46, %v58_v41  ;;  %v257_v52 = vadd.f32 %v256_v48, %v194_v43  ;;  %v74_v41 = vld [vmem:[#allocation2 + $0x160] sm:$0xff]  ;;  %v210_v43 = vmul.f32 %v73_v37, %v73_v37 }
  0x4b   :  { %v123_v54 = vadd.f32 %v122_v50, %v59_v45  ;;  %v258_v56 = vadd.f32 %v257_v52, %v195_v47  ;;  %v75_v45 = vld [vmem:[#allocation2 + $0x168] sm:$0xff]  ;;  %v211_v47 = vmul.f32 %v74_v41, %v74_v41 }
  0x4d   :  { %v124_v58 = vadd.f32 %v123_v54, %v60_v49  ;;  %v259_v60 = vadd.f32 %v258_v56, %v196_v51  ;;  %v76_v49 = vld [vmem:[#allocation2 + $0x170] sm:$0xff]  ;;  %v212_v51 = vmul.f32 %v75_v45, %v75_v45 }
  0x4f   :  { %v125_v62 = vadd.f32 %v124_v58, %v61_v53  ;;  %v260_v0 = vadd.f32 %v259_v60, %v197_v55  ;;  %v77_v53 = vld [vmem:[#allocation2 + $0x178] sm:$0xff]  ;;  %v213_v55 = vmul.f32 %v76_v49, %v76_v49 }
  0x51   :  { %v126_v2 = vadd.f32 %v125_v62, %v62_v57  ;;  %v261_v4 = vadd.f32 %v260_v0, %v198_v59  ;;  %v78_v57 = vld [vmem:[#allocation2 + $0x180] sm:$0xff]  ;;  %v214_v59 = vmul.f32 %v77_v53, %v77_v53 }
  0x53   :  { %v127_v6 = vadd.f32 %v126_v2, %v63_v61  ;;  %v262_v8 = vadd.f32 %v261_v4, %v199_v63  ;;  %v79_v61 = vld [vmem:[#allocation2 + $0x188] sm:$0xff]  ;;  %v215_v63 = vmul.f32 %v78_v57, %v78_v57 }
  0x55   :  { %v128_v10 = vadd.f32 %v127_v6, %v64_v1  ;;  %v263_v12 = vadd.f32 %v262_v8, %v200_v3  ;;  %v80_v1 = vld [vmem:[#allocation2 + $0x190] sm:$0xff]  ;;  %v216_v3 = vmul.f32 %v79_v61, %v79_v61 }
  0x57   :  { %v129_v14 = vadd.f32 %v128_v10, %v65_v5  ;;  %v264_v16 = vadd.f32 %v263_v12, %v201_v7  ;;  %v81_v5 = vld [vmem:[#allocation2 + $0x198] sm:$0xff]  ;;  %v217_v7 = vmul.f32 %v80_v1, %v80_v1 }
  0x59   :  { %v130_v18 = vadd.f32 %v129_v14, %v66_v9  ;;  %v265_v20 = vadd.f32 %v264_v16, %v202_v11  ;;  %v82_v9 = vld [vmem:[#allocation2 + $0x1a0] sm:$0xff]  ;;  %v218_v11 = vmul.f32 %v81_v5, %v81_v5 }
  0x5b   :  { %v131_v22 = vadd.f32 %v130_v18, %v67_v13  ;;  %v266_v24 = vadd.f32 %v265_v20, %v203_v15  ;;  %v83_v13 = vld [vmem:[#allocation2 + $0x1a8] sm:$0xff]  ;;  %v219_v15 = vmul.f32 %v82_v9, %v82_v9 }
  0x5d   :  { %v132_v26 = vadd.f32 %v131_v22, %v68_v17  ;;  %v267_v28 = vadd.f32 %v266_v24, %v204_v19  ;;  %v84_v17 = vld [vmem:[#allocation2 + $0x1b0] sm:$0xff]  ;;  %v220_v19 = vmul.f32 %v83_v13, %v83_v13 }
  0x5f   :  { %v133_v30 = vadd.f32 %v132_v26, %v69_v21  ;;  %v268_v32 = vadd.f32 %v267_v28, %v205_v23  ;;  %v85_v21 = vld [vmem:[#allocation2 + $0x1b8] sm:$0xff]  ;;  %v221_v23 = vmul.f32 %v84_v17, %v84_v17 }
  0x61   :  { %v134_v34 = vadd.f32 %v133_v30, %v70_v25  ;;  %v269_v36 = vadd.f32 %v268_v32, %v206_v27  ;;  %v86_v25 = vld [vmem:[#allocation2 + $0x1c0] sm:$0xff]  ;;  %v222_v27 = vmul.f32 %v85_v21, %v85_v21 }
  0x63   :  { %v135_v38 = vadd.f32 %v134_v34, %v71_v29  ;;  %v270_v40 = vadd.f32 %v269_v36, %v207_v31  ;;  %v87_v29 = vld [vmem:[#allocation2 + $0x1c8] sm:$0xff]  ;;  %v223_v31 = vmul.f32 %v86_v25, %v86_v25 }
  0x65   :  { %v136_v42 = vadd.f32 %v135_v38, %v72_v33  ;;  %v271_v44 = vadd.f32 %v270_v40, %v208_v35  ;;  %v88_v33 = vld [vmem:[#allocation2 + $0x1d0] sm:$0xff]  ;;  %v224_v35 = vmul.f32 %v87_v29, %v87_v29 }
  0x67   :  { %v137_v46 = vadd.f32 %v136_v42, %v73_v37  ;;  %v272_v48 = vadd.f32 %v271_v44, %v209_v39  ;;  %v89_v37 = vld [vmem:[#allocation2 + $0x1d8] sm:$0xff]  ;;  %v225_v39 = vmul.f32 %v88_v33, %v88_v33 }
  0x69   :  { %v138_v50 = vadd.f32 %v137_v46, %v74_v41  ;;  %v273_v52 = vadd.f32 %v272_v48, %v210_v43  ;;  %v90_v41 = vld [vmem:[#allocation2 + $0x1e0] sm:$0xff]  ;;  %v226_v43 = vmul.f32 %v89_v37, %v89_v37 }
  0x6b   :  { %v139_v54 = vadd.f32 %v138_v50, %v75_v45  ;;  %v274_v56 = vadd.f32 %v273_v52, %v211_v47  ;;  %v91_v45 = vld [vmem:[#allocation2 + $0x1e8] sm:$0xff]  ;;  %v227_v47 = vmul.f32 %v90_v41, %v90_v41 }
  0x6d   :  { %v140_v58 = vadd.f32 %v139_v54, %v76_v49  ;;  %v275_v60 = vadd.f32 %v274_v56, %v212_v51  ;;  %v92_v49 = vld [vmem:[#allocation2 + $0x1f0] sm:$0xff]  ;;  %v228_v51 = vmul.f32 %v91_v45, %v91_v45 }
  0x6f   :  { %v141_v62 = vadd.f32 %v140_v58, %v77_v53  ;;  %v276_v0 = vadd.f32 %v275_v60, %v213_v55  ;;  %v93_v53 = vld [vmem:[#allocation2 + $0x1f8] sm:$0xff]  ;;  %v229_v55 = vmul.f32 %v92_v49, %v92_v49 }
  0x70   :  { %v230_v58 = vmul.f32 %v93_v53, %v93_v53 }
  0x71   :  { %v142_v2 = vadd.f32 %v141_v62, %v78_v57  ;;  %v277_v4 = vadd.f32 %v276_v0, %v214_v59 }
  0x73   :  { %v143_v6 = vadd.f32 %v142_v2, %v79_v61  ;;  %v278_v8 = vadd.f32 %v277_v4, %v215_v63 }
  0x75   :  { %v144_v10 = vadd.f32 %v143_v6, %v80_v1  ;;  %v279_v12 = vadd.f32 %v278_v8, %v216_v3 }
  0x77   :  { %v145_v14 = vadd.f32 %v144_v10, %v81_v5  ;;  %v280_v16 = vadd.f32 %v279_v12, %v217_v7  ;;  %v94_v7 = vld [vmem:[%s389_s1] sm:$0x1] }
  0x78   :  { %v166_v12 = vld [vmem:[%s390_s2] sm:$0x1] }
  0x79   :  { %v146_v18 = vadd.f32 %v145_v14, %v82_v9  ;;  %v281_v20 = vadd.f32 %v280_v16, %v218_v11 }
  0x7b   :  { %v147_v22 = vadd.f32 %v146_v18, %v83_v13  ;;  %v282_v24 = vadd.f32 %v281_v20, %v219_v15 }
  0x7d   :  { %v148_v26 = vadd.f32 %v147_v22, %v84_v17  ;;  %v283_v28 = vadd.f32 %v282_v24, %v220_v19 }
  0x7f   :  { %v149_v30 = vadd.f32 %v148_v26, %v85_v21  ;;  %v284_v32 = vadd.f32 %v283_v28, %v221_v23 }
  0x81   :  { %v150_v34 = vadd.f32 %v149_v30, %v86_v25  ;;  %v285_v36 = vadd.f32 %v284_v32, %v222_v27 }
  0x83   :  { %v151_v38 = vadd.f32 %v150_v34, %v87_v29  ;;  %v286_v40 = vadd.f32 %v285_v36, %v223_v31 }
  0x85   :  { %v152_v42 = vadd.f32 %v151_v38, %v88_v33  ;;  %v287_v44 = vadd.f32 %v286_v40, %v224_v35 }
  0x87   :  { %v153_v46 = vadd.f32 %v152_v42, %v89_v37  ;;  %v288_v48 = vadd.f32 %v287_v44, %v225_v39 }
  0x89   :  { %v154_v50 = vadd.f32 %v153_v46, %v90_v41  ;;  %v289_v52 = vadd.f32 %v288_v48, %v226_v43 }
  0x8b   :  { %v155_v54 = vadd.f32 %v154_v50, %v91_v45  ;;  %v290_v56 = vadd.f32 %v289_v52, %v227_v47 }
  0x8d   :  { %v156_v57 = vadd.f32 %v155_v54, %v92_v49  ;;  %v291_v59 = vadd.f32 %v290_v56, %v228_v51 }
  0x8f   :  { %v157_v60 = vadd.f32 %v156_v57, %v93_v53  ;;  %v292_v61 = vadd.f32 %v291_v59, %v229_v55 }
  0x91   :  { %v158_v62 = vrot.slane %v157_v60, 4  ;;  %v293_v63 = vadd.f32 %v292_v61, %v230_v58 }
  0x93   :  { %v159_v0 = vadd.f32 %v158_v62, %v157_v60  ;;  %v294_v1 = vrot.slane %v293_v63, 4 }
  0x95   :  { %v160_v2 = vrot.slane %v159_v0, 2  ;;  %v295_v3 = vadd.f32 %v294_v1, %v293_v63 }
  0x97   :  { %v161_v4 = vadd.f32 %v160_v2, %v159_v0  ;;  %v296_v5 = vrot.slane %v295_v3, 2 }
  0x99   :  { %v162_v6 = vrot.slane %v161_v4, 1  ;;  %v297_v8 = vadd.f32 %v296_v5, %v295_v3 }
  0x9b   :  { %v163_v9 = vadd.f32 %v162_v6, %v161_v4  ;;  %v298_v10 = vrot.slane %v297_v8, 1 }
  0x9d   :  { %v164_v11 = vadd.f32 %v163_v9, %v94_v7  ;;  %v299_v13 = vadd.f32 %v298_v10, %v297_v8 }
  0x9f   :  { %165 = vst [vmem:[%s389_s1] sm:$0x1] %v164_v11  ;;  %v300_v14 = vadd.f32 %v299_v13, %v166_v12 }
  0xa1   :  { %301 = vst [vmem:[%s390_s2] sm:$0x1] %v300_v14 }
  0xa2   :  { %310 = vsyncpa [#allocation3], 1 }

// kernel: network_block.14
= control target key start
LH: loop header
LB: loop body
LE: loop exit
PB: predicated region body
PF: predicated region fallthrough
CT: control target
= control target key end

     0   :  { %s1375_s0 = inlined_call_operand.vmem [shape: f32[512,128], index: 0, kind: input, shape index: {}]   ;;  %s1376_s1 = inlined_call_operand.vmem [shape: f32[1,128], index: 1, kind: input, shape index: {}]   ;;  %s1377_s2 = inlined_call_operand.vmem [shape: f32[1,128], index: 2, kind: input, shape index: {}]   ;;  %s1378_s3 = inlined_call_operand.vmem [shape: bf16[512,128], index: 3, kind: output, shape index: {}]  }
   0x1   :  { %v14_v0 = vld [vmem:[%s1375_s0] sm:$0xff]  ;;  %v15_v1 = vld [vmem:[%s1375_s0 + $0x8] sm:$0xff]  ;;  %v16_v6 = vld [vmem:[%s1375_s0 + $0x10] sm:$0xff] }
   0x2   :  { %v958_v2 = vld [vmem:[%s1376_s1] ss:$0 sm:$0xff]  ;;  %v17_v7 = vld [vmem:[%s1375_s0 + $0x18] sm:$0xff]  ;;  %v19_v11 = vld [vmem:[%s1375_s0 + $0x28] sm:$0xff] }
   0x3   :  { %v85_v3 = vmul.f32 %v958_v2, %v14_v0  ;;  %v86_v4 = vmul.f32 %v958_v2, %v15_v1  ;;  %v965_v5 = vld [vmem:[%s1377_s2] ss:$0 sm:$0xff]  ;;  %v87_v8 = vmul.f32 %v958_v2, %v16_v6  ;;  %v88_v9 = vmul.f32 %v958_v2, %v17_v7  ;;  %v20_v12 = vld [vmem:[%s1375_s0 + $0x30] sm:$0xff]  ;;  %v21_v17 = vld [vmem:[%s1375_s0 + $0x38] sm:$0xff] }
   0x4   :  { %v18_v10 = vld [vmem:[%s1375_s0 + $0x20] sm:$0xff]  ;;  %v90_v16 = vmul.f32 %v958_v2, %v19_v11  ;;  %v91_v20 = vmul.f32 %v958_v2, %v20_v12  ;;  %v92_v21 = vmul.f32 %v958_v2, %v21_v17  ;;  %v23_v27 = vld [vmem:[%s1375_s0 + $0x48] sm:$0xff]  ;;  %v24_v32 = vld [vmem:[%s1375_s0 + $0x50] sm:$0xff] }
   0x5   :  { %v156_v13 = vadd.f32 %v965_v5, %v85_v3  ;;  %v157_v14 = vadd.f32 %v965_v5, %v86_v4  ;;  %v89_v15 = vmul.f32 %v958_v2, %v18_v10  ;;  %v158_v18 = vadd.f32 %v965_v5, %v87_v8  ;;  %v22_v22 = vld [vmem:[%s1375_s0 + $0x40] sm:$0xff]  ;;  %v25_v33 = vld [vmem:[%s1375_s0 + $0x58] sm:$0xff]  ;;  %v27_v39 = vld [vmem:[%s1375_s0 + $0x68] sm:$0xff] }
   0x6   :  { %v159_v19 = vadd.f32 %v965_v5, %v88_v9  ;;  %v161_v26 = vadd.f32 %v965_v5, %v90_v16  ;;  %v162_v30 = vadd.f32 %v965_v5, %v91_v20  ;;  %v163_v31 = vadd.f32 %v965_v5, %v92_v21  ;;  %v26_v38 = vld [vmem:[%s1375_s0 + $0x60] sm:$0xff]  ;;  %v28_v44 = vld [vmem:[%s1375_s0 + $0x70] sm:$0xff]  ;;  %v29_v49 = vld [vmem:[%s1375_s0 + $0x78] sm:$0xff] }
   0x7   :  { %v220_v23 = vmax.f32 %v156_v13, 0.0  ;;  %v221_v24 = vmax.f32 %v157_v14, 0.0  ;;  %v160_v25 = vadd.f32 %v965_v5, %v89_v15  ;;  %v222_v28 = vmax.f32 %v158_v18, 0.0  ;;  %v30_v54 = vld [vmem:[%s1375_s0 + $0x80] sm:$0xff]  ;;  %v31_v63 = vld [vmem:[%s1375_s0 + $0x88] sm:$0xff]  ;;  %v32_v6 = vld [vmem:[%s1375_s0 + $0x90] sm:$0xff] }
   0x8   :  { %v223_v29 = vmax.f32 %v159_v19, 0.0  ;;  %v225_v36 = vmax.f32 %v161_v26, 0.0  ;;  %v93_v37 = vmul.f32 %v958_v2, %v22_v22  ;;  %v226_v41 = vmax.f32 %v162_v30, 0.0  ;;  %v33_v7 = vld [vmem:[%s1375_s0 + $0x98] sm:$0xff]  ;;  %v34_v12 = vld [vmem:[%s1375_s0 + $0xa0] sm:$0xff]  ;;  %v35_v13 = vld [vmem:[%s1375_s0 + $0xa8] sm:$0xff] }
   0x9   :  { %v741_v34 = vpack.c.bf16 %v221_v24, %v220_v23  ;;  %v224_v35 = vmax.f32 %v160_v25, 0.0  ;;  %v227_v42 = vmax.f32 %v163_v31, 0.0  ;;  %v94_v43 = vmul.f32 %v958_v2, %v23_v27  ;;  %v36_v18 = vld [vmem:[%s1375_s0 + $0xb0] sm:$0xff]  ;;  %v37_v23 = vld [vmem:[%s1375_s0 + $0xb8] sm:$0xff] }
   0xa   :  { %v746_v40 = vpack.c.bf16 %v223_v29, %v222_v28  ;;  %v164_v46 = vadd.f32 %v965_v5, %v93_v37  ;;  %v95_v47 = vmul.f32 %v958_v2, %v24_v32  ;;  %v96_v48 = vmul.f32 %v958_v2, %v25_v33  ;;  %v38_v28 = vld [vmem:[%s1375_s0 + $0xc0] sm:$0xff]  ;;  %v39_v37 = vld [vmem:[%s1375_s0 + $0xc8] sm:$0xff] }
   0xb   :  { %742 = vst [vmem:[%s1378_s3] sm:$0xff] %v741_v34   ;;  %v751_v45 = vpack.c.bf16 %v225_v36, %v224_v35  ;;  %v756_v50 = vpack.c.bf16 %v227_v42, %v226_v41  ;;  %v165_v51 = vadd.f32 %v965_v5, %v94_v43  ;;  %v97_v52 = vmul.f32 %v958_v2, %v26_v38  ;;  %v40_v42 = vld [vmem:[%s1375_s0 + $0xd0] sm:$0xff]  ;;  %v41_v43 = vld [vmem:[%s1375_s0 + $0xd8] sm:$0xff] }
   0xc   :  { %898 = vst [vmem:[%s1378_s3 + $0x8] sm:$0xff] %v746_v40   ;;  %v98_v53 = vmul.f32 %v958_v2, %v27_v39  ;;  %v228_v55 = vmax.f32 %v164_v46, 0.0  ;;  %v166_v56 = vadd.f32 %v965_v5, %v95_v47  ;;  %v167_v57 = vadd.f32 %v965_v5, %v96_v48  ;;  %v42_v48 = vld [vmem:[%s1375_s0 + $0xe0] sm:$0xff] }
   0xd   :  { %899 = vst [vmem:[%s1378_s3 + $0x10] sm:$0xff] %v751_v45   ;;  %v99_v58 = vmul.f32 %v958_v2, %v28_v44  ;;  %900 = vst [vmem:[%s1378_s3 + $0x18] sm:$0xff] %v756_v50   ;;  %v229_v59 = vmax.f32 %v165_v51, 0.0  ;;  %v168_v60 = vadd.f32 %v965_v5, %v97_v52  ;;  %v100_v62 = vmul.f32 %v958_v2, %v29_v49  ;;  %v43_v49 = vld [vmem:[%s1375_s0 + $0xe8] sm:$0xff] }
   0xe   :  { %v169_v61 = vadd.f32 %v965_v5, %v98_v53  ;;  %v230_v0 = vmax.f32 %v166_v56, 0.0  ;;  %v231_v1 = vmax.f32 %v167_v57, 0.0  ;;  %v101_v4 = vmul.f32 %v958_v2, %v30_v54  ;;  %v44_v54 = vld [vmem:[%s1375_s0 + $0xf0] sm:$0xff] }
   0xf   :  { %v170_v3 = vadd.f32 %v965_v5, %v99_v58  ;;  %v761_v8 = vpack.c.bf16 %v229_v59, %v228_v55  ;;  %v232_v9 = vmax.f32 %v168_v60, 0.0  ;;  %v171_v11 = vadd.f32 %v965_v5, %v100_v62  ;;  %v45_v59 = vld [vmem:[%s1375_s0 + $0xf8] sm:$0xff] }
  0x10   :  { %v233_v10 = vmax.f32 %v169_v61, 0.0  ;;  %v766_v14 = vpack.c.bf16 %v231_v1, %v230_v0  ;;  %v102_v16 = vmul.f32 %v958_v2, %v31_v63  ;;  %v172_v17 = vadd.f32 %v965_v5, %v101_v4  ;;  %v46_v0 = vld [vmem:[%s1375_s0 + $0x100] sm:$0xff] }
  0x11   :  { %v234_v15 = vmax.f32 %v170_v3, 0.0  ;;  %901 = vst [vmem:[%s1378_s3 + $0x20] sm:$0xff] %v761_v8   ;;  %v235_v20 = vmax.f32 %v171_v11, 0.0  ;;  %v103_v21 = vmul.f32 %v958_v2, %v32_v6  ;;  %v104_v22 = vmul.f32 %v958_v2, %v33_v7  ;;  %v47_v11 = vld [vmem:[%s1375_s0 + $0x108] sm:$0xff] }
  0x12   :  { %v771_v19 = vpack.c.bf16 %v233_v10, %v232_v9  ;;  %902 = vst [vmem:[%s1378_s3 + $0x28] sm:$0xff] %v766_v14   ;;  %v173_v24 = vadd.f32 %v965_v5, %v102_v16  ;;  %v236_v25 = vmax.f32 %v172_v17, 0.0  ;;  %v105_v26 = vmul.f32 %v958_v2, %v34_v12  ;;  %v48_v16 = vld [vmem:[%s1375_s0 + $0x110] sm:$0xff]  ;;  %v49_v17 = vld [vmem:[%s1375_s0 + $0x118] sm:$0xff] }
  0x13   :  { %v106_v27 = vmul.f32 %v958_v2, %v35_v13  ;;  %v776_v29 = vpack.c.bf16 %v235_v20, %v234_v15  ;;  %v174_v30 = vadd.f32 %v965_v5, %v103_v21  ;;  %v175_v31 = vadd.f32 %v965_v5, %v104_v22  ;;  %v50_v22 = vld [vmem:[%s1375_s0 + $0x120] sm:$0xff] }
  0x14   :  { %903 = vst [vmem:[%s1378_s3 + $0x30] sm:$0xff] %v771_v19   ;;  %v107_v32 = vmul.f32 %v958_v2, %v36_v18  ;;  %v237_v33 = vmax.f32 %v173_v24, 0.0  ;;  %v176_v34 = vadd.f32 %v965_v5, %v105_v26  ;;  %v108_v36 = vmul.f32 %v958_v2, %v37_v23  ;;  %v51_v23 = vld [vmem:[%s1375_s0 + $0x128] sm:$0xff] }
  0x15   :  { %v177_v35 = vadd.f32 %v965_v5, %v106_v27  ;;  %904 = vst [vmem:[%s1378_s3 + $0x38] sm:$0xff] %v776_v29   ;;  %v238_v38 = vmax.f32 %v174_v30, 0.0  ;;  %v239_v39 = vmax.f32 %v175_v31, 0.0  ;;  %v109_v41 = vmul.f32 %v958_v2, %v38_v28  ;;  %v52_v28 = vld [vmem:[%s1375_s0 + $0x130] sm:$0xff] }
  0x16   :  { %v178_v40 = vadd.f32 %v965_v5, %v107_v32  ;;  %v781_v44 = vpack.c.bf16 %v237_v33, %v236_v25  ;;  %v240_v45 = vmax.f32 %v176_v34, 0.0  ;;  %v179_v47 = vadd.f32 %v965_v5, %v108_v36  ;;  %v53_v33 = vld [vmem:[%s1375_s0 + $0x138] sm:$0xff] }
  0x17   :  { %v241_v46 = vmax.f32 %v177_v35, 0.0  ;;  %v786_v50 = vpack.c.bf16 %v239_v39, %v238_v38  ;;  %v110_v52 = vmul.f32 %v958_v2, %v39_v37  ;;  %v180_v53 = vadd.f32 %v965_v5, %v109_v41  ;;  %v54_v38 = vld [vmem:[%s1375_s0 + $0x140] sm:$0xff] }
  0x18   :  { %v242_v51 = vmax.f32 %v178_v40, 0.0  ;;  %905 = vst [vmem:[%s1378_s3 + $0x40] sm:$0xff] %v781_v44   ;;  %v243_v56 = vmax.f32 %v179_v47, 0.0  ;;  %v111_v57 = vmul.f32 %v958_v2, %v40_v42  ;;  %v112_v58 = vmul.f32 %v958_v2, %v41_v43  ;;  %v55_v47 = vld [vmem:[%s1375_s0 + $0x148] sm:$0xff] }
  0x19   :  { %v791_v55 = vpack.c.bf16 %v241_v46, %v240_v45  ;;  %906 = vst [vmem:[%s1378_s3 + $0x48] sm:$0xff] %v786_v50   ;;  %v181_v60 = vadd.f32 %v965_v5, %v110_v52  ;;  %v244_v61 = vmax.f32 %v180_v53, 0.0  ;;  %v113_v62 = vmul.f32 %v958_v2, %v42_v48  ;;  %v56_v52 = vld [vmem:[%s1375_s0 + $0x150] sm:$0xff]  ;;  %v57_v53 = vld [vmem:[%s1375_s0 + $0x158] sm:$0xff] }
  0x1a   :  { %v114_v63 = vmul.f32 %v958_v2, %v43_v49  ;;  %v796_v1 = vpack.c.bf16 %v243_v56, %v242_v51  ;;  %v182_v3 = vadd.f32 %v965_v5, %v111_v57  ;;  %v183_v4 = vadd.f32 %v965_v5, %v112_v58  ;;  %v58_v58 = vld [vmem:[%s1375_s0 + $0x160] sm:$0xff] }
  0x1b   :  { %907 = vst [vmem:[%s1378_s3 + $0x50] sm:$0xff] %v791_v55   ;;  %v115_v6 = vmul.f32 %v958_v2, %v44_v54  ;;  %v245_v7 = vmax.f32 %v181_v60, 0.0  ;;  %v184_v8 = vadd.f32 %v965_v5, %v113_v62  ;;  %v116_v10 = vmul.f32 %v958_v2, %v45_v59  ;;  %v59_v59 = vld [vmem:[%s1375_s0 + $0x168] sm:$0xff] }
  0x1c   :  { %v185_v9 = vadd.f32 %v965_v5, %v114_v63  ;;  %908 = vst [vmem:[%s1378_s3 + $0x58] sm:$0xff] %v796_v1   ;;  %v246_v12 = vmax.f32 %v182_v3, 0.0  ;;  %v247_v13 = vmax.f32 %v183_v4, 0.0  ;;  %v117_v15 = vmul.f32 %v958_v2, %v46_v0  ;;  %v60_v0 = vld [vmem:[%s1375_s0 + $0x170] sm:$0xff] }
  0x1d   :  { %v186_v14 = vadd.f32 %v965_v5, %v115_v6  ;;  %v801_v18 = vpack.c.bf16 %v245_v7, %v244_v61  ;;  %v248_v19 = vmax.f32 %v184_v8, 0.0  ;;  %v187_v21 = vadd.f32 %v965_v5, %v116_v10  ;;  %v61_v7 = vld [vmem:[%s1375_s0 + $0x178] sm:$0xff] }
  0x1e   :  { %v249_v20 = vmax.f32 %v185_v9, 0.0  ;;  %v806_v24 = vpack.c.bf16 %v247_v13, %v246_v12  ;;  %v118_v26 = vmul.f32 %v958_v2, %v47_v11  ;;  %v188_v27 = vadd.f32 %v965_v5, %v117_v15  ;;  %v62_v12 = vld [vmem:[%s1375_s0 + $0x180] sm:$0xff] }
  0x1f   :  { %v250_v25 = vmax.f32 %v186_v14, 0.0  ;;  %909 = vst [vmem:[%s1378_s3 + $0x60] sm:$0xff] %v801_v18   ;;  %v251_v30 = vmax.f32 %v187_v21, 0.0  ;;  %v119_v31 = vmul.f32 %v958_v2, %v48_v16  ;;  %v120_v32 = vmul.f32 %v958_v2, %v49_v17  ;;  %v63_v21 = vld [vmem:[%s1375_s0 + $0x188] sm:$0xff] }
  0x20   :  { %v811_v29 = vpack.c.bf16 %v249_v20, %v248_v19  ;;  %910 = vst [vmem:[%s1378_s3 + $0x68] sm:$0xff] %v806_v24   ;;  %v189_v34 = vadd.f32 %v965_v5, %v118_v26  ;;  %v252_v35 = vmax.f32 %v188_v27, 0.0  ;;  %v121_v36 = vmul.f32 %v958_v2, %v50_v22  ;;  %v64_v26 = vld [vmem:[%s1375_s0 + $0x190] sm:$0xff]  ;;  %v65_v27 = vld [vmem:[%s1375_s0 + $0x198] sm:$0xff] }
  0x21   :  { %v122_v37 = vmul.f32 %v958_v2, %v51_v23  ;;  %v816_v39 = vpack.c.bf16 %v251_v30, %v250_v25  ;;  %v190_v40 = vadd.f32 %v965_v5, %v119_v31  ;;  %v191_v41 = vadd.f32 %v965_v5, %v120_v32  ;;  %v66_v32 = vld [vmem:[%s1375_s0 + $0x1a0] sm:$0xff] }
  0x22   :  { %911 = vst [vmem:[%s1378_s3 + $0x70] sm:$0xff] %v811_v29   ;;  %v123_v42 = vmul.f32 %v958_v2, %v52_v28  ;;  %v253_v43 = vmax.f32 %v189_v34, 0.0  ;;  %v192_v44 = vadd.f32 %v965_v5, %v121_v36  ;;  %v124_v46 = vmul.f32 %v958_v2, %v53_v33  ;;  %v67_v33 = vld [vmem:[%s1375_s0 + $0x1a8] sm:$0xff] }
  0x23   :  { %v193_v45 = vadd.f32 %v965_v5, %v122_v37  ;;  %912 = vst [vmem:[%s1378_s3 + $0x78] sm:$0xff] %v816_v39   ;;  %v254_v48 = vmax.f32 %v190_v40, 0.0  ;;  %v255_v49 = vmax.f32 %v191_v41, 0.0  ;;  %v125_v51 = vmul.f32 %v958_v2, %v54_v38  ;;  %v68_v38 = vld [vmem:[%s1375_s0 + $0x1b0] sm:$0xff] }
  0x24   :  { %v194_v50 = vadd.f32 %v965_v5, %v123_v42  ;;  %v821_v54 = vpack.c.bf16 %v253_v43, %v252_v35  ;;  %v256_v55 = vmax.f32 %v192_v44, 0.0  ;;  %v195_v57 = vadd.f32 %v965_v5, %v124_v46  ;;  %v69_v43 = vld [vmem:[%s1375_s0 + $0x1b8] sm:$0xff] }
  0x25   :  { %v257_v56 = vmax.f32 %v193_v45, 0.0  ;;  %v826_v60 = vpack.c.bf16 %v255_v49, %v254_v48  ;;  %v126_v62 = vmul.f32 %v958_v2, %v55_v47  ;;  %v196_v63 = vadd.f32 %v965_v5, %v125_v51  ;;  %v70_v48 = vld [vmem:[%s1375_s0 + $0x1c0] sm:$0xff] }
  0x26   :  { %v258_v61 = vmax.f32 %v194_v50, 0.0  ;;  %913 = vst [vmem:[%s1378_s3 + $0x80] sm:$0xff] %v821_v54   ;;  %v259_v3 = vmax.f32 %v195_v57, 0.0  ;;  %v127_v4 = vmul.f32 %v958_v2, %v56_v52  ;;  %v128_v6 = vmul.f32 %v958_v2, %v57_v53  ;;  %v71_v57 = vld [vmem:[%s1375_s0 + $0x1c8] sm:$0xff] }
  0x27   :  { %v831_v1 = vpack.c.bf16 %v257_v56, %v256_v55  ;;  %914 = vst [vmem:[%s1378_s3 + $0x88] sm:$0xff] %v826_v60   ;;  %v197_v8 = vadd.f32 %v965_v5, %v126_v62  ;;  %v260_v9 = vmax.f32 %v196_v63, 0.0  ;;  %v129_v10 = vmul.f32 %v958_v2, %v58_v58  ;;  %v72_v62 = vld [vmem:[%s1375_s0 + $0x1d0] sm:$0xff]  ;;  %v73_v63 = vld [vmem:[%s1375_s0 + $0x1d8] sm:$0xff] }
  0x28   :  { %v130_v11 = vmul.f32 %v958_v2, %v59_v59  ;;  %v836_v13 = vpack.c.bf16 %v259_v3, %v258_v61  ;;  %v198_v14 = vadd.f32 %v965_v5, %v127_v4  ;;  %v199_v15 = vadd.f32 %v965_v5, %v128_v6  ;;  %v74_v6 = vld [vmem:[%s1375_s0 + $0x1e0] sm:$0xff] }
  0x29   :  { %915 = vst [vmem:[%s1378_s3 + $0x90] sm:$0xff] %v831_v1   ;;  %v131_v16 = vmul.f32 %v958_v2, %v60_v0  ;;  %v261_v17 = vmax.f32 %v197_v8, 0.0  ;;  %v200_v18 = vadd.f32 %v965_v5, %v129_v10  ;;  %v132_v20 = vmul.f32 %v958_v2, %v61_v7  ;;  %v75_v7 = vld [vmem:[%s1375_s0 + $0x1e8] sm:$0xff] }
  0x2a   :  { %v201_v19 = vadd.f32 %v965_v5, %v130_v11  ;;  %916 = vst [vmem:[%s1378_s3 + $0x98] sm:$0xff] %v836_v13   ;;  %v262_v22 = vmax.f32 %v198_v14, 0.0  ;;  %v263_v23 = vmax.f32 %v199_v15, 0.0  ;;  %v133_v25 = vmul.f32 %v958_v2, %v62_v12  ;;  %v76_v12 = vld [vmem:[%s1375_s0 + $0x1f0] sm:$0xff] }
  0x2b   :  { %v202_v24 = vadd.f32 %v965_v5, %v131_v16  ;;  %v841_v28 = vpack.c.bf16 %v261_v17, %v260_v9  ;;  %v264_v29 = vmax.f32 %v200_v18, 0.0  ;;  %v203_v31 = vadd.f32 %v965_v5, %v132_v20  ;;  %v77_v17 = vld [vmem:[%s1375_s0 + $0x1f8] sm:$0xff] }
  0x2c   :  { %v265_v30 = vmax.f32 %v201_v19, 0.0  ;;  %v846_v34 = vpack.c.bf16 %v263_v23, %v262_v22  ;;  %v134_v36 = vmul.f32 %v958_v2, %v63_v21  ;;  %v204_v37 = vadd.f32 %v965_v5, %v133_v25 }
  0x2d   :  { %v266_v35 = vmax.f32 %v202_v24, 0.0  ;;  %917 = vst [vmem:[%s1378_s3 + $0xa0] sm:$0xff] %v841_v28   ;;  %v267_v40 = vmax.f32 %v203_v31, 0.0  ;;  %v135_v41 = vmul.f32 %v958_v2, %v64_v26  ;;  %v136_v42 = vmul.f32 %v958_v2, %v65_v27 }
  0x2e   :  { %v851_v39 = vpack.c.bf16 %v265_v30, %v264_v29  ;;  %918 = vst [vmem:[%s1378_s3 + $0xa8] sm:$0xff] %v846_v34   ;;  %v205_v44 = vadd.f32 %v965_v5, %v134_v36  ;;  %v268_v45 = vmax.f32 %v204_v37, 0.0  ;;  %v137_v46 = vmul.f32 %v958_v2, %v66_v32 }
  0x2f   :  { %v138_v47 = vmul.f32 %v958_v2, %v67_v33  ;;  %v856_v49 = vpack.c.bf16 %v267_v40, %v266_v35  ;;  %v206_v50 = vadd.f32 %v965_v5, %v135_v41  ;;  %v207_v51 = vadd.f32 %v965_v5, %v136_v42 }
  0x30   :  { %919 = vst [vmem:[%s1378_s3 + $0xb0] sm:$0xff] %v851_v39   ;;  %v139_v52 = vmul.f32 %v958_v2, %v68_v38  ;;  %v269_v53 = vmax.f32 %v205_v44, 0.0  ;;  %v208_v54 = vadd.f32 %v965_v5, %v137_v46  ;;  %v140_v56 = vmul.f32 %v958_v2, %v69_v43 }
  0x31   :  { %v209_v55 = vadd.f32 %v965_v5, %v138_v47  ;;  %920 = vst [vmem:[%s1378_s3 + $0xb8] sm:$0xff] %v856_v49   ;;  %v270_v58 = vmax.f32 %v206_v50, 0.0  ;;  %v271_v59 = vmax.f32 %v207_v51, 0.0  ;;  %v141_v61 = vmul.f32 %v958_v2, %v70_v48 }
  0x32   :  { %v210_v60 = vadd.f32 %v965_v5, %v139_v52  ;;  %v861_v0 = vpack.c.bf16 %v269_v53, %v268_v45  ;;  %v272_v1 = vmax.f32 %v208_v54, 0.0  ;;  %v211_v4 = vadd.f32 %v965_v5, %v140_v56 }
  0x33   :  { %v273_v3 = vmax.f32 %v209_v55, 0.0  ;;  %v866_v8 = vpack.c.bf16 %v271_v59, %v270_v58  ;;  %v142_v10 = vmul.f32 %v958_v2, %v71_v57  ;;  %v212_v11 = vadd.f32 %v965_v5, %v141_v61 }
  0x34   :  { %v274_v9 = vmax.f32 %v210_v60, 0.0  ;;  %921 = vst [vmem:[%s1378_s3 + $0xc0] sm:$0xff] %v861_v0   ;;  %v275_v14 = vmax.f32 %v211_v4, 0.0  ;;  %v143_v15 = vmul.f32 %v958_v2, %v72_v62  ;;  %v144_v16 = vmul.f32 %v958_v2, %v73_v63 }
  0x35   :  { %v871_v13 = vpack.c.bf16 %v273_v3, %v272_v1  ;;  %922 = vst [vmem:[%s1378_s3 + $0xc8] sm:$0xff] %v866_v8   ;;  %v213_v18 = vadd.f32 %v965_v5, %v142_v10  ;;  %v276_v19 = vmax.f32 %v212_v11, 0.0  ;;  %v145_v20 = vmul.f32 %v958_v2, %v74_v6 }
  0x36   :  { %v146_v21 = vmul.f32 %v958_v2, %v75_v7  ;;  %v876_v22 = vpack.c.bf16 %v275_v14, %v274_v9  ;;  %v214_v23 = vadd.f32 %v965_v5, %v143_v15  ;;  %v215_v24 = vadd.f32 %v965_v5, %v144_v16 }
  0x37   :  { %923 = vst [vmem:[%s1378_s3 + $0xd0] sm:$0xff] %v871_v13   ;;  %v147_v25 = vmul.f32 %v958_v2, %v76_v12  ;;  %v277_v26 = vmax.f32 %v213_v18, 0.0  ;;  %v216_v27 = vadd.f32 %v965_v5, %v145_v20  ;;  %v148_v29 = vmul.f32 %v958_v2, %v77_v17 }
  0x38   :  { %v217_v28 = vadd.f32 %v965_v5, %v146_v21  ;;  %924 = vst [vmem:[%s1378_s3 + $0xd8] sm:$0xff] %v876_v22   ;;  %v278_v30 = vmax.f32 %v214_v23, 0.0  ;;  %v279_v31 = vmax.f32 %v215_v24, 0.0 }
  0x39   :  { %v218_v32 = vadd.f32 %v965_v5, %v147_v25  ;;  %v881_v33 = vpack.c.bf16 %v277_v26, %v276_v19  ;;  %v280_v34 = vmax.f32 %v216_v27, 0.0  ;;  %v219_v36 = vadd.f32 %v965_v5, %v148_v29 }
  0x3a   :  { %v281_v35 = vmax.f32 %v217_v28, 0.0  ;;  %v886_v37 = vpack.c.bf16 %v279_v31, %v278_v30 }
  0x3b   :  { %v282_v38 = vmax.f32 %v218_v32, 0.0  ;;  %925 = vst [vmem:[%s1378_s3 + $0xe0] sm:$0xff] %v881_v33   ;;  %v283_v39 = vmax.f32 %v219_v36, 0.0 }
  0x3c   :  { %v891_v2 = vpack.c.bf16 %v281_v35, %v280_v34  ;;  %926 = vst [vmem:[%s1378_s3 + $0xe8] sm:$0xff] %v886_v37  }
  0x3d   :  { %v896_v40 = vpack.c.bf16 %v283_v39, %v282_v38 }
  0x3e   :  { %927 = vst [vmem:[%s1378_s3 + $0xf0] sm:$0xff] %v891_v2  }
  0x3f   :  { %928 = vst [vmem:[%s1378_s3 + $0xf8] sm:$0xff] %v896_v40  }

// kernel: network_block.16
= control target key start
LH: loop header
LB: loop body
LE: loop exit
PB: predicated region body
PF: predicated region fallthrough
CT: control target
= control target key end

     0   :  { %v105_v0 = vmov 0.0   ;;  %s187_s1 = inlined_call_operand.vmem [shape: f32[1,128], index: 1, kind: output, shape index: {0}]   ;;  %s188_s2 = inlined_call_operand.vmem [shape: f32[1,128], index: 2, kind: output, shape index: {1}]   ;;  %s189_s0 = inlined_call_operand.vmem [shape: f32[128,128], index: 0, kind: input, shape index: {}]  }
   0x1   :  { %14 = vst [vmem:[%s187_s1] sm:$0x1] %v105_v0  ;;  %15 = vst [vmem:[%s188_s2] sm:$0x1] %v105_v0  ;;  %v16_v1 = vld [vmem:[%s189_s0] sm:$0xff]  ;;  %v17_v2 = vld [vmem:[%s189_s0 + $0x8] sm:$0xff] }
   0x2   :  { %v18_v3 = vld [vmem:[%s189_s0 + $0x10] sm:$0xff]  ;;  %v19_v4 = vld [vmem:[%s189_s0 + $0x18] sm:$0xff]  ;;  %v33_v5 = vadd.f32 %v17_v2, %v16_v1  ;;  %v57_v6 = vmul.f32 %v16_v1, %v16_v1  ;;  %v58_v7 = vmul.f32 %v17_v2, %v17_v2  ;;  %v20_v9 = vld [vmem:[%s189_s0 + $0x20] sm:$0xff] }
   0x3   :  { %v59_v8 = vmul.f32 %v18_v3, %v18_v3  ;;  %v60_v11 = vmul.f32 %v19_v4, %v19_v4  ;;  %v21_v13 = vld [vmem:[%s189_s0 + $0x28] sm:$0xff]  ;;  %v61_v15 = vmul.f32 %v20_v9, %v20_v9  ;;  %v22_v17 = vld [vmem:[%s189_s0 + $0x30] sm:$0xff]  ;;  %v23_v21 = vld [vmem:[%s189_s0 + $0x38] sm:$0xff] }
   0x4   :  { %v34_v10 = vadd.f32 %v33_v5, %v18_v3  ;;  %v73_v12 = vadd.f32 %v58_v7, %v57_v6  ;;  %v62_v19 = vmul.f32 %v21_v13, %v21_v13  ;;  %v63_v23 = vmul.f32 %v22_v17, %v22_v17  ;;  %v24_v25 = vld [vmem:[%s189_s0 + $0x40] sm:$0xff]  ;;  %v25_v29 = vld [vmem:[%s189_s0 + $0x48] sm:$0xff]  ;;  %v26_v33 = vld [vmem:[%s189_s0 + $0x50] sm:$0xff] }
   0x5   :  { %v64_v27 = vmul.f32 %v23_v21, %v23_v21  ;;  %v65_v31 = vmul.f32 %v24_v25, %v24_v25  ;;  %v66_v35 = vmul.f32 %v25_v29, %v25_v29  ;;  %v27_v37 = vld [vmem:[%s189_s0 + $0x58] sm:$0xff]  ;;  %v67_v39 = vmul.f32 %v26_v33, %v26_v33  ;;  %v28_v41 = vld [vmem:[%s189_s0 + $0x60] sm:$0xff]  ;;  %v29_v45 = vld [vmem:[%s189_s0 + $0x68] sm:$0xff] }
   0x6   :  { %v35_v14 = vadd.f32 %v34_v10, %v19_v4  ;;  %v74_v16 = vadd.f32 %v73_v12, %v59_v8  ;;  %v68_v43 = vmul.f32 %v27_v37, %v27_v37  ;;  %v69_v47 = vmul.f32 %v28_v41, %v28_v41  ;;  %v30_v49 = vld [vmem:[%s189_s0 + $0x70] sm:$0xff]  ;;  %v31_v53 = vld [vmem:[%s189_s0 + $0x78] sm:$0xff] }
   0x7   :  { %v70_v51 = vmul.f32 %v29_v45, %v29_v45  ;;  %v71_v55 = vmul.f32 %v30_v49, %v30_v49  ;;  %v72_v58 = vmul.f32 %v31_v53, %v31_v53 }
   0x8   :  { %v36_v18 = vadd.f32 %v35_v14, %v20_v9  ;;  %v75_v20 = vadd.f32 %v74_v16, %v60_v11  ;;  %v32_v7 = vld [vmem:[%s187_s1] sm:$0x1] }
   0x9   :  { %v56_v12 = vld [vmem:[%s188_s2] sm:$0x1] }
   0xa   :  { %v37_v22 = vadd.f32 %v36_v18, %v21_v13  ;;  %v76_v24 = vadd.f32 %v75_v20, %v61_v15 }
   0xc   :  { %v38_v26 = vadd.f32 %v37_v22, %v22_v17  ;;  %v77_v28 = vadd.f32 %v76_v24, %v62_v19 }
   0xe   :  { %v39_v30 = vadd.f32 %v38_v26, %v23_v21  ;;  %v78_v32 = vadd.f32 %v77_v28, %v63_v23 }
  0x10   :  { %v40_v34 = vadd.f32 %v39_v30, %v24_v25  ;;  %v79_v36 = vadd.f32 %v78_v32, %v64_v27 }
  0x12   :  { %v41_v38 = vadd.f32 %v40_v34, %v25_v29  ;;  %v80_v40 = vadd.f32 %v79_v36, %v65_v31 }
  0x14   :  { %v42_v42 = vadd.f32 %v41_v38, %v26_v33  ;;  %v81_v44 = vadd.f32 %v80_v40, %v66_v35 }
  0x16   :  { %v43_v46 = vadd.f32 %v42_v42, %v27_v37  ;;  %v82_v48 = vadd.f32 %v81_v44, %v67_v39 }
  0x18   :  { %v44_v50 = vadd.f32 %v43_v46, %v28_v41  ;;  %v83_v52 = vadd.f32 %v82_v48, %v68_v43 }
  0x1a   :  { %v45_v54 = vadd.f32 %v44_v50, %v29_v45  ;;  %v84_v56 = vadd.f32 %v83_v52, %v69_v47 }
  0x1c   :  { %v46_v57 = vadd.f32 %v45_v54, %v30_v49  ;;  %v85_v59 = vadd.f32 %v84_v56, %v70_v51 }
  0x1e   :  { %v47_v60 = vadd.f32 %v46_v57, %v31_v53  ;;  %v86_v61 = vadd.f32 %v85_v59, %v71_v55 }
  0x20   :  { %v48_v62 = vrot.slane %v47_v60, 4  ;;  %v87_v63 = vadd.f32 %v86_v61, %v72_v58 }
  0x22   :  { %v49_v0 = vadd.f32 %v48_v62, %v47_v60  ;;  %v88_v1 = vrot.slane %v87_v63, 4 }
  0x24   :  { %v50_v2 = vrot.slane %v49_v0, 2  ;;  %v89_v3 = vadd.f32 %v88_v1, %v87_v63 }
  0x26   :  { %v51_v4 = vadd.f32 %v50_v2, %v49_v0  ;;  %v90_v5 = vrot.slane %v89_v3, 2 }
  0x28   :  { %v52_v6 = vrot.slane %v51_v4, 1  ;;  %v91_v8 = vadd.f32 %v90_v5, %v89_v3 }
  0x2a   :  { %v53_v9 = vadd.f32 %v52_v6, %v51_v4  ;;  %v92_v10 = vrot.slane %v91_v8, 1 }
  0x2c   :  { %v54_v11 = vadd.f32 %v53_v9, %v32_v7  ;;  %v93_v13 = vadd.f32 %v92_v10, %v91_v8 }
  0x2e   :  { %55 = vst [vmem:[%s187_s1] sm:$0x1] %v54_v11  ;;  %v94_v14 = vadd.f32 %v93_v13, %v56_v12 }
  0x30   :  { %95 = vst [vmem:[%s188_s2] sm:$0x1] %v94_v14 }

// kernel: network_block.18
= control target key start
LH: loop header
LB: loop body
LE: loop exit
PB: predicated region body
PF: predicated region fallthrough
CT: control target
= control target key end

     0   :  { %s547_s9 = smov 0   ;;  %s549_s10 = smov 0   ;;  %s631_s0 = inlined_call_operand.vmem [shape: bf16[2,18,9,128], index: 0, kind: input, shape index: {}]   ;;  %s632_s1 = inlined_call_operand.vmem [shape: bf16[128,128], index: 1, kind: input, shape index: {}]   ;;  %s633_s2 = inlined_call_operand.vmem [shape: f32[2,8,8,128], index: 2, kind: output, shape index: {}]  }
   0x1   :  { %s551_s11 = smov 0   ;;  %s553_s12 = smov 0  }
   0x2   :  { %s555_s13 = smov 0  }
   0x3 LB: > { %s21_s14 = sadd.s32 1, %s520_s11  ;;  %s24_s15 = sadd.s32 1, %s524_s12  ;;  %s528_s13 = sphi %s555_s13, %s12_s13   ;;  %s524_s12 = sphi %s553_s12, %s637_s12   ;;  %s520_s11 = sphi %s551_s11, %s636_s11   ;;  %s516_s10 = sphi %s549_s10, %s635_s10   ;;  %s512_s9 = sphi %s547_s9, %s634_s9  }
   0x4   : > { %p22_p0 = scmp.ge.s32.totalorder %s21_s14, 8  ;;  %p394_p1 = scmp.ge.s32.totalorder %s528_s13, 1 }
   0x5   : > { %p140_p2 = scmp.lt.s32.totalorder %s528_s13, 17 }
   0x6   : > { %s639_s14 = smov (%p22_p0, %s21_s14), 0  ;;  %s641_s15 = smov (!%p22_p0, %s24_s15), %s524_s12 }
   0x7   : > { %p141_p3 = pnand %p394_p1, %p140_p2  ;;  %p26_p4 = scmp.ge.s32.totalorder %s641_s15, 2 }
   0x8   : > { %v482_v0 = vld [vmem:[%s632_s1] sm:$0xff] (!%p141_p3)   ;;  %v530_v1 = vmov (!%p141_p3), 0.0   ;;  %v483_v2 = vld [vmem:[%s632_s1 + $0x8] sm:$0xff] (!%p141_p3)   ;;  %vm531_vm0 = vmmov (!%p141_p3), 0   ;;  %s395_s20 = sshll.u32 (!%p141_p3), %s512_s9, 1  ;;  %v484_v3 = vld [vmem:[%s632_s1 + $0x10] sm:$0xff] (!%p141_p3)  }
   0x9   : > { %s643_s15 = smov (%p26_p4, %s641_s15), 0  ;;  %144 = sbr.rel (%p141_p3) target bundleno = 257 (0x101), region = 28 }
   0xa   : > { %419 = vmatprep.subr.bf16.mxu0 (!%p141_p3), %v530_v1  ;;  %435 = vmatprep.mubr.msk.bf16.mxu0 (!%p141_p3), %vm531_vm0, %v530_v1  ;;  %s172_s23 = sadd.s32 (!%p141_p3), 1, %s395_s20  ;;  %p173_p5 = scmp.lt.s32.totalorder (!%p141_p3), %s516_s10, 1  ;;  %v485_v4 = vld [vmem:[%s632_s1 + $0x18] sm:$0xff] (!%p141_p3)   ;;  %v486_v5 = vld [vmem:[%s632_s1 + $0x20] sm:$0xff] (!%p141_p3)   ;;  %v487_v6 = vld [vmem:[%s632_s1 + $0x28] sm:$0xff] (!%p141_p3)  }
   0xb   : > { %420 = vmatpush3.bf16.msra.mxu0 (!%p141_p3), %v482_v0  ;;  %p175_p6 = scmp.lt.s32.totalorder (!%p141_p3), %s172_s23, 17  ;;  %v488_v7 = vld [vmem:[%s632_s1 + $0x30] sm:$0xff] (!%p141_p3)   ;;  %v489_v8 = vld [vmem:[%s632_s1 + $0x38] sm:$0xff] (!%p141_p3)   ;;  %p186_p7 = scmp.lt.s32.totalorder (!%p141_p3), %s512_s9, 7 }
   0xc   : > { %421 = vmatprep.subr.bf16.mxu0 (!%p141_p3), %v530_v1 }
   0xf   : > { %422 = vmatpush3.bf16.msra.mxu0 (!%p141_p3), %v483_v2 }
  0x10   : > { %423 = vmatprep.subr.bf16.mxu0 %v530_v1  ;;  %s645_s10 = smov (!%p173_p5, %s516_s10), 1  ;;  %s647_s23 = smov (!%p175_p6, %s172_s23), 17 }
  0x11   : > { %s439_s28 = smul.u32 36, %s645_s10  ;;  %s396_s3 = sshll.u32 %s647_s23, 1 }
  0x12   : > { %s649_s9 = smov (!%p186_p7, %s512_s9), 7  ;;  %s398_s20 = sshll.u32 %s645_s10, 3 }
  0x13   : > { %424 = vmatpush3.bf16.msra.mxu0 %v484_v3  ;;  %s179_s4 = sadd.s32 %s439_s28, %s396_s3  ;;  %s189_s21 = sadd.s32 %s398_s20, %s649_s9 }
  0x14   : > { %425 = vmatprep.subr.bf16.mxu0 %v530_v1  ;;  %s397_s7 = sshll.u32 %s179_s4, 2  ;;  %s399_s22 = sshll.u32 %s189_s21, 3 }
  0x15   : > { %s181_s19 = scalar_lea.vmem %s631_s0, %s397_s7  ;;  %s191_s25 = scalar_lea.vmem %s633_s2, %s399_s22 }
  0x16   : > { %v193_v9 = vld [vmem:[%s181_s19] sm:$0xf] }
  0x17   : > { %426 = vmatpush3.bf16.msra.mxu0 %v485_v4 }
  0x18   : > { %427 = vmatprep.subr.bf16.mxu0 %v530_v1 }
  0x1b   : > { %428 = vmatpush3.bf16.msra.mxu0 %v486_v5 }
  0x1c   : > { %429 = vmatprep.subr.bf16.mxu0 %v530_v1 }
  0x1f   : > { %430 = vmatpush3.bf16.msra.mxu0 %v487_v6 }
  0x20   : > { %431 = vmatprep.subr.bf16.mxu0 %v530_v1 }
  0x23   : > { %432 = vmatpush3.bf16.msra.mxu0 %v488_v7 }
  0x24   : > { %433 = vmatprep.subr.bf16.mxu0 %v530_v1 }
  0x27   : > { %434 = vmatpush3.bf16.msra.mxu0 %v489_v8 }
  0x2a   : > { %436 = vmatmul.mubr.bf16.vlgmr.msra.gmra.mrb[0].mxu0 %v193_v9 }
  0xfd   : > { %v292_v10 = vpop.f32.mrb[0].mxu0 }
  0xfe   : > { %298 = vst [vmem:[%s191_s25] sm:$0xff] %v292_v10  ;;  %v437_v11 = vpop.f32.mrb[1].mxu0 }
  0xff   : > { %v295_v12 = vpop.f32.mrb[2].mxu0 }
 0x100   : > { %v438_v13 = vpop.f32.mrb[3].mxu0 }
 0x101 PF: > { %s12_s13 = sadd.s32 1, %s528_s13   ;;  %s634_s9 = smov %s520_s11 }
 0x102   : > { %p9_p8 = scmp.ge.s32.totalorder %s12_s13, 18   ;;  %s635_s10 = smov %s524_s12 }
 0x103   : > { %s636_s11 = smov %s639_s14  ;;  %s637_s12 = smov %s643_s15 }
 0x104   :  { %11 = sbr.rel (!%p9_p8) target bundleno = 3 (0x3), region = 58 }

// kernel: network_block.17
= control target key start
LH: loop header
LB: loop body
LE: loop exit
PB: predicated region body
PF: predicated region fallthrough
CT: control target
= control target key end

     0   :  { %s391_s0 = inlined_call_operand.vmem [shape: f32[128,128], index: 0, kind: input, shape index: {}]   ;;  %s392_s1 = inlined_call_operand.vmem [shape: f32[1,128], index: 1, kind: input, shape index: {}]   ;;  %s393_s2 = inlined_call_operand.vmem [shape: f32[1,128], index: 2, kind: input, shape index: {}]   ;;  %s394_s3 = inlined_call_operand.vmem [shape: bf16[128,128], index: 3, kind: output, shape index: {}]  }
   0x1   :  { %v14_v0 = vld [vmem:[%s391_s0] sm:$0xff]  ;;  %v15_v1 = vld [vmem:[%s391_s0 + $0x8] sm:$0xff]  ;;  %v16_v6 = vld [vmem:[%s391_s0 + $0x10] sm:$0xff] }
   0x2   :  { %v286_v2 = vld [vmem:[%s392_s1] ss:$0 sm:$0xff]  ;;  %v17_v7 = vld [vmem:[%s391_s0 + $0x18] sm:$0xff]  ;;  %v19_v11 = vld [vmem:[%s391_s0 + $0x28] sm:$0xff] }
   0x3   :  { %v37_v3 = vmul.f32 %v286_v2, %v14_v0  ;;  %v38_v4 = vmul.f32 %v286_v2, %v15_v1  ;;  %v293_v5 = vld [vmem:[%s393_s2] ss:$0 sm:$0xff]  ;;  %v39_v8 = vmul.f32 %v286_v2, %v16_v6  ;;  %v40_v9 = vmul.f32 %v286_v2, %v17_v7  ;;  %v20_v12 = vld [vmem:[%s391_s0 + $0x30] sm:$0xff]  ;;  %v21_v17 = vld [vmem:[%s391_s0 + $0x38] sm:$0xff] }
   0x4   :  { %v18_v10 = vld [vmem:[%s391_s0 + $0x20] sm:$0xff]  ;;  %v42_v16 = vmul.f32 %v286_v2, %v19_v11  ;;  %v43_v20 = vmul.f32 %v286_v2, %v20_v12  ;;  %v44_v21 = vmul.f32 %v286_v2, %v21_v17  ;;  %v23_v27 = vld [vmem:[%s391_s0 + $0x48] sm:$0xff]  ;;  %v24_v32 = vld [vmem:[%s391_s0 + $0x50] sm:$0xff] }
   0x5   :  { %v60_v13 = vadd.f32 %v293_v5, %v37_v3  ;;  %v61_v14 = vadd.f32 %v293_v5, %v38_v4  ;;  %v41_v15 = vmul.f32 %v286_v2, %v18_v10  ;;  %v62_v18 = vadd.f32 %v293_v5, %v39_v8  ;;  %v22_v22 = vld [vmem:[%s391_s0 + $0x40] sm:$0xff]  ;;  %v25_v33 = vld [vmem:[%s391_s0 + $0x58] sm:$0xff]  ;;  %v27_v39 = vld [vmem:[%s391_s0 + $0x68] sm:$0xff] }
   0x6   :  { %v63_v19 = vadd.f32 %v293_v5, %v40_v9  ;;  %v65_v26 = vadd.f32 %v293_v5, %v42_v16  ;;  %v66_v30 = vadd.f32 %v293_v5, %v43_v20  ;;  %v67_v31 = vadd.f32 %v293_v5, %v44_v21  ;;  %v26_v38 = vld [vmem:[%s391_s0 + $0x60] sm:$0xff]  ;;  %v28_v44 = vld [vmem:[%s391_s0 + $0x70] sm:$0xff]  ;;  %v29_v49 = vld [vmem:[%s391_s0 + $0x78] sm:$0xff] }
   0x7   :  { %v76_v23 = vmax.f32 %v60_v13, 0.0  ;;  %v77_v24 = vmax.f32 %v61_v14, 0.0  ;;  %v64_v25 = vadd.f32 %v293_v5, %v41_v15  ;;  %v78_v28 = vmax.f32 %v62_v18, 0.0 }
   0x8   :  { %v79_v29 = vmax.f32 %v63_v19, 0.0  ;;  %v81_v36 = vmax.f32 %v65_v26, 0.0  ;;  %v45_v37 = vmul.f32 %v286_v2, %v22_v22  ;;  %v82_v41 = vmax.f32 %v66_v30, 0.0 }
   0x9   :  { %v213_v34 = vpack.c.bf16 %v77_v24, %v76_v23  ;;  %v80_v35 = vmax.f32 %v64_v25, 0.0  ;;  %v83_v42 = vmax.f32 %v67_v31, 0.0  ;;  %v46_v43 = vmul.f32 %v286_v2, %v23_v27 }
   0xa   :  { %v218_v40 = vpack.c.bf16 %v79_v29, %v78_v28  ;;  %v68_v46 = vadd.f32 %v293_v5, %v45_v37  ;;  %v47_v47 = vmul.f32 %v286_v2, %v24_v32  ;;  %v48_v48 = vmul.f32 %v286_v2, %v25_v33 }
   0xb   :  { %214 = vst [vmem:[%s394_s3] sm:$0xff] %v213_v34   ;;  %v223_v45 = vpack.c.bf16 %v81_v36, %v80_v35  ;;  %v228_v50 = vpack.c.bf16 %v83_v42, %v82_v41  ;;  %v69_v51 = vadd.f32 %v293_v5, %v46_v43  ;;  %v49_v52 = vmul.f32 %v286_v2, %v26_v38 }
   0xc   :  { %250 = vst [vmem:[%s394_s3 + $0x8] sm:$0xff] %v218_v40   ;;  %v50_v53 = vmul.f32 %v286_v2, %v27_v39  ;;  %v84_v54 = vmax.f32 %v68_v46, 0.0  ;;  %v70_v55 = vadd.f32 %v293_v5, %v47_v47  ;;  %v71_v56 = vadd.f32 %v293_v5, %v48_v48 }
   0xd   :  { %251 = vst [vmem:[%s394_s3 + $0x10] sm:$0xff] %v223_v45   ;;  %v51_v57 = vmul.f32 %v286_v2, %v28_v44  ;;  %252 = vst [vmem:[%s394_s3 + $0x18] sm:$0xff] %v228_v50   ;;  %v85_v58 = vmax.f32 %v69_v51, 0.0  ;;  %v72_v59 = vadd.f32 %v293_v5, %v49_v52  ;;  %v52_v61 = vmul.f32 %v286_v2, %v29_v49 }
   0xe   :  { %v73_v60 = vadd.f32 %v293_v5, %v50_v53  ;;  %v86_v62 = vmax.f32 %v70_v55, 0.0  ;;  %v87_v63 = vmax.f32 %v71_v56, 0.0 }
   0xf   :  { %v74_v0 = vadd.f32 %v293_v5, %v51_v57  ;;  %v233_v1 = vpack.c.bf16 %v85_v58, %v84_v54  ;;  %v88_v3 = vmax.f32 %v72_v59, 0.0  ;;  %v75_v6 = vadd.f32 %v293_v5, %v52_v61 }
  0x10   :  { %v89_v4 = vmax.f32 %v73_v60, 0.0  ;;  %v238_v7 = vpack.c.bf16 %v87_v63, %v86_v62 }
  0x11   :  { %v90_v8 = vmax.f32 %v74_v0, 0.0  ;;  %253 = vst [vmem:[%s394_s3 + $0x20] sm:$0xff] %v233_v1   ;;  %v91_v10 = vmax.f32 %v75_v6, 0.0 }
  0x12   :  { %v243_v9 = vpack.c.bf16 %v89_v4, %v88_v3  ;;  %254 = vst [vmem:[%s394_s3 + $0x28] sm:$0xff] %v238_v7  }
  0x13   :  { %v248_v2 = vpack.c.bf16 %v91_v10, %v90_v8 }
  0x14   :  { %255 = vst [vmem:[%s394_s3 + $0x30] sm:$0xff] %v243_v9  }
  0x15   :  { %256 = vst [vmem:[%s394_s3 + $0x38] sm:$0xff] %v248_v2  }

// kernel: network_block.15
= control target key start
LH: loop header
LB: loop body
LE: loop exit
PB: predicated region body
PF: predicated region fallthrough
CT: control target
= control target key end

     0   :  { %s2480_s24 = smov 0   ;;  %s2482_s25 = smov 0   ;;  %s2913_s0 = inlined_call_operand.vmem [shape: bf16[2,18,9,128], index: 0, kind: input, shape index: {}, may-alias: {0,2,4}]   ;;  %s2914_s1 = inlined_call_operand.vmem [shape: bf16[2,18,9,128], index: 1, kind: input, shape index: {}, may-alias: {1,3,5}]   ;;  %s2915_s2 = inlined_call_operand.vmem [shape: bf16[2,18,9,128], index: 2, kind: input, shape index: {}, may-alias: {0,2,4}]   ;;  %s2916_s3 = inlined_call_operand.vmem [shape: bf16[2,18,9,128], index: 3, kind: input, shape index: {}, may-alias: {1,3,5}]   ;;  %s2917_s4 = inlined_call_operand.vmem [shape: bf16[2,18,9,128], index: 4, kind: input, shape index: {}, may-alias: {0,2,4}]   ;;  %s2918_s5 = inlined_call_operand.vmem [shape: bf16[2,18,9,128], index: 5, kind: input, shape index: {}, may-alias: {1,3,5}]   ;;  %s2919_s6 = inlined_call_operand.vmem [shape: bf16[9,128,128], index: 6, kind: input, shape index: {}]   ;;  %s2920_s7 = inlined_call_operand.vmem [shape: f32[2,8,8,128], index: 7, kind: output, shape index: {}]  }
   0x1   :  { %2922 = sst [smem:[#allocation2_spill]] %s2914_s1  ;;  %s2484_s26 = smov 0  }
   0x2   :  { %s2486_s27 = smov 0   ;;  %s2488_s28 = smov 0  }
   0x3 LB: > { %s26_s29 = sadd.s32 1, %s2428_s26  ;;  %s29_s30 = sadd.s32 1, %s2432_s27  ;;  %s2436_s28 = sphi %s2488_s28, %s17_s28   ;;  %s2432_s27 = sphi %s2486_s27, %s2928_s27   ;;  %s2428_s26 = sphi %s2484_s26, %s2927_s26   ;;  %s2424_s25 = sphi %s2482_s25, %s2926_s25   ;;  %s2420_s24 = sphi %s2480_s24, %s2925_s24  }
   0x4   : > { %p27_p0 = scmp.ge.s32.totalorder %s26_s29, 8  ;;  %p1764_p1 = scmp.ge.s32.totalorder %s2436_s28, 1 }
   0x5   : > { %p377_p2 = scmp.lt.s32.totalorder %s2436_s28, 17 }
   0x6   : > { %s2930_s29 = smov (%p27_p0, %s26_s29), 0  ;;  %s2932_s30 = smov (!%p27_p0, %s29_s30), %s2432_s27 }
   0x7   : > { %p378_p3 = pnand %p1764_p1, %p377_p2  ;;  %p31_p4 = scmp.ge.s32.totalorder %s2932_s30, 2 }
   0x8   : > { %v2323_v0 = vld [vmem:[%s2919_s6 + $0x40] sm:$0xff] (!%p378_p3)   ;;  %v2438_v1 = vmov (!%p378_p3), 0.0   ;;  %v2325_v3 = vld [vmem:[%s2919_s6 + $0x48] sm:$0xff] (!%p378_p3)   ;;  %vm2439_vm0 = vmmov (!%p378_p3), 0   ;;  %s2535_s16 = sshll.u32 (!%p378_p3), %s2420_s24, 1  ;;  %v2327_v5 = vld [vmem:[%s2919_s6 + $0x50] sm:$0xff] (!%p378_p3)  }
   0x9   : > { %s2934_s30 = smov (%p31_p4, %s2932_s30), 0  ;;  %381 = sbr.rel (%p378_p3) target bundleno = 386 (0x182), region = 48 }
   0xa   : > { %2071 = vmatprep.subr.bf16.mxu1 (!%p378_p3), %v2438_v1  ;;  %2151 = vmatprep.subr.bf16.mxu0 (!%p378_p3), %v2438_v1  ;;  %v2324_v2 = vld [vmem:[%s2919_s6 + $0x100] sm:$0xff] (!%p378_p3)   ;;  %v2326_v4 = vld [vmem:[%s2919_s6 + $0x108] sm:$0xff] (!%p378_p3)   ;;  %p472_p5 = scmp.lt.s32.totalorder (!%p378_p3), %s2424_s25, 1  ;;  %v2328_v6 = vld [vmem:[%s2919_s6 + $0x110] sm:$0xff] (!%p378_p3)   ;;  %p474_p6 = scmp.lt.s32.totalorder (!%p378_p3), %s2535_s16, 17 }
   0xb   : > { %2072 = vmatpush3.bf16.msra.mxu1 (!%p378_p3), %v2323_v0  ;;  %2087 = vmatprep.mubr.msk.bf16.mxu1 (!%p378_p3), %vm2439_vm0, %v2438_v1  ;;  %s494_s21 = sadd.s32 (!%p378_p3), 1, %s2535_s16  ;;  %v2329_v7 = vld [vmem:[%s2919_s6 + $0x58] sm:$0xff] (!%p378_p3)   ;;  %v2331_v9 = vld [vmem:[%s2919_s6 + $0x60] sm:$0xff] (!%p378_p3)   ;;  %s520_s18 = sadd.s32 (!%p378_p3), 2, %s2535_s16  ;;  %v2333_v11 = vld [vmem:[%s2919_s6 + $0x68] sm:$0xff] (!%p378_p3)  }
   0xc   : > { %2152 = vmatpush3.bf16.msra.mxu0 (!%p378_p3), %v2324_v2  ;;  %2073 = vmatprep.subr.bf16.mxu1 (!%p378_p3), %v2438_v1  ;;  %v2330_v8 = vld [vmem:[%s2919_s6 + $0x118] sm:$0xff] (!%p378_p3)   ;;  %p497_p7 = scmp.lt.s32.totalorder (!%p378_p3), %s494_s21, 17  ;;  %v2332_v10 = vld [vmem:[%s2919_s6 + $0x120] sm:$0xff] (!%p378_p3)   ;;  %v2334_v12 = vld [vmem:[%s2919_s6 + $0x128] sm:$0xff] (!%p378_p3)   ;;  %p523_p8 = scmp.lt.s32.totalorder (!%p378_p3), %s520_s18, 17 }
   0xd   : > { %2153 = vmatprep.subr.bf16.mxu0 (!%p378_p3), %v2438_v1  ;;  %2167 = vmatprep.mubr.msk.bf16.mxu0 (!%p378_p3), %vm2439_vm0, %v2438_v1  ;;  %v2335_v13 = vld [vmem:[%s2919_s6 + $0x70] sm:$0xff] (!%p378_p3)   ;;  %s2923_s1 = sld [smem:[#allocation2_spill]] (!%p378_p3)  ;;  %v2337_v15 = vld [vmem:[%s2919_s6 + $0x78] sm:$0xff] (!%p378_p3)   ;;  %v2339_v18 = vld [vmem:[%s2919_s6] sm:$0xff] (!%p378_p3)   ;;  %p547_p9 = scmp.lt.s32.totalorder (!%p378_p3), %s2420_s24, 7 }
   0xe   : > { %v2336_v14 = vld [vmem:[%s2919_s6 + $0x130] sm:$0xff] (!%p378_p3)   ;;  %v2338_v16 = vld [vmem:[%s2919_s6 + $0x138] sm:$0xff] (!%p378_p3)   ;;  %v2341_v19 = vld [vmem:[%s2919_s6 + $0x140] sm:$0xff] (!%p378_p3)  }
   0xf   : > { %2074 = vmatpush3.bf16.msra.mxu1 (!%p378_p3), %v2325_v3  ;;  %v2342_v21 = vld [vmem:[%s2919_s6 + $0x8] sm:$0xff] (!%p378_p3)   ;;  %v2344_v23 = vld [vmem:[%s2919_s6 + $0x10] sm:$0xff] (!%p378_p3)   ;;  %v2346_v25 = vld [vmem:[%s2919_s6 + $0x18] sm:$0xff] (!%p378_p3)  }
  0x10   : > { %2154 = vmatpush3.bf16.msra.mxu0 %v2326_v4  ;;  %2075 = vmatprep.subr.bf16.mxu1 %v2438_v1  ;;  %s2936_s25 = smov (!%p472_p5, %s2424_s25), 1  ;;  %s2938_s21 = smov (!%p497_p7, %s494_s21), 17  ;;  %v2343_v22 = vld [vmem:[%s2919_s6 + $0x148] sm:$0xff]   ;;  %v2345_v24 = vld [vmem:[%s2919_s6 + $0x150] sm:$0xff]   ;;  %v2347_v26 = vld [vmem:[%s2919_s6 + $0x158] sm:$0xff]  }
  0x11   : > { %2155 = vmatprep.subr.bf16.mxu0 %v2438_v1  ;;  %s475_s10 = scalar_select %p474_p6, %s2535_s16, 17  ;;  %v2348_v29 = vld [vmem:[%s2919_s6 + $0x20] sm:$0xff]   ;;  %v2350_v32 = vld [vmem:[%s2919_s6 + $0x28] sm:$0xff]   ;;  %v2352_v35 = vld [vmem:[%s2919_s6 + $0x30] sm:$0xff]  }
  0x12   : > { %s2568_s15 = smul.u32 36, %s2936_s25  ;;  %s1772_s22 = sshll.u32 %s2938_s21, 1  ;;  %v2349_v30 = vld [vmem:[%s2919_s6 + $0x160] sm:$0xff]   ;;  %v2351_v33 = vld [vmem:[%s2919_s6 + $0x168] sm:$0xff]   ;;  %v2353_v36 = vld [vmem:[%s2919_s6 + $0x170] sm:$0xff]  }
  0x13   : > { %2076 = vmatpush3.bf16.msra.mxu1 %v2327_v5  ;;  %s1766_s17 = sshll.u32 %s475_s10, 1  ;;  %s2940_s18 = smov (!%p523_p8, %s520_s18), 17  ;;  %v2354_v39 = vld [vmem:[%s2919_s6 + $0x38] sm:$0xff]   ;;  %v2357_v42 = vld [vmem:[%s2919_s6 + $0x80] sm:$0xff]   ;;  %v2359_v45 = vld [vmem:[%s2919_s6 + $0x88] sm:$0xff]  }
  0x14   : > { %2156 = vmatpush3.bf16.msra.mxu0 %v2328_v6  ;;  %2077 = vmatprep.subr.bf16.mxu1 %v2438_v1  ;;  %s2580_s9 = sadd.s32 %s2568_s15, %s1766_s17  ;;  %s2584_s16 = sadd.s32 %s2568_s15, %s1772_s22  ;;  %v2355_v40 = vld [vmem:[%s2919_s6 + $0x178] sm:$0xff]   ;;  %v2358_v44 = vld [vmem:[%s2919_s6 + $0x180] sm:$0xff]   ;;  %v2360_v46 = vld [vmem:[%s2919_s6 + $0x188] sm:$0xff]  }
  0x15   : > { %2157 = vmatprep.subr.bf16.mxu0 %v2438_v1  ;;  %s2921_s11 = sshll.u32 %s2580_s9, 2  ;;  %s1773_s14 = sshll.u32 %s2584_s16, 2  ;;  %v2361_v47 = vld [vmem:[%s2919_s6 + $0x90] sm:$0xff]   ;;  %v2363_v49 = vld [vmem:[%s2919_s6 + $0x98] sm:$0xff]   ;;  %v2365_v52 = vld [vmem:[%s2919_s6 + $0xa0] sm:$0xff]  }
  0x16   : > { %s491_s20 = scalar_lea.vmem %s2923_s1, %s2921_s11  ;;  %s1778_s21 = sshll.u32 %s2940_s18, 1  ;;  %v2362_v48 = vld [vmem:[%s2919_s6 + $0x190] sm:$0xff]   ;;  %v2364_v50 = vld [vmem:[%s2919_s6 + $0x198] sm:$0xff]   ;;  %v2366_v53 = vld [vmem:[%s2919_s6 + $0x1a0] sm:$0xff]  }
  0x17   : > { %2078 = vmatpush3.bf16.msra.mxu1 %v2329_v7  ;;  %v556_v17 = vld [vmem:[%s491_s20] sm:$0xf]  ;;  %s516_s17 = scalar_lea.vmem %s2916_s3, %s1773_s14  ;;  %s2615_s19 = sadd.s32 %s2568_s15, %s1778_s21  ;;  %v2367_v55 = vld [vmem:[%s2919_s6 + $0xa8] sm:$0xff]   ;;  %v2369_v58 = vld [vmem:[%s2919_s6 + $0xb0] sm:$0xff]  }
  0x18   : > { %2158 = vmatpush3.bf16.msra.mxu0 %v2330_v8  ;;  %2079 = vmatprep.subr.bf16.mxu1 %v2438_v1  ;;  %v887_v20 = vld [vmem:[%s516_s17] sm:$0xf]  ;;  %s503_s17 = scalar_lea.vmem %s2915_s2, %s1773_s14  ;;  %s2924_s23 = sshll.u32 %s2580_s9, 2  ;;  %v2368_v56 = vld [vmem:[%s2919_s6 + $0x1a8] sm:$0xff]   ;;  %v2370_v59 = vld [vmem:[%s2919_s6 + $0x1b0] sm:$0xff]  }
  0x19   : > { %2159 = vmatprep.subr.bf16.mxu0 %v2438_v1  ;;  %v2658_v27 = vld [vmem:[%s503_s17] sm:$0xf]  ;;  %v886_v28 = vld [vmem:[%s503_s17 + $0x4] sm:$0x1]  ;;  %s2690_s16 = scalar_lea.vmem %s2913_s0, %s2924_s23  ;;  %s1779_s20 = sshll.u32 %s2615_s19, 2  ;;  %v2371_v62 = vld [vmem:[%s2919_s6 + $0xb8] sm:$0xff]  }
  0x1a   : > { %v1906_v31 = vcombine.low %v2658_v27, %v886_v28  ;;  %v554_v41 = vld [vmem:[%s2690_s16] sm:$0xf]  ;;  %v555_v51 = vld [vmem:[%s2690_s16 + $0x4] sm:$0x1]  ;;  %v2372_v63 = vld [vmem:[%s2919_s6 + $0x1b8] sm:$0xff]   ;;  %s2776_s12 = scalar_lea.vmem %s2917_s4, %s1779_s20  ;;  %s542_s18 = scalar_lea.vmem %s2918_s5, %s1779_s20 }
  0x1b   : > { %2080 = vmatpush3.bf16.msra.mxu1 %v2331_v9  ;;  %v1833_v54 = vcombine.low %v554_v41, %v555_v51  ;;  %v2373_v2 = vld [vmem:[%s2919_s6 + $0xc0] sm:$0xff]   ;;  %v2376_v5 = vld [vmem:[%s2919_s6 + $0xc8] sm:$0xff]   ;;  %v2378_v7 = vld [vmem:[%s2919_s6 + $0xd0] sm:$0xff]   ;;  %s2942_s24 = smov (!%p547_p9, %s2420_s24), 7 }
  0x1c   : > { %2160 = vmatpush3.bf16.msra.mxu0 %v2332_v10  ;;  %2081 = vmatprep.subr.bf16.mxu1 %v2438_v1  ;;  %v1125_v34 = vshll.u32 %v1906_v31, 16  ;;  %v1123_v37 = vshrl.u32 %v1906_v31, 16  ;;  %v2783_v3 = vld [vmem:[%s2776_s12] sm:$0xf]  ;;  %v2377_v6 = vld [vmem:[%s2919_s6 + $0x1c8] sm:$0xff]   ;;  %v2379_v8 = vld [vmem:[%s2919_s6 + $0x1d0] sm:$0xff]  }
  0x1d   : > { %2161 = vmatprep.subr.bf16.mxu0 %v2438_v1  ;;  %v791_v57 = vshll.u32 %v1833_v54, 16  ;;  %v789_v60 = vshrl.u32 %v1833_v54, 16  ;;  %v2375_v4 = vld [vmem:[%s2919_s6 + $0x1c0] sm:$0xff]   ;;  %v2380_v9 = vld [vmem:[%s2919_s6 + $0xd8] sm:$0xff]  }
  0x1e   : > { %v1127_v38 = vrot.slane %v1125_v34, 1  ;;  %v2381_v10 = vld [vmem:[%s2919_s6 + $0x1d8] sm:$0xff]  }
  0x1f   : > { %2082 = vmatpush3.bf16.msra.mxu1 %v2333_v11  ;;  %v793_v61 = vrot.slane %v791_v57, 1  ;;  %v2382_v11 = vld [vmem:[%s2919_s6 + $0xe0] sm:$0xff]  }
  0x20   : > { %2162 = vmatpush3.bf16.msra.mxu0 %v2334_v12  ;;  %2083 = vmatprep.subr.bf16.mxu1 %v2438_v1  ;;  %v1128_v43 = vor.u32 %v1127_v38, %v1123_v37  ;;  %v2383_v12 = vld [vmem:[%s2919_s6 + $0x1e0] sm:$0xff]  }
  0x21   : > { %2163 = vmatprep.subr.bf16.mxu0 %v2438_v1  ;;  %v794_v0 = vor.u32 %v793_v61, %v789_v60 }
  0x23   : > { %2084 = vmatpush3.bf16.msra.mxu1 %v2335_v13  ;;  %v2384_v13 = vld [vmem:[%s2919_s6 + $0xe8] sm:$0xff]  }
  0x24   : > { %2164 = vmatpush3.bf16.msra.mxu0 %v2336_v14  ;;  %2085 = vmatprep.subr.bf16.mxu1 %v2438_v1  ;;  %v2385_v14 = vld [vmem:[%s2919_s6 + $0x1e8] sm:$0xff]  }
  0x25   : > { %2165 = vmatprep.subr.bf16.mxu0 %v2438_v1 }
  0x27   : > { %2086 = vmatpush3.bf16.msra.mxu1 %v2337_v15  ;;  %v2386_v15 = vld [vmem:[%s2919_s6 + $0xf0] sm:$0xff]  }
  0x28   : > { %2166 = vmatpush3.bf16.msra.mxu0 %v2338_v16  ;;  %2091 = vmatprep.subr.bf16.mxu1 %v2438_v1  ;;  %v2387_v16 = vld [vmem:[%s2919_s6 + $0x1f0] sm:$0xff]  }
  0x29   : > { %2171 = vmatprep.subr.bf16.mxu0 %v2438_v1 }
  0x2a   : > { %2088 = vmatmul.mubr.bf16.vlgmr.msra.gmra.mrb[0].mxu1 %v556_v17  ;;  %v2388_v17 = vld [vmem:[%s2919_s6 + $0xf8] sm:$0xff]  }
  0x2b   : > { %2092 = vmatpush3.bf16.msra.mxu1 %v2339_v18  ;;  %2168 = vmatmul.mubr.bf16.vlgmr.msra.gmra.mrb[0].mxu0 %v887_v20  ;;  %v2389_v18 = vld [vmem:[%s2919_s6 + $0x1f8] sm:$0xff]   ;;  %v2390_v20 = vld [vmem:[%s2919_s6 + $0x200] sm:$0xff]  }
  0x2c   : > { %2172 = vmatpush3.bf16.msra.mxu0 %v2341_v19  ;;  %2093 = vmatprep.subr.bf16.mxu1 %v2438_v1  ;;  %v1221_v19 = vld [vmem:[%s542_s18] sm:$0xf]  ;;  %s1783_s18 = sshll.u32 %s2936_s25, 3 }
  0x2d   : > { %2173 = vmatprep.subr.bf16.mxu0 %v2438_v1  ;;  %2107 = vmatprep.mubr.msk.bf16.mxu1 %vm2439_vm0, %v2438_v1  ;;  %s550_s14 = sadd.s32 %s1783_s18, %s2942_s24 }
  0x2e   : > { %2187 = vmatprep.mubr.msk.bf16.mxu0 %vm2439_vm0, %v2438_v1  ;;  %s1784_s1 = sshll.u32 %s550_s14, 3 }
  0x2f   : > { %2094 = vmatpush3.bf16.msra.mxu1 %v2342_v21  ;;  %v2391_v21 = vld [vmem:[%s2919_s6 + $0x208] sm:$0xff]   ;;  %s552_s20 = scalar_lea.vmem %s2920_s7, %s1784_s1 }
  0x30   : > { %2174 = vmatpush3.bf16.msra.mxu0 %v2343_v22  ;;  %2095 = vmatprep.subr.bf16.mxu1 %v2438_v1  ;;  %v2392_v22 = vld [vmem:[%s2919_s6 + $0x210] sm:$0xff]  }
  0x31   : > { %2175 = vmatprep.subr.bf16.mxu0 %v2438_v1 }
  0x33   : > { %2096 = vmatpush3.bf16.msra.mxu1 %v2344_v23  ;;  %v2393_v23 = vld [vmem:[%s2919_s6 + $0x218] sm:$0xff]  }
  0x34   : > { %2176 = vmatpush3.bf16.msra.mxu0 %v2345_v24  ;;  %2097 = vmatprep.subr.bf16.mxu1 %v2438_v1  ;;  %v1220_v24 = vld [vmem:[%s2776_s12 + $0x4] sm:$0x1] }
  0x35   : > { %2177 = vmatprep.subr.bf16.mxu0 %v2438_v1 }
  0x37   : > { %2098 = vmatpush3.bf16.msra.mxu1 %v2346_v25  ;;  %v2394_v25 = vld [vmem:[%s2919_s6 + $0x220] sm:$0xff]  }
  0x38   : > { %2178 = vmatpush3.bf16.msra.mxu0 %v2347_v26  ;;  %2099 = vmatprep.subr.bf16.mxu1 %v2438_v1  ;;  %v1979_v26 = vcombine.low %v2783_v3, %v1220_v24 }
  0x39   : > { %2179 = vmatprep.subr.bf16.mxu0 %v2438_v1 }
  0x3a   : > { %v1459_v28 = vshll.u32 %v1979_v26, 16 }
  0x3b   : > { %2100 = vmatpush3.bf16.msra.mxu1 %v2348_v29  ;;  %v2396_v29 = vld [vmem:[%s2919_s6 + $0x230] sm:$0xff]  }
  0x3c   : > { %2180 = vmatpush3.bf16.msra.mxu0 %v2349_v30  ;;  %2101 = vmatprep.subr.bf16.mxu1 %v2438_v1  ;;  %v1457_v30 = vshrl.u32 %v1979_v26, 16  ;;  %v1461_v31 = vrot.slane %v1459_v28, 1 }
  0x3d   : > { %2181 = vmatprep.subr.bf16.mxu0 %v2438_v1 }
  0x3f   : > { %2102 = vmatpush3.bf16.msra.mxu1 %v2350_v32  ;;  %v2397_v32 = vld [vmem:[%s2919_s6 + $0x238] sm:$0xff]  }
  0x40   : > { %2182 = vmatpush3.bf16.msra.mxu0 %v2351_v33  ;;  %2103 = vmatprep.subr.bf16.mxu1 %v2438_v1  ;;  %v1462_v33 = vor.u32 %v1461_v31, %v1457_v30 }
  0x41   : > { %2183 = vmatprep.subr.bf16.mxu0 %v2438_v1 }
  0x43   : > { %2104 = vmatpush3.bf16.msra.mxu1 %v2352_v35 }
  0x44   : > { %2184 = vmatpush3.bf16.msra.mxu0 %v2353_v36  ;;  %2105 = vmatprep.subr.bf16.mxu1 %v2438_v1 }
  0x45   : > { %2185 = vmatprep.subr.bf16.mxu0 %v2438_v1 }
  0x47   : > { %2106 = vmatpush3.bf16.msra.mxu1 %v2354_v39 }
  0x48   : > { %2186 = vmatpush3.bf16.msra.mxu0 %v2355_v40  ;;  %2111 = vmatprep.subr.bf16.mxu1 %v2438_v1 }
  0x49   : > { %2191 = vmatprep.subr.bf16.mxu0 %v2438_v1 }
  0x4a   : > { %2108 = vmatmul.mubr.bf16.vlgmr.msra.gmra.mrb[0].mxu1 %v554_v41 }
  0x4b   : > { %2112 = vmatpush3.bf16.msra.mxu1 %v2357_v42  ;;  %2188 = vmatmul.mubr.bf16.vlgmr.msra.gmra.mrb[0].mxu0 %v1128_v43 }
  0x4c   : > { %2192 = vmatpush3.bf16.msra.mxu0 %v2358_v44  ;;  %2113 = vmatprep.subr.bf16.mxu1 %v2438_v1 }
  0x4d   : > { %2193 = vmatprep.subr.bf16.mxu0 %v2438_v1  ;;  %2127 = vmatprep.mubr.msk.bf16.mxu1 %vm2439_vm0, %v2438_v1 }
  0x4e   : > { %2207 = vmatprep.mubr.msk.bf16.mxu0 %vm2439_vm0, %v2438_v1 }
  0x4f   : > { %2114 = vmatpush3.bf16.msra.mxu1 %v2359_v45 }
  0x50   : > { %2194 = vmatpush3.bf16.msra.mxu0 %v2360_v46  ;;  %2115 = vmatprep.subr.bf16.mxu1 %v2438_v1 }
  0x51   : > { %2195 = vmatprep.subr.bf16.mxu0 %v2438_v1 }
  0x53   : > { %2116 = vmatpush3.bf16.msra.mxu1 %v2361_v47 }
  0x54   : > { %2196 = vmatpush3.bf16.msra.mxu0 %v2362_v48  ;;  %2117 = vmatprep.subr.bf16.mxu1 %v2438_v1 }
  0x55   : > { %2197 = vmatprep.subr.bf16.mxu0 %v2438_v1 }
  0x57   : > { %2118 = vmatpush3.bf16.msra.mxu1 %v2363_v49 }
  0x58   : > { %2198 = vmatpush3.bf16.msra.mxu0 %v2364_v50  ;;  %2119 = vmatprep.subr.bf16.mxu1 %v2438_v1 }
  0x59   : > { %2199 = vmatprep.subr.bf16.mxu0 %v2438_v1 }
  0x5b   : > { %2120 = vmatpush3.bf16.msra.mxu1 %v2365_v52 }
  0x5c   : > { %2200 = vmatpush3.bf16.msra.mxu0 %v2366_v53  ;;  %2121 = vmatprep.subr.bf16.mxu1 %v2438_v1 }
  0x5d   : > { %2201 = vmatprep.subr.bf16.mxu0 %v2438_v1 }
  0x5f   : > { %2122 = vmatpush3.bf16.msra.mxu1 %v2367_v55 }
  0x60   : > { %2202 = vmatpush3.bf16.msra.mxu0 %v2368_v56  ;;  %2123 = vmatprep.subr.bf16.mxu1 %v2438_v1 }
  0x61   : > { %2203 = vmatprep.subr.bf16.mxu0 %v2438_v1 }
  0x63   : > { %2124 = vmatpush3.bf16.msra.mxu1 %v2369_v58 }
  0x64   : > { %2204 = vmatpush3.bf16.msra.mxu0 %v2370_v59  ;;  %2125 = vmatprep.subr.bf16.mxu1 %v2438_v1 }
  0x65   : > { %2205 = vmatprep.subr.bf16.mxu0 %v2438_v1 }
  0x67   : > { %2126 = vmatpush3.bf16.msra.mxu1 %v2371_v62 }
  0x68   : > { %2206 = vmatpush3.bf16.msra.mxu0 %v2372_v63  ;;  %2131 = vmatprep.subr.bf16.mxu1 %v2438_v1 }
  0x69   : > { %2211 = vmatprep.subr.bf16.mxu0 %v2438_v1 }
  0x6a   : > { %2128 = vmatmul.mubr.bf16.vlgmr.msra.gmra.mrb[0].mxu1 %v794_v0 }
  0x6b   : > { %2132 = vmatpush3.bf16.msra.mxu1 %v2373_v2  ;;  %2208 = vmatmul.mubr.bf16.vlgmr.msra.gmra.mrb[0].mxu0 %v2783_v3 }
  0x6c   : > { %2212 = vmatpush3.bf16.msra.mxu0 %v2375_v4  ;;  %2133 = vmatprep.subr.bf16.mxu1 %v2438_v1 }
  0x6d   : > { %2213 = vmatprep.subr.bf16.mxu0 %v2438_v1  ;;  %2147 = vmatprep.mubr.msk.bf16.mxu1 %vm2439_vm0, %v2438_v1 }
  0x6e   : > { %2227 = vmatprep.mubr.msk.bf16.mxu0 %vm2439_vm0, %v2438_v1 }
  0x6f   : > { %2134 = vmatpush3.bf16.msra.mxu1 %v2376_v5 }
  0x70   : > { %2214 = vmatpush3.bf16.msra.mxu0 %v2377_v6  ;;  %2135 = vmatprep.subr.bf16.mxu1 %v2438_v1 }
  0x71   : > { %2215 = vmatprep.subr.bf16.mxu0 %v2438_v1 }
  0x73   : > { %2136 = vmatpush3.bf16.msra.mxu1 %v2378_v7 }
  0x74   : > { %2216 = vmatpush3.bf16.msra.mxu0 %v2379_v8  ;;  %2137 = vmatprep.subr.bf16.mxu1 %v2438_v1 }
  0x75   : > { %2217 = vmatprep.subr.bf16.mxu0 %v2438_v1 }
  0x77   : > { %2138 = vmatpush3.bf16.msra.mxu1 %v2380_v9 }
  0x78   : > { %2218 = vmatpush3.bf16.msra.mxu0 %v2381_v10  ;;  %2139 = vmatprep.subr.bf16.mxu1 %v2438_v1 }
  0x79   : > { %2219 = vmatprep.subr.bf16.mxu0 %v2438_v1 }
  0x7b   : > { %2140 = vmatpush3.bf16.msra.mxu1 %v2382_v11 }
  0x7c   : > { %2220 = vmatpush3.bf16.msra.mxu0 %v2383_v12  ;;  %2141 = vmatprep.subr.bf16.mxu1 %v2438_v1 }
  0x7d   : > { %2221 = vmatprep.subr.bf16.mxu0 %v2438_v1 }
  0x7f   : > { %2142 = vmatpush3.bf16.msra.mxu1 %v2384_v13 }
  0x80   : > { %2222 = vmatpush3.bf16.msra.mxu0 %v2385_v14  ;;  %2143 = vmatprep.subr.bf16.mxu1 %v2438_v1 }
  0x81   : > { %2223 = vmatprep.subr.bf16.mxu0 %v2438_v1 }
  0x83   : > { %2144 = vmatpush3.bf16.msra.mxu1 %v2386_v15 }
  0x84   : > { %2224 = vmatpush3.bf16.msra.mxu0 %v2387_v16  ;;  %2145 = vmatprep.subr.bf16.mxu1 %v2438_v1 }
  0x85   : > { %2225 = vmatprep.subr.bf16.mxu0 %v2438_v1 }
  0x87   : > { %2146 = vmatpush3.bf16.msra.mxu1 %v2388_v17 }
  0x88   : > { %2226 = vmatpush3.bf16.msra.mxu0 %v2389_v18 }
  0x89   : > { %2231 = vmatprep.subr.bf16.mxu0 %v2438_v1 }
  0x8a   : > { %2148 = vmatmul.mubr.bf16.vlgmr.msra.gmra.mrb[0].mxu1 %v2658_v27  ;;  %v2395_v27 = vld [vmem:[%s2919_s6 + $0x228] sm:$0xff]  }
  0x8b   : > { %2228 = vmatmul.mubr.bf16.vlgmr.msra.gmra.mrb[0].mxu0 %v1221_v19 }
  0x8c   : > { %2232 = vmatpush3.bf16.msra.mxu0 %v2390_v20  ;;  %2247 = vmatprep.mubr.msk.bf16.mxu0 %vm2439_vm0, %v2438_v1 }
  0x8d   : > { %2233 = vmatprep.subr.bf16.mxu0 %v2438_v1 }
  0x90   : > { %2234 = vmatpush3.bf16.msra.mxu0 %v2391_v21 }
  0x91   : > { %2235 = vmatprep.subr.bf16.mxu0 %v2438_v1 }
  0x94   : > { %2236 = vmatpush3.bf16.msra.mxu0 %v2392_v22 }
  0x95   : > { %2237 = vmatprep.subr.bf16.mxu0 %v2438_v1 }
  0x98   : > { %2238 = vmatpush3.bf16.msra.mxu0 %v2393_v23 }
  0x99   : > { %2239 = vmatprep.subr.bf16.mxu0 %v2438_v1 }
  0x9c   : > { %2240 = vmatpush3.bf16.msra.mxu0 %v2394_v25 }
  0x9d   : > { %2241 = vmatprep.subr.bf16.mxu0 %v2438_v1 }
  0xa0   : > { %2242 = vmatpush3.bf16.msra.mxu0 %v2395_v27 }
  0xa1   : > { %2243 = vmatprep.subr.bf16.mxu0 %v2438_v1 }
  0xa4   : > { %2244 = vmatpush3.bf16.msra.mxu0 %v2396_v29 }
  0xa5   : > { %2245 = vmatprep.subr.bf16.mxu0 %v2438_v1 }
  0xa8   : > { %2246 = vmatpush3.bf16.msra.mxu0 %v2397_v32 }
  0xab   : > { %2248 = vmatmul.mubr.bf16.vlgmr.msra.gmra.mrb[0].mxu0 %v1462_v33 }
 0x15d   : > { %v987_v34 = vpop.f32.mrb[0].mxu1 }
 0x15e   : > { %v2149_v35 = vpop.f32.mrb[1].mxu1 }
 0x15f   : > { %v990_v36 = vpop.f32.mrb[2].mxu1 }
 0x160   : > { %v2150_v37 = vpop.f32.mrb[3].mxu1 }
 0x17e   : > { %v1546_v38 = vpop.f32.mrb[0].mxu0 }
 0x17f   : > { %v2251_v39 = vadd.f32 %v1546_v38, %v987_v34  ;;  %v2249_v40 = vpop.f32.mrb[1].mxu0 }
 0x180   : > { %v1549_v1 = vpop.f32.mrb[2].mxu0 }
 0x181   : > { %1553 = vst [vmem:[%s552_s20] sm:$0xff] %v2251_v39  ;;  %v2250_v41 = vpop.f32.mrb[3].mxu0 }
 0x182 PF: > { %s17_s28 = sadd.s32 1, %s2436_s28   ;;  %s2925_s24 = smov %s2428_s26 }
 0x183   : > { %p14_p10 = scmp.ge.s32.totalorder %s17_s28, 18   ;;  %s2926_s25 = smov %s2432_s27 }
 0x184   : > { %s2927_s26 = smov %s2930_s29  ;;  %s2928_s27 = smov %s2934_s30 }
 0x185   :  { %16 = sbr.rel (!%p14_p10) target bundleno = 3 (0x3), region = 101 }

// kernel: network_block.22
= control target key start
LH: loop header
LB: loop body
LE: loop exit
PB: predicated region body
PF: predicated region fallthrough
CT: control target
= control target key end

     0   :  { %s2142_s15 = smov 0   ;;  %s2144_s16 = smov 0   ;;  %s2548_s0 = inlined_call_operand.vmem [shape: bf16[2,10,10,128], index: 0, kind: input, shape index: {}, may-alias: {0,1,2}]   ;;  %s2549_s1 = inlined_call_operand.vmem [shape: bf16[2,10,10,128], index: 1, kind: input, shape index: {}, may-alias: {0,1,2}]   ;;  %s2550_s2 = inlined_call_operand.vmem [shape: bf16[2,10,10,128], index: 2, kind: input, shape index: {}, may-alias: {0,1,2}]   ;;  %s2551_s3 = inlined_call_operand.vmem [shape: bf16[9,128,128], index: 3, kind: input, shape index: {}]   ;;  %s2552_s4 = inlined_call_operand.vmem [shape: f32[2,8,8,128], index: 4, kind: output, shape index: {}]  }
   0x1   :  { %s2146_s17 = smov 0   ;;  %s2148_s18 = smov 0  }
   0x2   :  { %s2150_s19 = smov 0  }
   0x3 LB: > { %s23_s20 = sadd.s32 1, %s2105_s17  ;;  %s26_s21 = sadd.s32 1, %s2109_s18  ;;  %s2113_s19 = sphi %s2150_s19, %s14_s19   ;;  %s2109_s18 = sphi %s2148_s18, %s2556_s18   ;;  %s2105_s17 = sphi %s2146_s17, %s2555_s17   ;;  %s2101_s16 = sphi %s2144_s16, %s2554_s16   ;;  %s2097_s15 = sphi %s2142_s15, %s2553_s15  }
   0x4   : > { %p24_p0 = scmp.ge.s32.totalorder %s23_s20, 8  ;;  %p1453_p1 = scmp.ge.s32.totalorder %s2113_s19, 1 }
   0x5   : > { %p222_p2 = scmp.lt.s32.totalorder %s2113_s19, 17 }
   0x6   : > { %s2558_s20 = smov (%p24_p0, %s23_s20), 0  ;;  %s2560_s21 = smov (!%p24_p0, %s26_s21), %s2109_s18 }
   0x7   : > { %p223_p3 = pnand %p1453_p1, %p222_p2  ;;  %p28_p4 = scmp.ge.s32.totalorder %s2560_s21, 2 }
   0x8   : > { %v2000_v0 = vld [vmem:[%s2551_s3 + $0x40] sm:$0xff] (!%p223_p3)   ;;  %v2115_v1 = vmov (!%p223_p3), 0.0   ;;  %v2002_v3 = vld [vmem:[%s2551_s3 + $0x48] sm:$0xff] (!%p223_p3)   ;;  %vm2116_vm0 = vmmov (!%p223_p3), 0   ;;  %p275_p5 = scmp.lt.s32.totalorder (!%p223_p3), %s2101_s16, 1  ;;  %p277_p6 = scmp.lt.s32.totalorder (!%p223_p3), %s2097_s15, 9 }
   0x9   : > { %s2562_s21 = smov (%p28_p4, %s2560_s21), 0  ;;  %226 = sbr.rel (%p223_p3) target bundleno = 386 (0x182), region = 36 }
   0xa   : > { %1748 = vmatprep.subr.bf16.mxu1 (!%p223_p3), %v2115_v1  ;;  %1828 = vmatprep.subr.bf16.mxu0 (!%p223_p3), %v2115_v1  ;;  %v2001_v2 = vld [vmem:[%s2551_s3 + $0x100] sm:$0xff] (!%p223_p3)   ;;  %v2003_v4 = vld [vmem:[%s2551_s3 + $0x108] sm:$0xff] (!%p223_p3)   ;;  %v2004_v5 = vld [vmem:[%s2551_s3 + $0x50] sm:$0xff] (!%p223_p3)   ;;  %s284_s12 = sadd.s32 (!%p223_p3), 1, %s2097_s15  ;;  %p308_p9 = scmp.lt.s32.totalorder (!%p223_p3), %s2097_s15, 7 }
   0xb   : > { %1749 = vmatpush3.bf16.msra.mxu1 (!%p223_p3), %v2000_v0  ;;  %1764 = vmatprep.mubr.msk.bf16.mxu1 (!%p223_p3), %vm2116_vm0, %v2115_v1  ;;  %v2005_v6 = vld [vmem:[%s2551_s3 + $0x110] sm:$0xff] (!%p223_p3)   ;;  %v2006_v7 = vld [vmem:[%s2551_s3 + $0x58] sm:$0xff] (!%p223_p3)   ;;  %p287_p7 = scmp.lt.s32.totalorder (!%p223_p3), %s284_s12, 9  ;;  %v2008_v9 = vld [vmem:[%s2551_s3 + $0x60] sm:$0xff] (!%p223_p3)  }
   0xc   : > { %1829 = vmatpush3.bf16.msra.mxu0 (!%p223_p3), %v2001_v2  ;;  %1750 = vmatprep.subr.bf16.mxu1 (!%p223_p3), %v2115_v1  ;;  %v2007_v8 = vld [vmem:[%s2551_s3 + $0x118] sm:$0xff] (!%p223_p3)   ;;  %v2009_v10 = vld [vmem:[%s2551_s3 + $0x120] sm:$0xff] (!%p223_p3)   ;;  %v2010_v14 = vld [vmem:[%s2551_s3 + $0x68] sm:$0xff] (!%p223_p3)  }
   0xd   : > { %1830 = vmatprep.subr.bf16.mxu0 (!%p223_p3), %v2115_v1  ;;  %1844 = vmatprep.mubr.msk.bf16.mxu0 (!%p223_p3), %vm2116_vm0, %v2115_v1  ;;  %v2011_v15 = vld [vmem:[%s2551_s3 + $0x128] sm:$0xff] (!%p223_p3)   ;;  %v2012_v20 = vld [vmem:[%s2551_s3 + $0x70] sm:$0xff] (!%p223_p3)   ;;  %v2014_v23 = vld [vmem:[%s2551_s3 + $0x78] sm:$0xff] (!%p223_p3)  }
   0xe   : > { %v2013_v21 = vld [vmem:[%s2551_s3 + $0x130] sm:$0xff] (!%p223_p3)   ;;  %v2015_v28 = vld [vmem:[%s2551_s3 + $0x138] sm:$0xff] (!%p223_p3)   ;;  %v2017_v30 = vld [vmem:[%s2551_s3] sm:$0xff] (!%p223_p3)  }
   0xf   : > { %1751 = vmatpush3.bf16.msra.mxu1 (!%p223_p3), %v2002_v3  ;;  %v2019_v32 = vld [vmem:[%s2551_s3 + $0x140] sm:$0xff] (!%p223_p3)   ;;  %v2020_v33 = vld [vmem:[%s2551_s3 + $0x8] sm:$0xff] (!%p223_p3)   ;;  %v2022_v35 = vld [vmem:[%s2551_s3 + $0x10] sm:$0xff] (!%p223_p3)  }
  0x10   : > { %s2564_s16 = smov (!%p275_p5, %s2101_s16), 1  ;;  %1831 = vmatpush3.bf16.msra.mxu0 %v2003_v4  ;;  %1752 = vmatprep.subr.bf16.mxu1 %v2115_v1  ;;  %s2566_s12 = smov (!%p287_p7, %s284_s12), 9  ;;  %v2021_v34 = vld [vmem:[%s2551_s3 + $0x148] sm:$0xff]   ;;  %v2023_v36 = vld [vmem:[%s2551_s3 + $0x150] sm:$0xff]   ;;  %v2024_v37 = vld [vmem:[%s2551_s3 + $0x18] sm:$0xff]  }
  0x11   : > { %s278_s30 = scalar_select %p277_p6, %s2097_s15, 9  ;;  %1832 = vmatprep.subr.bf16.mxu0 %v2115_v1  ;;  %v2025_v38 = vld [vmem:[%s2551_s3 + $0x158] sm:$0xff]   ;;  %v2026_v39 = vld [vmem:[%s2551_s3 + $0x20] sm:$0xff]   ;;  %v2028_v41 = vld [vmem:[%s2551_s3 + $0x28] sm:$0xff]  }
  0x12   : > { %s2206_s7 = smul.u32 20, %s2564_s16  ;;  %v2027_v40 = vld [vmem:[%s2551_s3 + $0x160] sm:$0xff]   ;;  %v2029_v42 = vld [vmem:[%s2551_s3 + $0x168] sm:$0xff]   ;;  %v2030_v43 = vld [vmem:[%s2551_s3 + $0x30] sm:$0xff]   ;;  %s1460_s23 = sshll.u32 %s2564_s16, 3 }
  0x13   : > { %s1454_s10 = sshll.u32 %s278_s30, 1  ;;  %1753 = vmatpush3.bf16.msra.mxu1 %v2004_v5  ;;  %s1456_s30 = sshll.u32 %s2566_s12, 1  ;;  %v2031_v44 = vld [vmem:[%s2551_s3 + $0x170] sm:$0xff]   ;;  %v2032_v45 = vld [vmem:[%s2551_s3 + $0x38] sm:$0xff]   ;;  %v2034_v47 = vld [vmem:[%s2551_s3 + $0x80] sm:$0xff]  }
  0x14   : > { %s281_s11 = sadd.s32 %s2206_s7, %s1454_s10  ;;  %1833 = vmatpush3.bf16.msra.mxu0 %v2005_v6  ;;  %1754 = vmatprep.subr.bf16.mxu1 %v2115_v1  ;;  %s291_s8 = sadd.s32 %s2206_s7, %s1456_s30  ;;  %v2033_v46 = vld [vmem:[%s2551_s3 + $0x178] sm:$0xff]   ;;  %v2035_v49 = vld [vmem:[%s2551_s3 + $0x180] sm:$0xff]   ;;  %v2036_v50 = vld [vmem:[%s2551_s3 + $0x88] sm:$0xff]  }
  0x15   : > { %s1455_s22 = sshll.u32 %s281_s11, 2  ;;  %1834 = vmatprep.subr.bf16.mxu0 %v2115_v1  ;;  %s1457_s9 = sshll.u32 %s291_s8, 2  ;;  %v2037_v51 = vld [vmem:[%s2551_s3 + $0x188] sm:$0xff]   ;;  %v2038_v52 = vld [vmem:[%s2551_s3 + $0x90] sm:$0xff]   ;;  %v2040_v54 = vld [vmem:[%s2551_s3 + $0x98] sm:$0xff]  }
  0x16   : > { %s283_s27 = scalar_lea.vmem %s2548_s0, %s1455_s22  ;;  %s293_s14 = scalar_lea.vmem %s2549_s1, %s1457_s9  ;;  %v2039_v53 = vld [vmem:[%s2551_s3 + $0x190] sm:$0xff]   ;;  %v2041_v55 = vld [vmem:[%s2551_s3 + $0x198] sm:$0xff]   ;;  %v2042_v56 = vld [vmem:[%s2551_s3 + $0xa0] sm:$0xff]  }
  0x17   : > { %1755 = vmatpush3.bf16.msra.mxu1 %v2006_v7  ;;  %v2235_v11 = vld [vmem:[%s283_s27] sm:$0xf]  ;;  %v316_v12 = vld [vmem:[%s283_s27 + $0x4] sm:$0x1]  ;;  %s295_s22 = sadd.s32 2, %s2097_s15  ;;  %v2044_v58 = vld [vmem:[%s2551_s3 + $0xa8] sm:$0xff]  }
  0x18   : > { %1835 = vmatpush3.bf16.msra.mxu0 %v2007_v8  ;;  %1756 = vmatprep.subr.bf16.mxu1 %v2115_v1  ;;  %v2238_v13 = vcombine.low %v2235_v11, %v316_v12  ;;  %v2250_v16 = vld [vmem:[%s293_s14] sm:$0xf]  ;;  %v648_v17 = vld [vmem:[%s293_s14 + $0x4] sm:$0x1]  ;;  %p298_p8 = scmp.lt.s32.totalorder %s295_s22, 9  ;;  %v2045_v59 = vld [vmem:[%s2551_s3 + $0x1a8] sm:$0xff]  }
  0x19   : > { %1836 = vmatprep.subr.bf16.mxu0 %v2115_v1  ;;  %v2254_v18 = vcombine.low %v2250_v16, %v648_v17  ;;  %v2043_v57 = vld [vmem:[%s2551_s3 + $0x1a0] sm:$0xff]   ;;  %v2046_v60 = vld [vmem:[%s2551_s3 + $0xb0] sm:$0xff]   ;;  %v2048_v62 = vld [vmem:[%s2551_s3 + $0xb8] sm:$0xff]   ;;  %s2570_s15 = smov (!%p308_p9, %s2097_s15), 7 }
  0x1a   : > { %v358_v19 = vshll.u32 %v2238_v13, 16  ;;  %v356_v24 = vshrl.u32 %v2238_v13, 16  ;;  %s2568_s22 = smov (!%p298_p8, %s295_s22), 9  ;;  %v2047_v61 = vld [vmem:[%s2551_s3 + $0x1b0] sm:$0xff]   ;;  %v2049_v63 = vld [vmem:[%s2551_s3 + $0x1b8] sm:$0xff]   ;;  %v556_v0 = vrot.slane %v2238_v13, 1 }
  0x1b   : > { %1757 = vmatpush3.bf16.msra.mxu1 %v2008_v9  ;;  %v780_v22 = vshll.u32 %v2254_v18, 16  ;;  %v778_v26 = vshrl.u32 %v2254_v18, 16  ;;  %v891_v48 = vrot.slane %v2254_v18, 1  ;;  %s1458_s10 = sshll.u32 %s2568_s22, 1  ;;  %v2050_v2 = vld [vmem:[%s2551_s3 + $0xc0] sm:$0xff]   ;;  %v2053_v5 = vld [vmem:[%s2551_s3 + $0xc8] sm:$0xff]  }
  0x1c   : > { %1837 = vmatpush3.bf16.msra.mxu0 %v2009_v10  ;;  %1758 = vmatprep.subr.bf16.mxu1 %v2115_v1  ;;  %v360_v25 = vrot.slane %v358_v19, 1  ;;  %s302_s13 = sadd.s32 %s2206_s7, %s1458_s10  ;;  %v2052_v4 = vld [vmem:[%s2551_s3 + $0x1c0] sm:$0xff]   ;;  %v2054_v6 = vld [vmem:[%s2551_s3 + $0x1c8] sm:$0xff]   ;;  %v2055_v7 = vld [vmem:[%s2551_s3 + $0xd0] sm:$0xff]  }
  0x1d   : > { %1838 = vmatprep.subr.bf16.mxu0 %v2115_v1  ;;  %v782_v27 = vrot.slane %v780_v22, 1  ;;  %s1459_s24 = sshll.u32 %s302_s13, 2  ;;  %v2056_v8 = vld [vmem:[%s2551_s3 + $0x1d0] sm:$0xff]   ;;  %v2057_v9 = vld [vmem:[%s2551_s3 + $0xd8] sm:$0xff]   ;;  %v2060_v13 = vld [vmem:[%s2551_s3 + $0x1e0] sm:$0xff]  }
  0x1e   : > { %v361_v29 = vor.u32 %v360_v25, %v356_v24  ;;  %s2419_s29 = scalar_lea.vmem %s2550_s2, %s1459_s24  ;;  %v2058_v10 = vld [vmem:[%s2551_s3 + $0x1d8] sm:$0xff]   ;;  %v2062_v17 = vld [vmem:[%s2551_s3 + $0x1e8] sm:$0xff]   ;;  %v2063_v19 = vld [vmem:[%s2551_s3 + $0xf0] sm:$0xff]   ;;  %s311_s24 = sadd.s32 %s1460_s23, %s2570_s15 }
  0x1f   : > { %1759 = vmatpush3.bf16.msra.mxu1 %v2010_v14  ;;  %v783_v31 = vor.u32 %v782_v27, %v778_v26  ;;  %v982_v3 = vld [vmem:[%s2419_s29] sm:$0xf]  ;;  %v983_v12 = vld [vmem:[%s2419_s29 + $0x4] sm:$0x1]  ;;  %v2065_v22 = vld [vmem:[%s2551_s3 + $0xf8] sm:$0xff]   ;;  %s1461_s22 = sshll.u32 %s311_s24, 3 }
  0x20   : > { %1839 = vmatpush3.bf16.msra.mxu0 %v2011_v15  ;;  %1760 = vmatprep.subr.bf16.mxu1 %v2115_v1  ;;  %v1632_v14 = vcombine.low %v982_v3, %v983_v12  ;;  %v2061_v15 = vld [vmem:[%s2551_s3 + $0xe8] sm:$0xff]   ;;  %v2066_v24 = vld [vmem:[%s2551_s3 + $0x1f8] sm:$0xff]   ;;  %v2067_v26 = vld [vmem:[%s2551_s3 + $0x200] sm:$0xff]   ;;  %s313_s7 = scalar_lea.vmem %s2552_s4, %s1461_s22 }
  0x21   : > { %1840 = vmatprep.subr.bf16.mxu0 %v2115_v1  ;;  %v2068_v27 = vld [vmem:[%s2551_s3 + $0x208] sm:$0xff]  }
  0x22   : > { %v1115_v18 = vshll.u32 %v1632_v14, 16 }
  0x23   : > { %1761 = vmatpush3.bf16.msra.mxu1 %v2012_v20  ;;  %v2064_v20 = vld [vmem:[%s2551_s3 + $0x1f0] sm:$0xff]  }
  0x24   : > { %1841 = vmatpush3.bf16.msra.mxu0 %v2013_v21  ;;  %1762 = vmatprep.subr.bf16.mxu1 %v2115_v1  ;;  %v1113_v21 = vshrl.u32 %v1632_v14, 16 }
  0x25   : > { %1842 = vmatprep.subr.bf16.mxu0 %v2115_v1 }
  0x27   : > { %1763 = vmatpush3.bf16.msra.mxu1 %v2014_v23  ;;  %v1117_v23 = vrot.slane %v1115_v18, 1 }
  0x28   : > { %1843 = vmatpush3.bf16.msra.mxu0 %v2015_v28  ;;  %1768 = vmatprep.subr.bf16.mxu1 %v2115_v1  ;;  %v2069_v28 = vld [vmem:[%s2551_s3 + $0x210] sm:$0xff]  }
  0x29   : > { %1848 = vmatprep.subr.bf16.mxu0 %v2115_v1  ;;  %v1118_v25 = vor.u32 %v1117_v23, %v1113_v21 }
  0x2a   : > { %1765 = vmatmul.mubr.bf16.vlgmr.msra.gmra.mrb[0].mxu1 %v361_v29  ;;  %v2071_v29 = vld [vmem:[%s2551_s3 + $0x220] sm:$0xff]  }
  0x2b   : > { %1769 = vmatpush3.bf16.msra.mxu1 %v2017_v30  ;;  %1845 = vmatmul.mubr.bf16.vlgmr.msra.gmra.mrb[0].mxu0 %v783_v31  ;;  %v2072_v30 = vld [vmem:[%s2551_s3 + $0x228] sm:$0xff]   ;;  %v2073_v31 = vld [vmem:[%s2551_s3 + $0x230] sm:$0xff]  }
  0x2c   : > { %1849 = vmatpush3.bf16.msra.mxu0 %v2019_v32  ;;  %1770 = vmatprep.subr.bf16.mxu1 %v2115_v1  ;;  %v2074_v32 = vld [vmem:[%s2551_s3 + $0x238] sm:$0xff]  }
  0x2d   : > { %1850 = vmatprep.subr.bf16.mxu0 %v2115_v1  ;;  %1784 = vmatprep.mubr.msk.bf16.mxu1 %vm2116_vm0, %v2115_v1 }
  0x2e   : > { %1864 = vmatprep.mubr.msk.bf16.mxu0 %vm2116_vm0, %v2115_v1 }
  0x2f   : > { %1771 = vmatpush3.bf16.msra.mxu1 %v2020_v33  ;;  %v1226_v33 = vrot.slane %v1632_v14, 1 }
  0x30   : > { %1851 = vmatpush3.bf16.msra.mxu0 %v2021_v34  ;;  %1772 = vmatprep.subr.bf16.mxu1 %v2115_v1 }
  0x31   : > { %1852 = vmatprep.subr.bf16.mxu0 %v2115_v1 }
  0x33   : > { %1773 = vmatpush3.bf16.msra.mxu1 %v2022_v35 }
  0x34   : > { %1853 = vmatpush3.bf16.msra.mxu0 %v2023_v36  ;;  %1774 = vmatprep.subr.bf16.mxu1 %v2115_v1 }
  0x35   : > { %1854 = vmatprep.subr.bf16.mxu0 %v2115_v1 }
  0x37   : > { %1775 = vmatpush3.bf16.msra.mxu1 %v2024_v37 }
  0x38   : > { %1855 = vmatpush3.bf16.msra.mxu0 %v2025_v38  ;;  %1776 = vmatprep.subr.bf16.mxu1 %v2115_v1 }
  0x39   : > { %1856 = vmatprep.subr.bf16.mxu0 %v2115_v1 }
  0x3b   : > { %1777 = vmatpush3.bf16.msra.mxu1 %v2026_v39 }
  0x3c   : > { %1857 = vmatpush3.bf16.msra.mxu0 %v2027_v40  ;;  %1778 = vmatprep.subr.bf16.mxu1 %v2115_v1 }
  0x3d   : > { %1858 = vmatprep.subr.bf16.mxu0 %v2115_v1 }
  0x3f   : > { %1779 = vmatpush3.bf16.msra.mxu1 %v2028_v41 }
  0x40   : > { %1859 = vmatpush3.bf16.msra.mxu0 %v2029_v42  ;;  %1780 = vmatprep.subr.bf16.mxu1 %v2115_v1 }
  0x41   : > { %1860 = vmatprep.subr.bf16.mxu0 %v2115_v1 }
  0x43   : > { %1781 = vmatpush3.bf16.msra.mxu1 %v2030_v43 }
  0x44   : > { %1861 = vmatpush3.bf16.msra.mxu0 %v2031_v44  ;;  %1782 = vmatprep.subr.bf16.mxu1 %v2115_v1 }
  0x45   : > { %1862 = vmatprep.subr.bf16.mxu0 %v2115_v1 }
  0x47   : > { %1783 = vmatpush3.bf16.msra.mxu1 %v2032_v45 }
  0x48   : > { %1863 = vmatpush3.bf16.msra.mxu0 %v2033_v46  ;;  %1788 = vmatprep.subr.bf16.mxu1 %v2115_v1 }
  0x49   : > { %1868 = vmatprep.subr.bf16.mxu0 %v2115_v1 }
  0x4a   : > { %1785 = vmatmul.mubr.bf16.vlgmr.msra.gmra.mrb[0].mxu1 %v2235_v11  ;;  %v2059_v11 = vld [vmem:[%s2551_s3 + $0xe0] sm:$0xff]  }
  0x4b   : > { %1789 = vmatpush3.bf16.msra.mxu1 %v2034_v47  ;;  %1865 = vmatmul.mubr.bf16.vlgmr.msra.gmra.mrb[0].mxu0 %v891_v48 }
  0x4c   : > { %1869 = vmatpush3.bf16.msra.mxu0 %v2035_v49  ;;  %1790 = vmatprep.subr.bf16.mxu1 %v2115_v1 }
  0x4d   : > { %1870 = vmatprep.subr.bf16.mxu0 %v2115_v1  ;;  %1804 = vmatprep.mubr.msk.bf16.mxu1 %vm2116_vm0, %v2115_v1 }
  0x4e   : > { %1884 = vmatprep.mubr.msk.bf16.mxu0 %vm2116_vm0, %v2115_v1 }
  0x4f   : > { %1791 = vmatpush3.bf16.msra.mxu1 %v2036_v50 }
  0x50   : > { %1871 = vmatpush3.bf16.msra.mxu0 %v2037_v51  ;;  %1792 = vmatprep.subr.bf16.mxu1 %v2115_v1 }
  0x51   : > { %1872 = vmatprep.subr.bf16.mxu0 %v2115_v1 }
  0x53   : > { %1793 = vmatpush3.bf16.msra.mxu1 %v2038_v52 }
  0x54   : > { %1873 = vmatpush3.bf16.msra.mxu0 %v2039_v53  ;;  %1794 = vmatprep.subr.bf16.mxu1 %v2115_v1 }
  0x55   : > { %1874 = vmatprep.subr.bf16.mxu0 %v2115_v1 }
  0x57   : > { %1795 = vmatpush3.bf16.msra.mxu1 %v2040_v54 }
  0x58   : > { %1875 = vmatpush3.bf16.msra.mxu0 %v2041_v55  ;;  %1796 = vmatprep.subr.bf16.mxu1 %v2115_v1 }
  0x59   : > { %1876 = vmatprep.subr.bf16.mxu0 %v2115_v1 }
  0x5b   : > { %1797 = vmatpush3.bf16.msra.mxu1 %v2042_v56 }
  0x5c   : > { %1877 = vmatpush3.bf16.msra.mxu0 %v2043_v57  ;;  %1798 = vmatprep.subr.bf16.mxu1 %v2115_v1 }
  0x5d   : > { %1878 = vmatprep.subr.bf16.mxu0 %v2115_v1 }
  0x5f   : > { %1799 = vmatpush3.bf16.msra.mxu1 %v2044_v58 }
  0x60   : > { %1879 = vmatpush3.bf16.msra.mxu0 %v2045_v59  ;;  %1800 = vmatprep.subr.bf16.mxu1 %v2115_v1 }
  0x61   : > { %1880 = vmatprep.subr.bf16.mxu0 %v2115_v1 }
  0x63   : > { %1801 = vmatpush3.bf16.msra.mxu1 %v2046_v60 }
  0x64   : > { %1881 = vmatpush3.bf16.msra.mxu0 %v2047_v61  ;;  %1802 = vmatprep.subr.bf16.mxu1 %v2115_v1 }
  0x65   : > { %1882 = vmatprep.subr.bf16.mxu0 %v2115_v1 }
  0x67   : > { %1803 = vmatpush3.bf16.msra.mxu1 %v2048_v62 }
  0x68   : > { %1883 = vmatpush3.bf16.msra.mxu0 %v2049_v63  ;;  %1808 = vmatprep.subr.bf16.mxu1 %v2115_v1 }
  0x69   : > { %1888 = vmatprep.subr.bf16.mxu0 %v2115_v1 }
  0x6a   : > { %1805 = vmatmul.mubr.bf16.vlgmr.msra.gmra.mrb[0].mxu1 %v556_v0 }
  0x6b   : > { %1809 = vmatpush3.bf16.msra.mxu1 %v2050_v2  ;;  %1885 = vmatmul.mubr.bf16.vlgmr.msra.gmra.mrb[0].mxu0 %v982_v3 }
  0x6c   : > { %1889 = vmatpush3.bf16.msra.mxu0 %v2052_v4  ;;  %1810 = vmatprep.subr.bf16.mxu1 %v2115_v1 }
  0x6d   : > { %1890 = vmatprep.subr.bf16.mxu0 %v2115_v1  ;;  %1824 = vmatprep.mubr.msk.bf16.mxu1 %vm2116_vm0, %v2115_v1 }
  0x6e   : > { %1904 = vmatprep.mubr.msk.bf16.mxu0 %vm2116_vm0, %v2115_v1 }
  0x6f   : > { %1811 = vmatpush3.bf16.msra.mxu1 %v2053_v5 }
  0x70   : > { %1891 = vmatpush3.bf16.msra.mxu0 %v2054_v6  ;;  %1812 = vmatprep.subr.bf16.mxu1 %v2115_v1 }
  0x71   : > { %1892 = vmatprep.subr.bf16.mxu0 %v2115_v1 }
  0x73   : > { %1813 = vmatpush3.bf16.msra.mxu1 %v2055_v7 }
  0x74   : > { %1893 = vmatpush3.bf16.msra.mxu0 %v2056_v8  ;;  %1814 = vmatprep.subr.bf16.mxu1 %v2115_v1 }
  0x75   : > { %1894 = vmatprep.subr.bf16.mxu0 %v2115_v1 }
  0x77   : > { %1815 = vmatpush3.bf16.msra.mxu1 %v2057_v9 }
  0x78   : > { %1895 = vmatpush3.bf16.msra.mxu0 %v2058_v10  ;;  %1816 = vmatprep.subr.bf16.mxu1 %v2115_v1 }
  0x79   : > { %1896 = vmatprep.subr.bf16.mxu0 %v2115_v1 }
  0x7b   : > { %1817 = vmatpush3.bf16.msra.mxu1 %v2059_v11 }
  0x7c   : > { %1897 = vmatpush3.bf16.msra.mxu0 %v2060_v13  ;;  %1818 = vmatprep.subr.bf16.mxu1 %v2115_v1 }
  0x7d   : > { %1898 = vmatprep.subr.bf16.mxu0 %v2115_v1 }
  0x7f   : > { %1819 = vmatpush3.bf16.msra.mxu1 %v2061_v15 }
  0x80   : > { %1899 = vmatpush3.bf16.msra.mxu0 %v2062_v17  ;;  %1820 = vmatprep.subr.bf16.mxu1 %v2115_v1 }
  0x81   : > { %1900 = vmatprep.subr.bf16.mxu0 %v2115_v1 }
  0x83   : > { %1821 = vmatpush3.bf16.msra.mxu1 %v2063_v19 }
  0x84   : > { %1901 = vmatpush3.bf16.msra.mxu0 %v2064_v20  ;;  %1822 = vmatprep.subr.bf16.mxu1 %v2115_v1 }
  0x85   : > { %1902 = vmatprep.subr.bf16.mxu0 %v2115_v1 }
  0x87   : > { %1823 = vmatpush3.bf16.msra.mxu1 %v2065_v22 }
  0x88   : > { %1903 = vmatpush3.bf16.msra.mxu0 %v2066_v24 }
  0x89   : > { %1908 = vmatprep.subr.bf16.mxu0 %v2115_v1 }
  0x8a   : > { %1825 = vmatmul.mubr.bf16.vlgmr.msra.gmra.mrb[0].mxu1 %v2250_v16  ;;  %v2070_v16 = vld [vmem:[%s2551_s3 + $0x218] sm:$0xff]  }
  0x8b   : > { %1905 = vmatmul.mubr.bf16.vlgmr.msra.gmra.mrb[0].mxu0 %v1118_v25 }
  0x8c   : > { %1909 = vmatpush3.bf16.msra.mxu0 %v2067_v26  ;;  %1924 = vmatprep.mubr.msk.bf16.mxu0 %vm2116_vm0, %v2115_v1 }
  0x8d   : > { %1910 = vmatprep.subr.bf16.mxu0 %v2115_v1 }
  0x90   : > { %1911 = vmatpush3.bf16.msra.mxu0 %v2068_v27 }
  0x91   : > { %1912 = vmatprep.subr.bf16.mxu0 %v2115_v1 }
  0x94   : > { %1913 = vmatpush3.bf16.msra.mxu0 %v2069_v28 }
  0x95   : > { %1914 = vmatprep.subr.bf16.mxu0 %v2115_v1 }
  0x98   : > { %1915 = vmatpush3.bf16.msra.mxu0 %v2070_v16 }
  0x99   : > { %1916 = vmatprep.subr.bf16.mxu0 %v2115_v1 }
  0x9c   : > { %1917 = vmatpush3.bf16.msra.mxu0 %v2071_v29 }
  0x9d   : > { %1918 = vmatprep.subr.bf16.mxu0 %v2115_v1 }
  0xa0   : > { %1919 = vmatpush3.bf16.msra.mxu0 %v2072_v30 }
  0xa1   : > { %1920 = vmatprep.subr.bf16.mxu0 %v2115_v1 }
  0xa4   : > { %1921 = vmatpush3.bf16.msra.mxu0 %v2073_v31 }
  0xa5   : > { %1922 = vmatprep.subr.bf16.mxu0 %v2115_v1 }
  0xa8   : > { %1923 = vmatpush3.bf16.msra.mxu0 %v2074_v32 }
  0xab   : > { %1925 = vmatmul.mubr.bf16.vlgmr.msra.gmra.mrb[0].mxu0 %v1226_v33 }
 0x15d   : > { %v748_v34 = vpop.f32.mrb[0].mxu1 }
 0x15e   : > { %v1826_v35 = vpop.f32.mrb[1].mxu1 }
 0x15f   : > { %v751_v36 = vpop.f32.mrb[2].mxu1 }
 0x160   : > { %v1827_v37 = vpop.f32.mrb[3].mxu1 }
 0x17e   : > { %v1310_v38 = vpop.f32.mrb[0].mxu0 }
 0x17f   : > { %v1928_v39 = vadd.f32 %v1310_v38, %v748_v34  ;;  %v1926_v40 = vpop.f32.mrb[1].mxu0 }
 0x180   : > { %v1313_v1 = vpop.f32.mrb[2].mxu0 }
 0x181   : > { %1317 = vst [vmem:[%s313_s7] sm:$0xff] %v1928_v39  ;;  %v1927_v41 = vpop.f32.mrb[3].mxu0 }
 0x182 PF: > { %s14_s19 = sadd.s32 1, %s2113_s19   ;;  %s2553_s15 = smov %s2105_s17 }
 0x183   : > { %p11_p10 = scmp.ge.s32.totalorder %s14_s19, 18   ;;  %s2554_s16 = smov %s2109_s18 }
 0x184   : > { %s2555_s17 = smov %s2558_s20  ;;  %s2556_s18 = smov %s2562_s21 }
 0x185   :  { %13 = sbr.rel (!%p11_p10) target bundleno = 3 (0x3), region = 80 }

// kernel: network_block.19
= control target key start
LH: loop header
LB: loop body
LE: loop exit
PB: predicated region body
PF: predicated region fallthrough
CT: control target
= control target key end

     0   :  { %s2198_s18 = smov 0   ;;  %s2200_s19 = smov 0   ;;  %s2594_s0 = inlined_call_operand.vmem [shape: bf16[2,10,10,128], index: 0, kind: input, shape index: {}, may-alias: {0,1,2}]   ;;  %s2595_s1 = inlined_call_operand.vmem [shape: bf16[2,10,10,128], index: 1, kind: input, shape index: {}, may-alias: {0,1,2}]   ;;  %s2596_s2 = inlined_call_operand.vmem [shape: bf16[2,10,10,128], index: 2, kind: input, shape index: {}, may-alias: {0,1,2}]   ;;  %s2597_s3 = inlined_call_operand.vmem [shape: bf16[9,128,128], index: 3, kind: input, shape index: {}]   ;;  %s2598_s4 = inlined_call_operand.vmem [shape: f32[2,8,8,128], index: 4, kind: input, shape index: {}]   ;;  %s2599_s5 = inlined_call_operand.vmem [shape: f32[2,8,8,128], index: 5, kind: output, shape index: {}]  }
   0x1   :  { %s2202_s20 = smov 0   ;;  %s2204_s21 = smov 0  }
   0x2   :  { %s2206_s22 = smov 0  }
   0x3 LB: > { %s24_s23 = sadd.s32 1, %s2156_s20  ;;  %s27_s24 = sadd.s32 1, %s2160_s21  ;;  %s2164_s22 = sphi %s2206_s22, %s15_s22   ;;  %s2160_s21 = sphi %s2204_s21, %s2603_s21   ;;  %s2156_s20 = sphi %s2202_s20, %s2602_s20   ;;  %s2152_s19 = sphi %s2200_s19, %s2601_s19   ;;  %s2148_s18 = sphi %s2198_s18, %s2600_s18  }
   0x4   : > { %p25_p0 = scmp.ge.s32.totalorder %s24_s23, 8  ;;  %p1531_p1 = scmp.ge.s32.totalorder %s2164_s22, 1 }
   0x5   : > { %p262_p2 = scmp.lt.s32.totalorder %s2164_s22, 17 }
   0x6   : > { %s2605_s23 = smov (%p25_p0, %s24_s23), 0  ;;  %s2607_s24 = smov (!%p25_p0, %s27_s24), %s2160_s21 }
   0x7   : > { %p263_p3 = pnand %p1531_p1, %p262_p2  ;;  %p29_p4 = scmp.ge.s32.totalorder %s2607_s24, 2 }
   0x8   : > { %v2051_v0 = vld [vmem:[%s2597_s3 + $0x40] sm:$0xff] (!%p263_p3)   ;;  %v2166_v1 = vmov (!%p263_p3), 0.0   ;;  %v2053_v3 = vld [vmem:[%s2597_s3 + $0x48] sm:$0xff] (!%p263_p3)   ;;  %vm2167_vm0 = vmmov (!%p263_p3), 0   ;;  %p325_p5 = scmp.lt.s32.totalorder (!%p263_p3), %s2152_s19, 1  ;;  %p327_p6 = scmp.lt.s32.totalorder (!%p263_p3), %s2148_s18, 9 }
   0x9   : > { %s2609_s24 = smov (%p29_p4, %s2607_s24), 0  ;;  %266 = sbr.rel (%p263_p3) target bundleno = 387 (0x183), region = 40 }
   0xa   : > { %1828 = vmatprep.subr.bf16.mxu0 (!%p263_p3), %v2166_v1  ;;  %1848 = vmatprep.subr.bf16.mxu1 (!%p263_p3), %v2166_v1  ;;  %v2052_v2 = vld [vmem:[%s2597_s3] sm:$0xff] (!%p263_p3)   ;;  %v2054_v4 = vld [vmem:[%s2597_s3 + $0x8] sm:$0xff] (!%p263_p3)   ;;  %v2055_v5 = vld [vmem:[%s2597_s3 + $0x50] sm:$0xff] (!%p263_p3)   ;;  %s345_s29 = sadd.s32 (!%p263_p3), 2, %s2148_s18  ;;  %p358_p9 = scmp.lt.s32.totalorder (!%p263_p3), %s2148_s18, 7 }
   0xb   : > { %1829 = vmatpush3.bf16.msra.mxu0 (!%p263_p3), %v2051_v0  ;;  %1844 = vmatprep.mubr.msk.bf16.mxu0 (!%p263_p3), %vm2167_vm0, %v2166_v1  ;;  %v2056_v6 = vld [vmem:[%s2597_s3 + $0x10] sm:$0xff] (!%p263_p3)   ;;  %v2057_v7 = vld [vmem:[%s2597_s3 + $0x58] sm:$0xff] (!%p263_p3)   ;;  %v2059_v9 = vld [vmem:[%s2597_s3 + $0x60] sm:$0xff] (!%p263_p3)   ;;  %p348_p8 = scmp.lt.s32.totalorder (!%p263_p3), %s345_s29, 9 }
   0xc   : > { %1849 = vmatpush3.bf16.msra.mxu1 (!%p263_p3), %v2052_v2  ;;  %1830 = vmatprep.subr.bf16.mxu0 (!%p263_p3), %v2166_v1  ;;  %v2058_v8 = vld [vmem:[%s2597_s3 + $0x18] sm:$0xff] (!%p263_p3)   ;;  %v2060_v10 = vld [vmem:[%s2597_s3 + $0x20] sm:$0xff] (!%p263_p3)   ;;  %v2061_v14 = vld [vmem:[%s2597_s3 + $0x68] sm:$0xff] (!%p263_p3)  }
   0xd   : > { %1850 = vmatprep.subr.bf16.mxu1 (!%p263_p3), %v2166_v1  ;;  %1864 = vmatprep.mubr.msk.bf16.mxu1 (!%p263_p3), %vm2167_vm0, %v2166_v1  ;;  %v2062_v15 = vld [vmem:[%s2597_s3 + $0x28] sm:$0xff] (!%p263_p3)   ;;  %v2063_v17 = vld [vmem:[%s2597_s3 + $0x70] sm:$0xff] (!%p263_p3)   ;;  %v2065_v21 = vld [vmem:[%s2597_s3 + $0x78] sm:$0xff] (!%p263_p3)  }
   0xe   : > { %v2064_v18 = vld [vmem:[%s2597_s3 + $0x30] sm:$0xff] (!%p263_p3)   ;;  %v2066_v22 = vld [vmem:[%s2597_s3 + $0x38] sm:$0xff] (!%p263_p3)   ;;  %v2068_v24 = vld [vmem:[%s2597_s3 + $0x80] sm:$0xff] (!%p263_p3)  }
   0xf   : > { %1831 = vmatpush3.bf16.msra.mxu0 (!%p263_p3), %v2053_v3  ;;  %v2069_v25 = vld [vmem:[%s2597_s3 + $0xc0] sm:$0xff] (!%p263_p3)   ;;  %v2070_v26 = vld [vmem:[%s2597_s3 + $0x88] sm:$0xff] (!%p263_p3)   ;;  %v2072_v28 = vld [vmem:[%s2597_s3 + $0x90] sm:$0xff] (!%p263_p3)  }
  0x10   : > { %s2611_s19 = smov (!%p325_p5, %s2152_s19), 1  ;;  %1851 = vmatpush3.bf16.msra.mxu1 %v2054_v4  ;;  %1832 = vmatprep.subr.bf16.mxu0 %v2166_v1  ;;  %v2071_v27 = vld [vmem:[%s2597_s3 + $0xc8] sm:$0xff]   ;;  %v2073_v29 = vld [vmem:[%s2597_s3 + $0xd0] sm:$0xff]   ;;  %v2074_v30 = vld [vmem:[%s2597_s3 + $0x98] sm:$0xff]   ;;  %s2615_s29 = smov (!%p348_p8, %s345_s29), 9 }
  0x11   : > { %s328_s8 = scalar_select %p327_p6, %s2148_s18, 9  ;;  %1852 = vmatprep.subr.bf16.mxu1 %v2166_v1  ;;  %v2075_v31 = vld [vmem:[%s2597_s3 + $0xd8] sm:$0xff]   ;;  %v2076_v32 = vld [vmem:[%s2597_s3 + $0xa0] sm:$0xff]   ;;  %v2078_v34 = vld [vmem:[%s2597_s3 + $0xa8] sm:$0xff]  }
  0x12   : > { %s2262_s11 = smul.u32 20, %s2611_s19  ;;  %v2077_v33 = vld [vmem:[%s2597_s3 + $0xe0] sm:$0xff]   ;;  %v2079_v35 = vld [vmem:[%s2597_s3 + $0xe8] sm:$0xff]   ;;  %v2080_v36 = vld [vmem:[%s2597_s3 + $0xb0] sm:$0xff]   ;;  %s1536_s26 = sshll.u32 %s2615_s29, 1 }
  0x13   : > { %s1532_s14 = sshll.u32 %s328_s8, 1  ;;  %1833 = vmatpush3.bf16.msra.mxu0 %v2055_v5  ;;  %v2081_v37 = vld [vmem:[%s2597_s3 + $0xf0] sm:$0xff]   ;;  %v2082_v38 = vld [vmem:[%s2597_s3 + $0xb8] sm:$0xff]   ;;  %v2084_v41 = vld [vmem:[%s2597_s3 + $0x100] sm:$0xff]  }
  0x14   : > { %s331_s15 = sadd.s32 %s2262_s11, %s1532_s14  ;;  %1853 = vmatpush3.bf16.msra.mxu1 %v2056_v6  ;;  %1834 = vmatprep.subr.bf16.mxu0 %v2166_v1  ;;  %v2083_v39 = vld [vmem:[%s2597_s3 + $0xf8] sm:$0xff]   ;;  %v2086_v43 = vld [vmem:[%s2597_s3 + $0x140] sm:$0xff]   ;;  %v2087_v44 = vld [vmem:[%s2597_s3 + $0x108] sm:$0xff]   ;;  %s352_s28 = sadd.s32 %s2262_s11, %s1536_s26 }
  0x15   : > { %s1533_s25 = sshll.u32 %s331_s15, 2  ;;  %1854 = vmatprep.subr.bf16.mxu1 %v2166_v1  ;;  %v2088_v45 = vld [vmem:[%s2597_s3 + $0x148] sm:$0xff]   ;;  %v2089_v46 = vld [vmem:[%s2597_s3 + $0x110] sm:$0xff]   ;;  %v2091_v48 = vld [vmem:[%s2597_s3 + $0x118] sm:$0xff]   ;;  %s1537_s29 = sshll.u32 %s352_s28, 2 }
  0x16   : > { %s333_s30 = scalar_lea.vmem %s2594_s0, %s1533_s25  ;;  %s334_s25 = sadd.s32 1, %s2148_s18  ;;  %v2090_v47 = vld [vmem:[%s2597_s3 + $0x150] sm:$0xff]   ;;  %v2092_v49 = vld [vmem:[%s2597_s3 + $0x158] sm:$0xff]   ;;  %v2093_v51 = vld [vmem:[%s2597_s3 + $0x120] sm:$0xff]  }
  0x17   : > { %1835 = vmatpush3.bf16.msra.mxu0 %v2057_v7  ;;  %v373_v11 = vld [vmem:[%s333_s30] sm:$0xf]  ;;  %v374_v12 = vld [vmem:[%s333_s30 + $0x4] sm:$0x1]  ;;  %p337_p7 = scmp.lt.s32.totalorder %s334_s25, 9  ;;  %v2095_v54 = vld [vmem:[%s2597_s3 + $0x128] sm:$0xff]   ;;  %s354_s14 = scalar_lea.vmem %s2596_s2, %s1537_s29 }
  0x18   : > { %1855 = vmatpush3.bf16.msra.mxu1 %v2058_v8  ;;  %1836 = vmatprep.subr.bf16.mxu0 %v2166_v1  ;;  %v2289_v13 = vcombine.low %v373_v11, %v374_v12  ;;  %v2094_v52 = vld [vmem:[%s2597_s3 + $0x160] sm:$0xff]   ;;  %v2096_v55 = vld [vmem:[%s2597_s3 + $0x168] sm:$0xff]   ;;  %v2097_v57 = vld [vmem:[%s2597_s3 + $0x130] sm:$0xff]   ;;  %s2617_s18 = smov (!%p358_p9, %s2148_s18), 7 }
  0x19   : > { %1856 = vmatprep.subr.bf16.mxu1 %v2166_v1  ;;  %s2613_s25 = smov (!%p337_p7, %s334_s25), 9  ;;  %v2098_v58 = vld [vmem:[%s2597_s3 + $0x170] sm:$0xff]   ;;  %v2099_v61 = vld [vmem:[%s2597_s3 + $0x138] sm:$0xff]   ;;  %v2101_v0 = vld [vmem:[%s2597_s3 + $0x180] sm:$0xff]  }
  0x1a   : > { %v416_v16 = vshll.u32 %v2289_v13, 16  ;;  %v414_v19 = vshrl.u32 %v2289_v13, 16  ;;  %s1534_s12 = sshll.u32 %s2613_s25, 1  ;;  %v614_v40 = vrot.slane %v2289_v13, 1  ;;  %v2100_v62 = vld [vmem:[%s2597_s3 + $0x178] sm:$0xff]   ;;  %v2102_v3 = vld [vmem:[%s2597_s3 + $0x1c0] sm:$0xff]  }
  0x1b   : > { %1837 = vmatpush3.bf16.msra.mxu0 %v2059_v9  ;;  %s341_s15 = sadd.s32 %s2262_s11, %s1534_s12  ;;  %v2103_v4 = vld [vmem:[%s2597_s3 + $0x188] sm:$0xff]   ;;  %v2105_v6 = vld [vmem:[%s2597_s3 + $0x190] sm:$0xff]   ;;  %v2107_v8 = vld [vmem:[%s2597_s3 + $0x198] sm:$0xff]   ;;  %s1538_s11 = sshll.u32 %s2611_s19, 3 }
  0x1c   : > { %1857 = vmatpush3.bf16.msra.mxu1 %v2060_v10  ;;  %1838 = vmatprep.subr.bf16.mxu0 %v2166_v1  ;;  %v418_v20 = vrot.slane %v416_v16, 1  ;;  %s1535_s27 = sshll.u32 %s341_s15, 2  ;;  %v2104_v5 = vld [vmem:[%s2597_s3 + $0x1c8] sm:$0xff]   ;;  %v2106_v7 = vld [vmem:[%s2597_s3 + $0x1d0] sm:$0xff]   ;;  %v2108_v9 = vld [vmem:[%s2597_s3 + $0x1d8] sm:$0xff]   ;;  %s361_s12 = sadd.s32 %s1538_s11, %s2617_s18 }
  0x1d   : > { %1858 = vmatprep.subr.bf16.mxu1 %v2166_v1  ;;  %s2389_s9 = scalar_lea.vmem %s2595_s1, %s1535_s27  ;;  %v2109_v10 = vld [vmem:[%s2597_s3 + $0x1a0] sm:$0xff]   ;;  %v2112_v16 = vld [vmem:[%s2597_s3 + $0x1e8] sm:$0xff]   ;;  %s1539_s13 = sshll.u32 %s361_s12, 3 }
  0x1e   : > { %v419_v23 = vor.u32 %v418_v20, %v414_v19  ;;  %v705_v42 = vld [vmem:[%s2389_s9] sm:$0xf]  ;;  %v706_v50 = vld [vmem:[%s2389_s9 + $0x4] sm:$0x1]  ;;  %v2114_v19 = vld [vmem:[%s2597_s3 + $0x1f0] sm:$0xff]   ;;  %s363_s16 = scalar_lea.vmem %s2598_s4, %s1539_s13  ;;  %s371_s26 = scalar_lea.vmem %s2599_s5, %s1539_s13 }
  0x1f   : > { %1839 = vmatpush3.bf16.msra.mxu0 %v2061_v14  ;;  %v1639_v53 = vcombine.low %v705_v42, %v706_v50  ;;  %v1040_v12 = vld [vmem:[%s354_s14] sm:$0xf]  ;;  %v1041_v13 = vld [vmem:[%s354_s14 + $0x4] sm:$0x1]  ;;  %v2111_v14 = vld [vmem:[%s2597_s3 + $0x1a8] sm:$0xff]  }
  0x20   : > { %1859 = vmatpush3.bf16.msra.mxu1 %v2062_v15  ;;  %1840 = vmatprep.subr.bf16.mxu0 %v2166_v1  ;;  %v1712_v15 = vcombine.low %v1040_v12, %v1041_v13  ;;  %v2115_v20 = vld [vmem:[%s2597_s3 + $0x1b8] sm:$0xff]  }
  0x21   : > { %1860 = vmatprep.subr.bf16.mxu1 %v2166_v1  ;;  %v838_v56 = vshll.u32 %v1639_v53, 16  ;;  %v836_v59 = vshrl.u32 %v1639_v53, 16  ;;  %v949_v2 = vrot.slane %v1639_v53, 1 }
  0x23   : > { %1841 = vmatpush3.bf16.msra.mxu0 %v2063_v17  ;;  %v840_v60 = vrot.slane %v838_v56, 1  ;;  %v2113_v17 = vld [vmem:[%s2597_s3 + $0x1b0] sm:$0xff]  }
  0x24   : > { %1861 = vmatpush3.bf16.msra.mxu1 %v2064_v18  ;;  %1842 = vmatprep.subr.bf16.mxu0 %v2166_v1  ;;  %v1173_v18 = vshll.u32 %v1712_v15, 16 }
  0x25   : > { %1862 = vmatprep.subr.bf16.mxu1 %v2166_v1  ;;  %v841_v63 = vor.u32 %v840_v60, %v836_v59 }
  0x27   : > { %1843 = vmatpush3.bf16.msra.mxu0 %v2065_v21  ;;  %v1171_v21 = vshrl.u32 %v1712_v15, 16 }
  0x28   : > { %1863 = vmatpush3.bf16.msra.mxu1 %v2066_v22  ;;  %1868 = vmatprep.subr.bf16.mxu0 %v2166_v1  ;;  %v1175_v22 = vrot.slane %v1173_v18, 1 }
  0x29   : > { %1888 = vmatprep.subr.bf16.mxu1 %v2166_v1 }
  0x2a   : > { %1845 = vmatmul.mubr.bf16.vlgmr.msra.gmra.mrb[0].mxu0 %v419_v23  ;;  %v2116_v23 = vld [vmem:[%s2597_s3 + $0x1f8] sm:$0xff]  }
  0x2b   : > { %1865 = vmatmul.mubr.bf16.vlgmr.msra.gmra.mrb[0].mxu1 %v373_v11  ;;  %1869 = vmatpush3.bf16.msra.mxu0 %v2068_v24  ;;  %v2110_v11 = vld [vmem:[%s2597_s3 + $0x1e0] sm:$0xff]  }
  0x2c   : > { %1889 = vmatpush3.bf16.msra.mxu1 %v2069_v25  ;;  %1870 = vmatprep.subr.bf16.mxu0 %v2166_v1  ;;  %v2118_v24 = vld [vmem:[%s2597_s3 + $0x200] sm:$0xff]   ;;  %v1176_v25 = vor.u32 %v1175_v22, %v1171_v21 }
  0x2d   : > { %1890 = vmatprep.subr.bf16.mxu1 %v2166_v1  ;;  %1884 = vmatprep.mubr.msk.bf16.mxu0 %vm2167_vm0, %v2166_v1 }
  0x2e   : > { %1904 = vmatprep.mubr.msk.bf16.mxu1 %vm2167_vm0, %v2166_v1 }
  0x2f   : > { %1871 = vmatpush3.bf16.msra.mxu0 %v2070_v26  ;;  %v2119_v26 = vld [vmem:[%s2597_s3 + $0x208] sm:$0xff]  }
  0x30   : > { %1891 = vmatpush3.bf16.msra.mxu1 %v2071_v27  ;;  %1872 = vmatprep.subr.bf16.mxu0 %v2166_v1  ;;  %v2120_v27 = vld [vmem:[%s2597_s3 + $0x210] sm:$0xff]  }
  0x31   : > { %1892 = vmatprep.subr.bf16.mxu1 %v2166_v1 }
  0x33   : > { %1873 = vmatpush3.bf16.msra.mxu0 %v2072_v28  ;;  %v2121_v28 = vld [vmem:[%s2597_s3 + $0x218] sm:$0xff]  }
  0x34   : > { %1893 = vmatpush3.bf16.msra.mxu1 %v2073_v29  ;;  %1874 = vmatprep.subr.bf16.mxu0 %v2166_v1  ;;  %v2122_v29 = vld [vmem:[%s2597_s3 + $0x220] sm:$0xff]  }
  0x35   : > { %1894 = vmatprep.subr.bf16.mxu1 %v2166_v1 }
  0x37   : > { %1875 = vmatpush3.bf16.msra.mxu0 %v2074_v30  ;;  %v2123_v30 = vld [vmem:[%s2597_s3 + $0x228] sm:$0xff]  }
  0x38   : > { %1895 = vmatpush3.bf16.msra.mxu1 %v2075_v31  ;;  %1876 = vmatprep.subr.bf16.mxu0 %v2166_v1  ;;  %v2124_v31 = vld [vmem:[%s2597_s3 + $0x230] sm:$0xff]  }
  0x39   : > { %1896 = vmatprep.subr.bf16.mxu1 %v2166_v1 }
  0x3b   : > { %1877 = vmatpush3.bf16.msra.mxu0 %v2076_v32  ;;  %v2125_v32 = vld [vmem:[%s2597_s3 + $0x238] sm:$0xff]  }
  0x3c   : > { %1897 = vmatpush3.bf16.msra.mxu1 %v2077_v33  ;;  %1878 = vmatprep.subr.bf16.mxu0 %v2166_v1  ;;  %v1284_v33 = vrot.slane %v1712_v15, 1 }
  0x3d   : > { %1898 = vmatprep.subr.bf16.mxu1 %v2166_v1 }
  0x3f   : > { %1879 = vmatpush3.bf16.msra.mxu0 %v2078_v34 }
  0x40   : > { %1899 = vmatpush3.bf16.msra.mxu1 %v2079_v35  ;;  %1880 = vmatprep.subr.bf16.mxu0 %v2166_v1 }
  0x41   : > { %1900 = vmatprep.subr.bf16.mxu1 %v2166_v1 }
  0x43   : > { %1881 = vmatpush3.bf16.msra.mxu0 %v2080_v36 }
  0x44   : > { %1901 = vmatpush3.bf16.msra.mxu1 %v2081_v37  ;;  %1882 = vmatprep.subr.bf16.mxu0 %v2166_v1 }
  0x45   : > { %1902 = vmatprep.subr.bf16.mxu1 %v2166_v1 }
  0x47   : > { %1883 = vmatpush3.bf16.msra.mxu0 %v2082_v38 }
  0x48   : > { %1903 = vmatpush3.bf16.msra.mxu1 %v2083_v39  ;;  %1908 = vmatprep.subr.bf16.mxu0 %v2166_v1 }
  0x49   : > { %1928 = vmatprep.subr.bf16.mxu1 %v2166_v1 }
  0x4a   : > { %1885 = vmatmul.mubr.bf16.vlgmr.msra.gmra.mrb[4].mxu0 %v614_v40 }
  0x4b   : > { %1909 = vmatpush3.bf16.msra.mxu0 %v2084_v41  ;;  %1905 = vmatmul.mubr.bf16.vlgmr.msra.gmra.mrb[4].mxu1 %v705_v42 }
  0x4c   : > { %1929 = vmatpush3.bf16.msra.mxu1 %v2086_v43  ;;  %1910 = vmatprep.subr.bf16.mxu0 %v2166_v1 }
  0x4d   : > { %1930 = vmatprep.subr.bf16.mxu1 %v2166_v1  ;;  %1924 = vmatprep.mubr.msk.bf16.mxu0 %vm2167_vm0, %v2166_v1 }
  0x4e   : > { %1944 = vmatprep.mubr.msk.bf16.mxu1 %vm2167_vm0, %v2166_v1 }
  0x4f   : > { %1911 = vmatpush3.bf16.msra.mxu0 %v2087_v44 }
  0x50   : > { %1931 = vmatpush3.bf16.msra.mxu1 %v2088_v45  ;;  %1912 = vmatprep.subr.bf16.mxu0 %v2166_v1 }
  0x51   : > { %1932 = vmatprep.subr.bf16.mxu1 %v2166_v1 }
  0x53   : > { %1913 = vmatpush3.bf16.msra.mxu0 %v2089_v46 }
  0x54   : > { %1933 = vmatpush3.bf16.msra.mxu1 %v2090_v47  ;;  %1914 = vmatprep.subr.bf16.mxu0 %v2166_v1 }
  0x55   : > { %1934 = vmatprep.subr.bf16.mxu1 %v2166_v1 }
  0x57   : > { %1915 = vmatpush3.bf16.msra.mxu0 %v2091_v48 }
  0x58   : > { %1935 = vmatpush3.bf16.msra.mxu1 %v2092_v49  ;;  %1916 = vmatprep.subr.bf16.mxu0 %v2166_v1 }
  0x59   : > { %1936 = vmatprep.subr.bf16.mxu1 %v2166_v1 }
  0x5b   : > { %1917 = vmatpush3.bf16.msra.mxu0 %v2093_v51 }
  0x5c   : > { %1937 = vmatpush3.bf16.msra.mxu1 %v2094_v52  ;;  %1918 = vmatprep.subr.bf16.mxu0 %v2166_v1 }
  0x5d   : > { %1938 = vmatprep.subr.bf16.mxu1 %v2166_v1 }
  0x5f   : > { %1919 = vmatpush3.bf16.msra.mxu0 %v2095_v54 }
  0x60   : > { %1939 = vmatpush3.bf16.msra.mxu1 %v2096_v55  ;;  %1920 = vmatprep.subr.bf16.mxu0 %v2166_v1 }
  0x61   : > { %1940 = vmatprep.subr.bf16.mxu1 %v2166_v1 }
  0x63   : > { %1921 = vmatpush3.bf16.msra.mxu0 %v2097_v57 }
  0x64   : > { %1941 = vmatpush3.bf16.msra.mxu1 %v2098_v58  ;;  %1922 = vmatprep.subr.bf16.mxu0 %v2166_v1 }
  0x65   : > { %1942 = vmatprep.subr.bf16.mxu1 %v2166_v1 }
  0x67   : > { %1923 = vmatpush3.bf16.msra.mxu0 %v2099_v61 }
  0x68   : > { %1943 = vmatpush3.bf16.msra.mxu1 %v2100_v62  ;;  %1948 = vmatprep.subr.bf16.mxu0 %v2166_v1 }
  0x69   : > { %1968 = vmatprep.subr.bf16.mxu1 %v2166_v1 }
  0x6a   : > { %1925 = vmatmul.mubr.bf16.vlgmr.msra.gmra.mrb[8].mxu0 %v841_v63 }
  0x6b   : > { %1949 = vmatpush3.bf16.msra.mxu0 %v2101_v0  ;;  %1945 = vmatmul.mubr.bf16.vlgmr.msra.gmra.mrb[8].mxu1 %v949_v2 }
  0x6c   : > { %1969 = vmatpush3.bf16.msra.mxu1 %v2102_v3  ;;  %1950 = vmatprep.subr.bf16.mxu0 %v2166_v1 }
  0x6d   : > { %1970 = vmatprep.subr.bf16.mxu1 %v2166_v1  ;;  %1964 = vmatprep.mubr.msk.bf16.mxu0 %vm2167_vm0, %v2166_v1 }
  0x6e   : > { %1984 = vmatprep.mubr.msk.bf16.mxu1 %vm2167_vm0, %v2166_v1 }
  0x6f   : > { %1951 = vmatpush3.bf16.msra.mxu0 %v2103_v4 }
  0x70   : > { %1971 = vmatpush3.bf16.msra.mxu1 %v2104_v5  ;;  %1952 = vmatprep.subr.bf16.mxu0 %v2166_v1 }
  0x71   : > { %1972 = vmatprep.subr.bf16.mxu1 %v2166_v1 }
  0x73   : > { %1953 = vmatpush3.bf16.msra.mxu0 %v2105_v6 }
  0x74   : > { %1973 = vmatpush3.bf16.msra.mxu1 %v2106_v7  ;;  %1954 = vmatprep.subr.bf16.mxu0 %v2166_v1 }
  0x75   : > { %1974 = vmatprep.subr.bf16.mxu1 %v2166_v1 }
  0x77   : > { %1955 = vmatpush3.bf16.msra.mxu0 %v2107_v8 }
  0x78   : > { %1975 = vmatpush3.bf16.msra.mxu1 %v2108_v9  ;;  %1956 = vmatprep.subr.bf16.mxu0 %v2166_v1 }
  0x79   : > { %1976 = vmatprep.subr.bf16.mxu1 %v2166_v1 }
  0x7b   : > { %1957 = vmatpush3.bf16.msra.mxu0 %v2109_v10  ;;  %v1375_v10 = vld [vmem:[%s363_s16] sm:$0xff] }
  0x7c   : > { %1977 = vmatpush3.bf16.msra.mxu1 %v2110_v11  ;;  %1958 = vmatprep.subr.bf16.mxu0 %v2166_v1 }
  0x7d   : > { %1978 = vmatprep.subr.bf16.mxu1 %v2166_v1 }
  0x7f   : > { %1959 = vmatpush3.bf16.msra.mxu0 %v2111_v14 }
  0x80   : > { %1979 = vmatpush3.bf16.msra.mxu1 %v2112_v16  ;;  %1960 = vmatprep.subr.bf16.mxu0 %v2166_v1 }
  0x81   : > { %1980 = vmatprep.subr.bf16.mxu1 %v2166_v1 }
  0x83   : > { %1961 = vmatpush3.bf16.msra.mxu0 %v2113_v17 }
  0x84   : > { %1981 = vmatpush3.bf16.msra.mxu1 %v2114_v19  ;;  %1962 = vmatprep.subr.bf16.mxu0 %v2166_v1 }
  0x85   : > { %1982 = vmatprep.subr.bf16.mxu1 %v2166_v1 }
  0x87   : > { %1963 = vmatpush3.bf16.msra.mxu0 %v2115_v20 }
  0x88   : > { %1983 = vmatpush3.bf16.msra.mxu1 %v2116_v23  ;;  %1988 = vmatprep.subr.bf16.mxu0 %v2166_v1 }
  0x8a   : > { %1965 = vmatmul.mubr.bf16.vlgmr.msra.gmra.mrb[12].mxu0 %v1040_v12 }
  0x8b   : > { %1989 = vmatpush3.bf16.msra.mxu0 %v2118_v24  ;;  %1985 = vmatmul.mubr.bf16.vlgmr.msra.gmra.mrb[12].mxu1 %v1176_v25 }
  0x8c   : > { %1990 = vmatprep.subr.bf16.mxu0 %v2166_v1  ;;  %2004 = vmatprep.mubr.msk.bf16.mxu0 %vm2167_vm0, %v2166_v1 }
  0x8f   : > { %1991 = vmatpush3.bf16.msra.mxu0 %v2119_v26 }
  0x90   : > { %1992 = vmatprep.subr.bf16.mxu0 %v2166_v1 }
  0x93   : > { %1993 = vmatpush3.bf16.msra.mxu0 %v2120_v27 }
  0x94   : > { %1994 = vmatprep.subr.bf16.mxu0 %v2166_v1 }
  0x97   : > { %1995 = vmatpush3.bf16.msra.mxu0 %v2121_v28 }
  0x98   : > { %1996 = vmatprep.subr.bf16.mxu0 %v2166_v1 }
  0x9b   : > { %1997 = vmatpush3.bf16.msra.mxu0 %v2122_v29 }
  0x9c   : > { %1998 = vmatprep.subr.bf16.mxu0 %v2166_v1 }
  0x9f   : > { %1999 = vmatpush3.bf16.msra.mxu0 %v2123_v30 }
  0xa0   : > { %2000 = vmatprep.subr.bf16.mxu0 %v2166_v1 }
  0xa3   : > { %2001 = vmatpush3.bf16.msra.mxu0 %v2124_v31 }
  0xa4   : > { %2002 = vmatprep.subr.bf16.mxu0 %v2166_v1 }
  0xa7   : > { %2003 = vmatpush3.bf16.msra.mxu0 %v2125_v32 }
  0xaa   : > { %2005 = vmatmul.mubr.bf16.vlgmr.msra.gmra.mrb[16].mxu0 %v1284_v33 }
  0xfd   : > { %v503_v34 = vpop.f32.mrb[0].mxu0 }
  0xfe   : > { %v1846_v35 = vpop.f32.mrb[1].mxu0  ;;  %v591_v36 = vpop.f32.mrb[0].mxu1 }
  0xff   : > { %v592_v37 = vadd.f32 %v591_v36, %v503_v34  ;;  %v506_v38 = vpop.f32.mrb[2].mxu0  ;;  %v1866_v39 = vpop.f32.mrb[1].mxu1 }
 0x100   : > { %v1847_v40 = vpop.f32.mrb[3].mxu0  ;;  %v594_v41 = vpop.f32.mrb[2].mxu1 }
 0x101   : > { %v1867_v42 = vpop.f32.mrb[3].mxu1 }
 0x11d   : > { %v698_v43 = vpop.f32.mrb[4].mxu0 }
 0x11e   : > { %v704_v44 = vadd.f32 %v698_v43, %v592_v37  ;;  %v1886_v45 = vpop.f32.mrb[5].mxu0  ;;  %v806_v46 = vpop.f32.mrb[4].mxu1 }
 0x11f   : > { %v701_v47 = vpop.f32.mrb[6].mxu0  ;;  %v1906_v48 = vpop.f32.mrb[5].mxu1 }
 0x120   : > { %v812_v49 = vadd.f32 %v806_v46, %v704_v44  ;;  %v1887_v1 = vpop.f32.mrb[7].mxu0  ;;  %v809_v50 = vpop.f32.mrb[6].mxu1 }
 0x121   : > { %v1907_v51 = vpop.f32.mrb[7].mxu1 }
 0x13d   : > { %v925_v52 = vpop.f32.mrb[8].mxu0 }
 0x13e   : > { %v931_v53 = vadd.f32 %v925_v52, %v812_v49  ;;  %v1926_v54 = vpop.f32.mrb[9].mxu0  ;;  %v1033_v55 = vpop.f32.mrb[8].mxu1 }
 0x13f   : > { %v928_v56 = vpop.f32.mrb[10].mxu0  ;;  %v1946_v57 = vpop.f32.mrb[9].mxu1 }
 0x140   : > { %v1039_v58 = vadd.f32 %v1033_v55, %v931_v53  ;;  %v1927_v59 = vpop.f32.mrb[11].mxu0  ;;  %v1036_v60 = vpop.f32.mrb[10].mxu1 }
 0x141   : > { %v1947_v61 = vpop.f32.mrb[11].mxu1 }
 0x15d   : > { %v1141_v62 = vpop.f32.mrb[12].mxu0 }
 0x15e   : > { %v1147_v63 = vadd.f32 %v1141_v62, %v1039_v58  ;;  %v1966_v0 = vpop.f32.mrb[13].mxu0  ;;  %v1260_v2 = vpop.f32.mrb[12].mxu1 }
 0x15f   : > { %v1144_v3 = vpop.f32.mrb[14].mxu0  ;;  %v1986_v4 = vpop.f32.mrb[13].mxu1 }
 0x160   : > { %v1266_v5 = vadd.f32 %v1260_v2, %v1147_v63  ;;  %v1967_v6 = vpop.f32.mrb[15].mxu0  ;;  %v1263_v7 = vpop.f32.mrb[14].mxu1 }
 0x161   : > { %v1987_v8 = vpop.f32.mrb[15].mxu1 }
 0x17d   : > { %v1368_v9 = vpop.f32.mrb[16].mxu0 }
 0x17e   : > { %v1374_v11 = vadd.f32 %v1368_v9, %v1266_v5  ;;  %v2006_v12 = vpop.f32.mrb[17].mxu0 }
 0x17f   : > { %v1371_v13 = vpop.f32.mrb[18].mxu0 }
 0x180   : > { %v1376_v14 = vadd.f32 %v1375_v10, %v1374_v11  ;;  %v2007_v15 = vpop.f32.mrb[19].mxu0 }
 0x182   : > { %1377 = vst [vmem:[%s371_s26] sm:$0xff] %v1376_v14 }
 0x183 PF: > { %s15_s22 = sadd.s32 1, %s2164_s22   ;;  %s2600_s18 = smov %s2156_s20 }
 0x184   : > { %p12_p10 = scmp.ge.s32.totalorder %s15_s22, 18   ;;  %s2601_s19 = smov %s2160_s21 }
 0x185   : > { %s2602_s20 = smov %s2605_s23  ;;  %s2603_s21 = smov %s2609_s24 }
 0x186   :  { %14 = sbr.rel (!%p12_p10) target bundleno = 3 (0x3), region = 87 }

// kernel: network_block.25
= control target key start
LH: loop header
LB: loop body
LE: loop exit
PB: predicated region body
PF: predicated region fallthrough
CT: control target
= control target key end

     0   :  { %s2762_s0 = inlined_call_operand.vmem [shape: bf16[2,10,10,128], index: 0, kind: input, shape index: {}, may-alias: {0,1,2}]   ;;  %s2763_s1 = inlined_call_operand.vmem [shape: bf16[2,10,10,128], index: 1, kind: input, shape index: {}, may-alias: {0,1,2}]   ;;  %s2764_s2 = inlined_call_operand.vmem [shape: bf16[2,10,10,128], index: 2, kind: input, shape index: {}, may-alias: {0,1,2}]   ;;  %s2765_s3 = inlined_call_operand.vmem [shape: bf16[9,128,128], index: 3, kind: input, shape index: {}]   ;;  %s2766_s4 = inlined_call_operand.vmem [shape: f32[2,8,8,128], index: 4, kind: input, shape index: {}]   ;;  %s2767_s5 = inlined_call_operand.hbm [shape: f32[2,8,8,128], index: 5, kind: output, shape index: {}]  }
   0x1   :  { %2769 = sst [smem:[#allocation6_spill]] %s2762_s0 }
   0x2   :  { %2770 = sst [smem:[#allocation7_spill]] %s2763_s1 }
   0x3   :  { %10 = vsyncpa [#allocation3], 0 }
   0x4   :  { %12 = vsyncpa [#allocation3 + $0x1], 0  ;;  %s2288_s18 = smov 0   ;;  %s2290_s19 = smov 0  }
   0x5   :  { %s2292_s20 = smov 0   ;;  %s2294_s21 = smov 0  }
   0x6   :  { %s2296_s22 = smov 0   ;;  %s2298_s23 = smov 0  }
   0x7   :  { %s2300_s24 = smov 0   ;;  %s2302_s25 = smov 0  }
   0x8 LB: > { %s1527_s26 = sadd.s32 4294967295, %s2253_s25   ;;  %s1528_s27 = sadd.s32 4294967294, %s2253_s25   ;;  %s2253_s25 = sphi %s2302_s25, %s18_s25   ;;  %s2249_s24 = sphi %s2300_s24, %s2783_s24   ;;  %s2245_s23 = sphi %s2298_s23, %s2782_s23   ;;  %s2241_s22 = sphi %s2296_s22, %s2781_s22   ;;  %s2237_s21 = sphi %s2294_s21, %s2780_s21   ;;  %s2233_s20 = sphi %s2292_s20, %s2779_s20   ;;  %s2229_s19 = sphi %s2290_s19, %s2778_s19   ;;  %s2225_s18 = sphi %s2288_s18, %s2777_s18  }
   0x9   : > { %s27_s28 = sadd.s32 1, %s2245_s23  ;;  %s30_s29 = sadd.s32 1, %s2249_s24 }
   0xa   : > { %p28_p0 = scmp.ge.s32.totalorder %s27_s28, 8  ;;  %p186_p1 = scmp.ne.s32.totalorder %s2233_s20, %s2229_s19 }
   0xb   : > { %p187_p2 = scmp.eq.s32.totalorder %s1527_s26, 15  ;;  %p192_p5 = scmp.ne.s32.totalorder %s2229_s19, %s2225_s18 }
   0xc   : > { %s2785_s28 = smov (%p28_p0, %s27_s28), 0  ;;  %s2787_s29 = smov (!%p28_p0, %s30_s29), %s2249_s24 }
   0xd   : > { %s172_s30 = ssub.s32 %s2245_s23, %s2785_s28  ;;  %p2339_p3 = por %p187_p2, %p186_p1 }
   0xe   : > { %p32_p4 = scmp.ge.s32.totalorder %s2787_s29, 2  ;;  %p193_p6 = scmp.eq.s32.totalorder %s1528_s27, 15 }
   0xf   : > { %p1531_p7 = scmp.ge.s32.totalorder %s2253_s25, 1  ;;  %p265_p9 = scmp.lt.s32.totalorder %s2253_s25, 17 }
  0x10   : > { %s2789_s29 = smov (%p32_p4, %s2787_s29), 0  ;;  %p2348_p8 = por %p193_p6, %p192_p5 }
  0x11   : > { %2772 = sst [smem:[#allocation5_spill]] %s2789_s29  ;;  %s171_s8 = ssub.s32 %s2249_s24, %s2789_s29 }
  0x12   : > { %s176_s9 = sadd.s32 1, %s2233_s20  ;;  %s173_s10 = sor.u32 %s172_s30, %s171_s8 }
  0x13   : > { %p266_p10 = pnand %p1531_p7, %p265_p9  ;;  %p174_p11 = scmp.eq.s32.totalorder %s173_s10, 0 }
  0x14   : > { %v2084_v0 = vld [vmem:[%s2765_s3 + $0x40] sm:$0xff] (!%p266_p10)   ;;  %v2255_v1 = vmov (!%p266_p10), 0.0   ;;  %v2086_v3 = vld [vmem:[%s2765_s3 + $0x48] sm:$0xff] (!%p266_p10)   ;;  %vm2256_vm0 = vmmov (!%p266_p10), 0   ;;  %p325_p12 = scmp.lt.s32.totalorder (!%p266_p10), %s2241_s22, 1  ;;  %p327_p13 = scmp.lt.s32.totalorder (!%p266_p10), %s2237_s21, 9 }
  0x15   : > { %s2357_s11 = scalar_select %p174_p11, %s2233_s20, %s176_s9  }
  0x16   : > { %269 = sbr.rel (%p266_p10) target bundleno = 412 (0x19c), region = 40  ;;  %1830 = vmatprep.subr.bf16.mxu0 (!%p266_p10), %v2255_v1  ;;  %1850 = vmatprep.subr.bf16.mxu1 (!%p266_p10), %v2255_v1  ;;  %v2085_v2 = vld [vmem:[%s2765_s3] sm:$0xff] (!%p266_p10)   ;;  %v2087_v4 = vld [vmem:[%s2765_s3 + $0x8] sm:$0xff] (!%p266_p10)   ;;  %v2088_v5 = vld [vmem:[%s2765_s3 + $0x50] sm:$0xff] (!%p266_p10)   ;;  %s2774_s0 = sld [smem:[#allocation6_spill]] (!%p266_p10) }
  0x17   : > { %1831 = vmatpush3.bf16.msra.mxu0 (!%p266_p10), %v2084_v0  ;;  %1846 = vmatprep.mubr.msk.bf16.mxu0 (!%p266_p10), %vm2256_vm0, %v2255_v1  ;;  %v2089_v6 = vld [vmem:[%s2765_s3 + $0x10] sm:$0xff] (!%p266_p10)   ;;  %v2090_v7 = vld [vmem:[%s2765_s3 + $0x58] sm:$0xff] (!%p266_p10)   ;;  %v2092_v9 = vld [vmem:[%s2765_s3 + $0x60] sm:$0xff] (!%p266_p10)   ;;  %s334_s29 = sadd.s32 (!%p266_p10), 1, %s2237_s21  ;;  %s2775_s1 = sld [smem:[#allocation7_spill]] (!%p266_p10) }
  0x18   : > { %1851 = vmatpush3.bf16.msra.mxu1 (!%p266_p10), %v2085_v2  ;;  %1832 = vmatprep.subr.bf16.mxu0 (!%p266_p10), %v2255_v1  ;;  %v2091_v8 = vld [vmem:[%s2765_s3 + $0x18] sm:$0xff] (!%p266_p10)   ;;  %v2093_v10 = vld [vmem:[%s2765_s3 + $0x20] sm:$0xff] (!%p266_p10)   ;;  %v2094_v14 = vld [vmem:[%s2765_s3 + $0x68] sm:$0xff] (!%p266_p10)   ;;  %p337_p0 = scmp.lt.s32.totalorder (!%p266_p10), %s334_s29, 9  ;;  %s345_s10 = sadd.s32 (!%p266_p10), 2, %s2237_s21 }
  0x19   : > { %1852 = vmatprep.subr.bf16.mxu1 (!%p266_p10), %v2255_v1  ;;  %1866 = vmatprep.mubr.msk.bf16.mxu1 (!%p266_p10), %vm2256_vm0, %v2255_v1  ;;  %v2095_v15 = vld [vmem:[%s2765_s3 + $0x28] sm:$0xff] (!%p266_p10)   ;;  %v2096_v17 = vld [vmem:[%s2765_s3 + $0x70] sm:$0xff] (!%p266_p10)   ;;  %v2098_v21 = vld [vmem:[%s2765_s3 + $0x78] sm:$0xff] (!%p266_p10)   ;;  %p348_p1 = scmp.lt.s32.totalorder (!%p266_p10), %s345_s10, 9  ;;  %p358_p2 = scmp.lt.s32.totalorder (!%p266_p10), %s2237_s21, 7 }
  0x1a   : > { %v2097_v18 = vld [vmem:[%s2765_s3 + $0x30] sm:$0xff] (!%p266_p10)   ;;  %v2099_v22 = vld [vmem:[%s2765_s3 + $0x38] sm:$0xff] (!%p266_p10)   ;;  %v2101_v24 = vld [vmem:[%s2765_s3 + $0x80] sm:$0xff] (!%p266_p10)   ;;  %s1745_s26 = sshll.u32 (!%p266_p10), %s2241_s22, 3 }
  0x1b   : > { %1833 = vmatpush3.bf16.msra.mxu0 (!%p266_p10), %v2086_v3  ;;  %v2102_v25 = vld [vmem:[%s2765_s3 + $0xc0] sm:$0xff] (!%p266_p10)   ;;  %v2103_v26 = vld [vmem:[%s2765_s3 + $0x88] sm:$0xff] (!%p266_p10)   ;;  %v2105_v28 = vld [vmem:[%s2765_s3 + $0x90] sm:$0xff] (!%p266_p10)  }
  0x1c   : > { %1853 = vmatpush3.bf16.msra.mxu1 (!%p266_p10), %v2087_v4  ;;  %1834 = vmatprep.subr.bf16.mxu0 (!%p266_p10), %v2255_v1  ;;  %v2104_v27 = vld [vmem:[%s2765_s3 + $0xc8] sm:$0xff] (!%p266_p10)   ;;  %v2106_v29 = vld [vmem:[%s2765_s3 + $0xd0] sm:$0xff] (!%p266_p10)   ;;  %v2107_v30 = vld [vmem:[%s2765_s3 + $0x98] sm:$0xff] (!%p266_p10)  }
  0x1d   : > { %s2380_s30 = scalar_select %p325_p12, %s2241_s22, 1  ;;  %1854 = vmatprep.subr.bf16.mxu1 %v2255_v1  ;;  %v2108_v31 = vld [vmem:[%s2765_s3 + $0xd8] sm:$0xff]   ;;  %v2109_v32 = vld [vmem:[%s2765_s3 + $0xa0] sm:$0xff]   ;;  %v2111_v34 = vld [vmem:[%s2765_s3 + $0xa8] sm:$0xff]  }
  0x1e   : > { %s328_s8 = scalar_select %p327_p13, %s2237_s21, 9  ;;  %v2110_v33 = vld [vmem:[%s2765_s3 + $0xe0] sm:$0xff]   ;;  %v2112_v35 = vld [vmem:[%s2765_s3 + $0xe8] sm:$0xff]   ;;  %v2113_v36 = vld [vmem:[%s2765_s3 + $0xb0] sm:$0xff]  }
  0x1f   : > { %s2389_s12 = smul.u32 20, %s2380_s30  ;;  %1835 = vmatpush3.bf16.msra.mxu0 %v2088_v5  ;;  %s2791_s29 = smov (!%p337_p0, %s334_s29), 9  ;;  %v2114_v37 = vld [vmem:[%s2765_s3 + $0xf0] sm:$0xff]   ;;  %v2115_v38 = vld [vmem:[%s2765_s3 + $0xb8] sm:$0xff]   ;;  %v2117_v41 = vld [vmem:[%s2765_s3 + $0x100] sm:$0xff]  }
  0x20   : > { %s1533_s15 = sshll.u32 %s328_s8, 1  ;;  %1855 = vmatpush3.bf16.msra.mxu1 %v2089_v6  ;;  %1836 = vmatprep.subr.bf16.mxu0 %v2255_v1  ;;  %s1535_s9 = sshll.u32 %s2791_s29, 1  ;;  %v2116_v39 = vld [vmem:[%s2765_s3 + $0xf8] sm:$0xff]   ;;  %v2119_v43 = vld [vmem:[%s2765_s3 + $0x140] sm:$0xff]   ;;  %v2120_v44 = vld [vmem:[%s2765_s3 + $0x108] sm:$0xff]  }
  0x21   : > { %s331_s16 = sadd.s32 %s2389_s12, %s1533_s15  ;;  %1856 = vmatprep.subr.bf16.mxu1 %v2255_v1  ;;  %s341_s8 = sadd.s32 %s2389_s12, %s1535_s9  ;;  %v2121_v45 = vld [vmem:[%s2765_s3 + $0x148] sm:$0xff]   ;;  %v2122_v46 = vld [vmem:[%s2765_s3 + $0x110] sm:$0xff]   ;;  %v2124_v48 = vld [vmem:[%s2765_s3 + $0x118] sm:$0xff]  }
  0x22   : > { %s1534_s27 = sshll.u32 %s331_s16, 2  ;;  %s1536_s17 = sshll.u32 %s341_s8, 2  ;;  %v2123_v47 = vld [vmem:[%s2765_s3 + $0x150] sm:$0xff]   ;;  %v2125_v49 = vld [vmem:[%s2765_s3 + $0x158] sm:$0xff]   ;;  %v2126_v51 = vld [vmem:[%s2765_s3 + $0x120] sm:$0xff]  }
  0x23   : > { %s333_s14 = scalar_lea.vmem %s2774_s0, %s1534_s27  ;;  %1837 = vmatpush3.bf16.msra.mxu0 %v2090_v7  ;;  %s2516_s15 = scalar_lea.vmem %s2775_s1, %s1536_s17  ;;  %v2127_v52 = vld [vmem:[%s2765_s3 + $0x160] sm:$0xff]   ;;  %v2128_v54 = vld [vmem:[%s2765_s3 + $0x128] sm:$0xff]   ;;  %v2130_v57 = vld [vmem:[%s2765_s3 + $0x130] sm:$0xff]  }
  0x24   : > { %1857 = vmatpush3.bf16.msra.mxu1 %v2091_v8  ;;  %1838 = vmatprep.subr.bf16.mxu0 %v2255_v1  ;;  %v365_v11 = vld [vmem:[%s333_s14] sm:$0xf]  ;;  %v366_v12 = vld [vmem:[%s333_s14 + $0x4] sm:$0x1]  ;;  %v2129_v55 = vld [vmem:[%s2765_s3 + $0x168] sm:$0xff]   ;;  %s2793_s10 = smov (!%p348_p1, %s345_s10), 9 }
  0x25   : > { %1858 = vmatprep.subr.bf16.mxu1 %v2255_v1  ;;  %v2416_v13 = vcombine.low %v365_v11, %v366_v12  ;;  %v697_v42 = vld [vmem:[%s2516_s15] sm:$0xf]  ;;  %v698_v50 = vld [vmem:[%s2516_s15 + $0x4] sm:$0x1]  ;;  %v2131_v58 = vld [vmem:[%s2765_s3 + $0x170] sm:$0xff]   ;;  %s1537_s8 = sshll.u32 %s2793_s10, 1 }
  0x26   : > { %v1638_v53 = vcombine.low %v697_v42, %v698_v50  ;;  %v2132_v61 = vld [vmem:[%s2765_s3 + $0x138] sm:$0xff]   ;;  %v2134_v0 = vld [vmem:[%s2765_s3 + $0x180] sm:$0xff]   ;;  %v2136_v4 = vld [vmem:[%s2765_s3 + $0x188] sm:$0xff]   ;;  %s352_s29 = sadd.s32 %s2389_s12, %s1537_s8  ;;  %s1539_s14 = sshll.u32 %s2380_s30, 3 }
  0x27   : > { %1839 = vmatpush3.bf16.msra.mxu0 %v2092_v9  ;;  %v408_v16 = vshll.u32 %v2416_v13, 16  ;;  %v406_v19 = vshrl.u32 %v2416_v13, 16  ;;  %v606_v40 = vrot.slane %v2416_v13, 1  ;;  %v2133_v62 = vld [vmem:[%s2765_s3 + $0x178] sm:$0xff]   ;;  %v2135_v3 = vld [vmem:[%s2765_s3 + $0x1c0] sm:$0xff]   ;;  %v2137_v5 = vld [vmem:[%s2765_s3 + $0x1c8] sm:$0xff]  }
  0x28   : > { %1859 = vmatpush3.bf16.msra.mxu1 %v2093_v10  ;;  %1840 = vmatprep.subr.bf16.mxu0 %v2255_v1  ;;  %v830_v56 = vshll.u32 %v1638_v53, 16  ;;  %v828_v59 = vshrl.u32 %v1638_v53, 16  ;;  %v941_v2 = vrot.slane %v1638_v53, 1  ;;  %v2138_v6 = vld [vmem:[%s2765_s3 + $0x190] sm:$0xff]   ;;  %s1538_s10 = sshll.u32 %s352_s29, 2  ;;  %v2140_v8 = vld [vmem:[%s2765_s3 + $0x198] sm:$0xff]  }
  0x29   : > { %1860 = vmatprep.subr.bf16.mxu1 %v2255_v1  ;;  %v410_v20 = vrot.slane %v408_v16, 1  ;;  %v2139_v7 = vld [vmem:[%s2765_s3 + $0x1d0] sm:$0xff]   ;;  %v2141_v9 = vld [vmem:[%s2765_s3 + $0x1d8] sm:$0xff]   ;;  %s354_s16 = scalar_lea.vmem %s2764_s2, %s1538_s10  ;;  %v2142_v10 = vld [vmem:[%s2765_s3 + $0x1a0] sm:$0xff]   ;;  %s1382_s10 = sadd.s32 %s2237_s21, %s1745_s26 }
  0x2a   : > { %v832_v60 = vrot.slane %v830_v56, 1  ;;  %v1032_v12 = vld [vmem:[%s354_s16] sm:$0xf]  ;;  %v1033_v13 = vld [vmem:[%s354_s16 + $0x4] sm:$0x1]  ;;  %v2145_v16 = vld [vmem:[%s2765_s3 + $0x1e8] sm:$0xff]  }
  0x2b   : > { %1841 = vmatpush3.bf16.msra.mxu0 %v2094_v14  ;;  %v411_v23 = vor.u32 %v410_v20, %v406_v19  ;;  %v2144_v14 = vld [vmem:[%s2765_s3 + $0x1a8] sm:$0xff]   ;;  %v2147_v19 = vld [vmem:[%s2765_s3 + $0x1f0] sm:$0xff]   ;;  %v2148_v20 = vld [vmem:[%s2765_s3 + $0x1b8] sm:$0xff]   ;;  %s359_s12 = scalar_select %p358_p2, %s2237_s21, 7 }
  0x2c   : > { %1861 = vmatpush3.bf16.msra.mxu1 %v2095_v15  ;;  %1842 = vmatprep.subr.bf16.mxu0 %v2255_v1  ;;  %v833_v63 = vor.u32 %v832_v60, %v828_v59  ;;  %v1711_v15 = vcombine.low %v1032_v12, %v1033_v13  ;;  %s322_s16 = sand.u32 1, %s2229_s19   ;;  %s1746_s13 = sshll.u32 %s1382_s10, 7 }
  0x2d   : > { %1862 = vmatprep.subr.bf16.mxu1 %v2255_v1  ;;  %s361_s8 = sadd.s32 %s1539_s14, %s359_s12  ;;  %s1532_s29 = sshll.u32 %s322_s16, 3 }
  0x2e   : > { %s1540_s15 = sshll.u32 %s361_s8, 3  ;;  %s324_s0 = scalar_lea.vmem [#allocation2], %s1532_s29 }
  0x2f   : > { %1843 = vmatpush3.bf16.msra.mxu0 %v2096_v17  ;;  %v2146_v17 = vld [vmem:[%s2765_s3 + $0x1b0] sm:$0xff]   ;;  %s363_s9 = scalar_lea.vmem %s2766_s4, %s1540_s15  ;;  %s1386_s1 = sshll.u32 %s324_s0, 4  ;;  %s2711_s1 = int_to_ptr.vmem [resolvable:$true] %s1386_s1 }
  0x30   : > { %1863 = vmatpush3.bf16.msra.mxu1 %v2097_v18  ;;  %1844 = vmatprep.subr.bf16.mxu0 %v2255_v1  ;;  %v1165_v18 = vshll.u32 %v1711_v15, 16  ;;  %s2709_s22 = scalar_lea.hbm %s2767_s5, %s1746_s13  ;;  %s1371_s21 = scalar_lea.sflag [#allocation3], %s322_s16 }
  0x31   : > { %1864 = vmatprep.subr.bf16.mxu1 %v2255_v1  ;;  %s2159_s14 = scalar_lea.vmem %s2711_s1, 128  ;;  %s2257_s8 = smov [#allocation2]  }
  0x32   : > { %p2160_p4 = scmp.ne.s32.totalorder %s2711_s1, %s2159_s14  ;;  %s2163_s15 = sshll.u32 %s2257_s8, 4  ;;  %s2164_s15 = int_to_ptr.vmem [resolvable:$false] %s2163_s15 }
  0x33   : > { %1845 = vmatpush3.bf16.msra.mxu0 %v2098_v21  ;;  %v1163_v21 = vshrl.u32 %v1711_v15, 16  ;;  %s2165_s29 = scalar_lea.vmem %s2164_s15, 256  ;;  %p2166_p7 = scmp.lt.s32.totalorder %s2711_s1, %s2164_s15 }
  0x34   : > { %1865 = vmatpush3.bf16.msra.mxu1 %v2099_v22  ;;  %1870 = vmatprep.subr.bf16.mxu0 %v2255_v1  ;;  %v1167_v22 = vrot.slane %v1165_v18, 1  ;;  %p2161_p5 = pnand %p2160_p4, %p2339_p3  ;;  %p2167_p9 = scmp.lt.s32.totalorder %s2165_s29, %s2159_s14 }
  0x35   : > { %1890 = vmatprep.subr.bf16.mxu1 %v2255_v1 }
  0x36   : > { %1847 = vmatmul.mubr.bf16.vlgmr.msra.gmra.mrb[0].mxu0 %v411_v23  ;;  %v2149_v23 = vld [vmem:[%s2765_s3 + $0x1f8] sm:$0xff]   ;;  %p2162_p6 = pneg %p2161_p5  ;;  %p2168_p10 = por %p2167_p9, %p2166_p7 }
  0x37   : > { %1867 = vmatmul.mubr.bf16.vlgmr.msra.gmra.mrb[0].mxu1 %v365_v11  ;;  %1871 = vmatpush3.bf16.msra.mxu0 %v2101_v24  ;;  %v2143_v11 = vld [vmem:[%s2765_s3 + $0x1e0] sm:$0xff]  }
  0x38   : > { %1891 = vmatpush3.bf16.msra.mxu1 %v2102_v25  ;;  %1872 = vmatprep.subr.bf16.mxu0 %v2255_v1  ;;  %v2151_v24 = vld [vmem:[%s2765_s3 + $0x200] sm:$0xff]   ;;  %v1168_v25 = vor.u32 %v1167_v22, %v1163_v21  ;;  %p2169_p11 = pnand %p2168_p10, %p2162_p6 }
  0x39   : > { %1892 = vmatprep.subr.bf16.mxu1 %v2255_v1  ;;  %1886 = vmatprep.mubr.msk.bf16.mxu0 %vm2256_vm0, %v2255_v1 }
  0x3a   : > { %1906 = vmatprep.mubr.msk.bf16.mxu1 %vm2256_vm0, %v2255_v1 }
  0x3b   : > { %1873 = vmatpush3.bf16.msra.mxu0 %v2103_v26  ;;  %v2152_v26 = vld [vmem:[%s2765_s3 + $0x208] sm:$0xff]  }
  0x3c   : > { %1893 = vmatpush3.bf16.msra.mxu1 %v2104_v27  ;;  %1874 = vmatprep.subr.bf16.mxu0 %v2255_v1  ;;  %v2153_v27 = vld [vmem:[%s2765_s3 + $0x210] sm:$0xff]  }
  0x3d   : > { %1894 = vmatprep.subr.bf16.mxu1 %v2255_v1 }
  0x3f   : > { %1875 = vmatpush3.bf16.msra.mxu0 %v2105_v28  ;;  %v2154_v28 = vld [vmem:[%s2765_s3 + $0x218] sm:$0xff]  }
  0x40   : > { %1895 = vmatpush3.bf16.msra.mxu1 %v2106_v29  ;;  %1876 = vmatprep.subr.bf16.mxu0 %v2255_v1  ;;  %v2155_v29 = vld [vmem:[%s2765_s3 + $0x220] sm:$0xff]  }
  0x41   : > { %1896 = vmatprep.subr.bf16.mxu1 %v2255_v1 }
  0x43   : > { %1877 = vmatpush3.bf16.msra.mxu0 %v2107_v30  ;;  %v2156_v30 = vld [vmem:[%s2765_s3 + $0x228] sm:$0xff]  }
  0x44   : > { %1897 = vmatpush3.bf16.msra.mxu1 %v2108_v31  ;;  %1878 = vmatprep.subr.bf16.mxu0 %v2255_v1  ;;  %v2157_v31 = vld [vmem:[%s2765_s3 + $0x230] sm:$0xff]  }
  0x45   : > { %1898 = vmatprep.subr.bf16.mxu1 %v2255_v1 }
  0x47   : > { %1879 = vmatpush3.bf16.msra.mxu0 %v2109_v32  ;;  %v2158_v32 = vld [vmem:[%s2765_s3 + $0x238] sm:$0xff]  }
  0x48   : > { %1899 = vmatpush3.bf16.msra.mxu1 %v2110_v33  ;;  %1880 = vmatprep.subr.bf16.mxu0 %v2255_v1  ;;  %v1276_v33 = vrot.slane %v1711_v15, 1 }
  0x49   : > { %1900 = vmatprep.subr.bf16.mxu1 %v2255_v1 }
  0x4b   : > { %1881 = vmatpush3.bf16.msra.mxu0 %v2111_v34 }
  0x4c   : > { %1901 = vmatpush3.bf16.msra.mxu1 %v2112_v35  ;;  %1882 = vmatprep.subr.bf16.mxu0 %v2255_v1 }
  0x4d   : > { %1902 = vmatprep.subr.bf16.mxu1 %v2255_v1 }
  0x4f   : > { %1883 = vmatpush3.bf16.msra.mxu0 %v2113_v36 }
  0x50   : > { %1903 = vmatpush3.bf16.msra.mxu1 %v2114_v37  ;;  %1884 = vmatprep.subr.bf16.mxu0 %v2255_v1 }
  0x51   : > { %1904 = vmatprep.subr.bf16.mxu1 %v2255_v1 }
  0x53   : > { %1885 = vmatpush3.bf16.msra.mxu0 %v2115_v38 }
  0x54   : > { %1905 = vmatpush3.bf16.msra.mxu1 %v2116_v39  ;;  %1910 = vmatprep.subr.bf16.mxu0 %v2255_v1 }
  0x55   : > { %1930 = vmatprep.subr.bf16.mxu1 %v2255_v1 }
  0x56   : > { %1887 = vmatmul.mubr.bf16.vlgmr.msra.gmra.mrb[4].mxu0 %v606_v40 }
  0x57   : > { %1911 = vmatpush3.bf16.msra.mxu0 %v2117_v41  ;;  %1907 = vmatmul.mubr.bf16.vlgmr.msra.gmra.mrb[4].mxu1 %v697_v42 }
  0x58   : > { %1931 = vmatpush3.bf16.msra.mxu1 %v2119_v43  ;;  %1912 = vmatprep.subr.bf16.mxu0 %v2255_v1 }
  0x59   : > { %1932 = vmatprep.subr.bf16.mxu1 %v2255_v1  ;;  %1926 = vmatprep.mubr.msk.bf16.mxu0 %vm2256_vm0, %v2255_v1 }
  0x5a   : > { %1946 = vmatprep.mubr.msk.bf16.mxu1 %vm2256_vm0, %v2255_v1 }
  0x5b   : > { %1913 = vmatpush3.bf16.msra.mxu0 %v2120_v44 }
  0x5c   : > { %1933 = vmatpush3.bf16.msra.mxu1 %v2121_v45  ;;  %1914 = vmatprep.subr.bf16.mxu0 %v2255_v1 }
  0x5d   : > { %1934 = vmatprep.subr.bf16.mxu1 %v2255_v1 }
  0x5f   : > { %1915 = vmatpush3.bf16.msra.mxu0 %v2122_v46 }
  0x60   : > { %1935 = vmatpush3.bf16.msra.mxu1 %v2123_v47  ;;  %1916 = vmatprep.subr.bf16.mxu0 %v2255_v1 }
  0x61   : > { %1936 = vmatprep.subr.bf16.mxu1 %v2255_v1 }
  0x63   : > { %1917 = vmatpush3.bf16.msra.mxu0 %v2124_v48 }
  0x64   : > { %1937 = vmatpush3.bf16.msra.mxu1 %v2125_v49  ;;  %1918 = vmatprep.subr.bf16.mxu0 %v2255_v1 }
  0x65   : > { %1938 = vmatprep.subr.bf16.mxu1 %v2255_v1 }
  0x67   : > { %1919 = vmatpush3.bf16.msra.mxu0 %v2126_v51 }
  0x68   : > { %1939 = vmatpush3.bf16.msra.mxu1 %v2127_v52  ;;  %1920 = vmatprep.subr.bf16.mxu0 %v2255_v1 }
  0x69   : > { %1940 = vmatprep.subr.bf16.mxu1 %v2255_v1 }
  0x6b   : > { %1921 = vmatpush3.bf16.msra.mxu0 %v2128_v54 }
  0x6c   : > { %1941 = vmatpush3.bf16.msra.mxu1 %v2129_v55  ;;  %1922 = vmatprep.subr.bf16.mxu0 %v2255_v1 }
  0x6d   : > { %1942 = vmatprep.subr.bf16.mxu1 %v2255_v1 }
  0x6f   : > { %1923 = vmatpush3.bf16.msra.mxu0 %v2130_v57 }
  0x70   : > { %1943 = vmatpush3.bf16.msra.mxu1 %v2131_v58  ;;  %1924 = vmatprep.subr.bf16.mxu0 %v2255_v1 }
  0x71   : > { %1944 = vmatprep.subr.bf16.mxu1 %v2255_v1 }
  0x73   : > { %1925 = vmatpush3.bf16.msra.mxu0 %v2132_v61 }
  0x74   : > { %1945 = vmatpush3.bf16.msra.mxu1 %v2133_v62  ;;  %1950 = vmatprep.subr.bf16.mxu0 %v2255_v1 }
  0x75   : > { %1970 = vmatprep.subr.bf16.mxu1 %v2255_v1 }
  0x76   : > { %1927 = vmatmul.mubr.bf16.vlgmr.msra.gmra.mrb[8].mxu0 %v833_v63 }
  0x77   : > { %1951 = vmatpush3.bf16.msra.mxu0 %v2134_v0  ;;  %1947 = vmatmul.mubr.bf16.vlgmr.msra.gmra.mrb[8].mxu1 %v941_v2 }
  0x78   : > { %1971 = vmatpush3.bf16.msra.mxu1 %v2135_v3  ;;  %1952 = vmatprep.subr.bf16.mxu0 %v2255_v1 }
  0x79   : > { %1972 = vmatprep.subr.bf16.mxu1 %v2255_v1  ;;  %1966 = vmatprep.mubr.msk.bf16.mxu0 %vm2256_vm0, %v2255_v1 }
  0x7a   : > { %1986 = vmatprep.mubr.msk.bf16.mxu1 %vm2256_vm0, %v2255_v1 }
  0x7b   : > { %1953 = vmatpush3.bf16.msra.mxu0 %v2136_v4 }
  0x7c   : > { %1973 = vmatpush3.bf16.msra.mxu1 %v2137_v5  ;;  %1954 = vmatprep.subr.bf16.mxu0 %v2255_v1 }
  0x7d   : > { %1974 = vmatprep.subr.bf16.mxu1 %v2255_v1 }
  0x7f   : > { %1955 = vmatpush3.bf16.msra.mxu0 %v2138_v6 }
  0x80   : > { %1975 = vmatpush3.bf16.msra.mxu1 %v2139_v7  ;;  %1956 = vmatprep.subr.bf16.mxu0 %v2255_v1 }
  0x81   : > { %1976 = vmatprep.subr.bf16.mxu1 %v2255_v1 }
  0x83   : > { %1957 = vmatpush3.bf16.msra.mxu0 %v2140_v8 }
  0x84   : > { %1977 = vmatpush3.bf16.msra.mxu1 %v2141_v9  ;;  %1958 = vmatprep.subr.bf16.mxu0 %v2255_v1 }
  0x85   : > { %1978 = vmatprep.subr.bf16.mxu1 %v2255_v1 }
  0x87   : > { %1959 = vmatpush3.bf16.msra.mxu0 %v2142_v10  ;;  %v1367_v10 = vld [vmem:[%s363_s9] sm:$0xff] }
  0x88   : > { %1979 = vmatpush3.bf16.msra.mxu1 %v2143_v11  ;;  %1960 = vmatprep.subr.bf16.mxu0 %v2255_v1 }
  0x89   : > { %1980 = vmatprep.subr.bf16.mxu1 %v2255_v1 }
  0x8b   : > { %1961 = vmatpush3.bf16.msra.mxu0 %v2144_v14 }
  0x8c   : > { %1981 = vmatpush3.bf16.msra.mxu1 %v2145_v16  ;;  %1962 = vmatprep.subr.bf16.mxu0 %v2255_v1 }
  0x8d   : > { %1982 = vmatprep.subr.bf16.mxu1 %v2255_v1 }
  0x8f   : > { %1963 = vmatpush3.bf16.msra.mxu0 %v2146_v17 }
  0x90   : > { %1983 = vmatpush3.bf16.msra.mxu1 %v2147_v19  ;;  %1964 = vmatprep.subr.bf16.mxu0 %v2255_v1 }
  0x91   : > { %1984 = vmatprep.subr.bf16.mxu1 %v2255_v1 }
  0x93   : > { %1965 = vmatpush3.bf16.msra.mxu0 %v2148_v20 }
  0x94   : > { %1985 = vmatpush3.bf16.msra.mxu1 %v2149_v23  ;;  %1990 = vmatprep.subr.bf16.mxu0 %v2255_v1 }
  0x96   : > { %1967 = vmatmul.mubr.bf16.vlgmr.msra.gmra.mrb[12].mxu0 %v1032_v12 }
  0x97   : > { %1991 = vmatpush3.bf16.msra.mxu0 %v2151_v24  ;;  %1987 = vmatmul.mubr.bf16.vlgmr.msra.gmra.mrb[12].mxu1 %v1168_v25 }
  0x98   : > { %1992 = vmatprep.subr.bf16.mxu0 %v2255_v1  ;;  %2006 = vmatprep.mubr.msk.bf16.mxu0 %vm2256_vm0, %v2255_v1 }
  0x9b   : > { %1993 = vmatpush3.bf16.msra.mxu0 %v2152_v26 }
  0x9c   : > { %1994 = vmatprep.subr.bf16.mxu0 %v2255_v1 }
  0x9f   : > { %1995 = vmatpush3.bf16.msra.mxu0 %v2153_v27 }
  0xa0   : > { %1996 = vmatprep.subr.bf16.mxu0 %v2255_v1 }
  0xa3   : > { %1997 = vmatpush3.bf16.msra.mxu0 %v2154_v28 }
  0xa4   : > { %1998 = vmatprep.subr.bf16.mxu0 %v2255_v1 }
  0xa7   : > { %1999 = vmatpush3.bf16.msra.mxu0 %v2155_v29 }
  0xa8   : > { %2000 = vmatprep.subr.bf16.mxu0 %v2255_v1 }
  0xab   : > { %2001 = vmatpush3.bf16.msra.mxu0 %v2156_v30 }
  0xac   : > { %2002 = vmatprep.subr.bf16.mxu0 %v2255_v1 }
  0xaf   : > { %2003 = vmatpush3.bf16.msra.mxu0 %v2157_v31 }
  0xb0   : > { %2004 = vmatprep.subr.bf16.mxu0 %v2255_v1 }
  0xb3   : > { %2005 = vmatpush3.bf16.msra.mxu0 %v2158_v32 }
  0xb6   : > { %2007 = vmatmul.mubr.bf16.vlgmr.msra.gmra.mrb[16].mxu0 %v1276_v33 }
 0x109   : > { %v495_v34 = vpop.f32.mrb[0].mxu0 }
 0x10a   : > { %v1848_v35 = vpop.f32.mrb[1].mxu0  ;;  %v583_v36 = vpop.f32.mrb[0].mxu1 }
 0x10b   : > { %v584_v37 = vadd.f32 %v583_v36, %v495_v34  ;;  %v498_v38 = vpop.f32.mrb[2].mxu0  ;;  %v1868_v39 = vpop.f32.mrb[1].mxu1 }
 0x10c   : > { %v1849_v40 = vpop.f32.mrb[3].mxu0  ;;  %v586_v41 = vpop.f32.mrb[2].mxu1 }
 0x10d   : > { %v1869_v42 = vpop.f32.mrb[3].mxu1 }
 0x129   : > { %v690_v43 = vpop.f32.mrb[4].mxu0 }
 0x12a   : > { %v696_v44 = vadd.f32 %v690_v43, %v584_v37  ;;  %v1888_v45 = vpop.f32.mrb[5].mxu0  ;;  %v798_v46 = vpop.f32.mrb[4].mxu1 }
 0x12b   : > { %v693_v47 = vpop.f32.mrb[6].mxu0  ;;  %v1908_v48 = vpop.f32.mrb[5].mxu1 }
 0x12c   : > { %v804_v49 = vadd.f32 %v798_v46, %v696_v44  ;;  %v1889_v1 = vpop.f32.mrb[7].mxu0  ;;  %v801_v50 = vpop.f32.mrb[6].mxu1 }
 0x12d   : > { %v1909_v51 = vpop.f32.mrb[7].mxu1 }
 0x149   : > { %v917_v52 = vpop.f32.mrb[8].mxu0 }
 0x14a   : > { %v923_v53 = vadd.f32 %v917_v52, %v804_v49  ;;  %v1928_v54 = vpop.f32.mrb[9].mxu0  ;;  %v1025_v55 = vpop.f32.mrb[8].mxu1 }
 0x14b   : > { %v920_v56 = vpop.f32.mrb[10].mxu0  ;;  %v1948_v57 = vpop.f32.mrb[9].mxu1 }
 0x14c   : > { %v1031_v58 = vadd.f32 %v1025_v55, %v923_v53  ;;  %v1929_v59 = vpop.f32.mrb[11].mxu0  ;;  %v1028_v60 = vpop.f32.mrb[10].mxu1 }
 0x14d   : > { %v1949_v61 = vpop.f32.mrb[11].mxu1 }
 0x169   : > { %v1133_v62 = vpop.f32.mrb[12].mxu0 }
 0x16a   : > { %v1139_v63 = vadd.f32 %v1133_v62, %v1031_v58  ;;  %v1968_v0 = vpop.f32.mrb[13].mxu0  ;;  %v1252_v2 = vpop.f32.mrb[12].mxu1 }
 0x16b   : > { %v1136_v3 = vpop.f32.mrb[14].mxu0  ;;  %v1988_v4 = vpop.f32.mrb[13].mxu1 }
 0x16c   : > { %v1258_v5 = vadd.f32 %v1252_v2, %v1139_v63  ;;  %v1969_v6 = vpop.f32.mrb[15].mxu0  ;;  %v1255_v7 = vpop.f32.mrb[14].mxu1 }
 0x16d   : > { %v1989_v8 = vpop.f32.mrb[15].mxu1 }
 0x189   : > { %v1360_v9 = vpop.f32.mrb[16].mxu0 }
 0x18a   : > { %v1366_v11 = vadd.f32 %v1360_v9, %v1258_v5  ;;  %v2008_v12 = vpop.f32.mrb[17].mxu0 }
 0x18b   : > { %v1363_v13 = vpop.f32.mrb[18].mxu0 }
 0x18c   : > { %v1368_v14 = vadd.f32 %v1367_v10, %v1366_v11  ;;  %v2009_v15 = vpop.f32.mrb[19].mxu0 }
 0x18e   : > { %1369 = vst [vmem:[%s324_s0] sm:$0xff] %v1368_v14 }
 0x18f   : > { %2172 = shalt.err (!%p2169_p11)
}
 0x190   : > { %s2173_s0 = scalar_lea.hbm %s2709_s22, 128  ;;  %s2177_s17 = scalar_lea.hbm %s2767_s5, 2048 }
 0x191   : > { %p2174_p12 = scmp.ne.s32.totalorder %s2709_s22, %s2173_s0  ;;  %p2178_p1 = scmp.lt.u32.totalorder %s2709_s22, %s2767_s5 }
 0x192   : > { %p2179_p2 = scmp.lt.u32.totalorder %s2177_s17, %s2173_s0  ;;  %p2181_p5 = scmp.lt.u32.totalorder %s2173_s0, %s2709_s22 }
 0x193   : > { %p2175_p13 = pnand %p2174_p12, %p2339_p3 }
 0x194   : > { %p2180_p4 = por %p2179_p2, %p2178_p1 }
 0x195   : > { %p2176_p0 = pneg %p2175_p13 }
 0x196   : > { %p2182_p6 = por %p2181_p5, %p2180_p4 }
 0x198   : > { %p2183_p7 = pnand %p2182_p6, %p2176_p0 }
 0x19a   : > { %2186 = shalt.err (!%p2183_p7)
}
 0x19b   : > { %2011 = dma.vmem_to_hbm [thread:$0]  (%p2339_p3), %s2711_s1, 128, %s2709_s22, %s1371_s21  }
 0x19c PF: > { %p2017_p9 = scmp.ge.s32.totalorder %s2253_s25, 2  ;;  %s1398_s10 = sand.u32 1, %s2225_s18  }
 0x19d   : > { %s1399_s13 = scalar_lea.sflag [#allocation3], %s1398_s10 }
 0x19e   : > { %p2014_p10 = pnand %p2017_p9, %p2348_p8 }
 0x1a0   : > { %2220 = dma.done.wait (!%p2014_p10), %s1399_s13, 128  }
 0x1a1   : > { %2222 = vsyncadd (!%p2014_p10), %s1399_s13, 4294967168  ;;  %s18_s25 = sadd.s32 1, %s2253_s25   ;;  %s2776_s1 = sld [smem:[#allocation5_spill]] }
 0x1a2   : > { %p15_p11 = scmp.ge.s32.totalorder %s18_s25, 18   ;;  %s2777_s18 = smov %s2229_s19 }
 0x1a3   : > { %s2778_s19 = smov %s2233_s20  ;;  %s2779_s20 = smov %s2357_s11 }
 0x1a4   : > { %s2780_s21 = smov %s2245_s23  ;;  %s2781_s22 = smov %s2249_s24 }
 0x1a5   : > { %s2782_s23 = smov %s2785_s28  ;;  %17 = sbr.rel (!%p15_p11) target bundleno = 8 (0x8), region = 92 }
 0x1a7   : > { %s2783_s24 = smov %s2776_s1 }
 0x1ac   :  { %1404 = vsyncpa [#allocation3], 1 }
 0x1ad   :  { %1406 = vsyncpa [#allocation3 + $0x1], 1 }

</bundles_post_ra>
